<compile_context>
chip_gen: v7x
topology: tpu7x:2x2x1
jax: 0.10.0
libtpu: 0.0.40
codegen_flags: <defaults>
</compile_context>

<pallas_src>
import jax
import jax.numpy as jnp
import numpy as np
from jax.experimental import pallas as pl
from jax.experimental.pallas import tpu as pltpu

# ---- FaceNeRF default hyper-parameters (dim_expr = dim_latent = 0, use_viewdirs) ----
D = 8
W = 256
INPUT_CH = 63          # xyz positional encoding
INPUT_CH_VIEWS = 27    # view-dir positional encoding
DIM_AUD = 64
SKIPS = (4,)

IN_ALL = INPUT_CH + DIM_AUD          # 127 (input_ch_all in the reference)
SKIP_IN = IN_ALL + W                 # 383 (unsplit skip-layer fan-in)
VIEWS_IN = W + INPUT_CH_VIEWS        # 283 (unsplit first view-layer fan-in)
W_HALF = W // 2                      # 128
N_VIEW_LAYERS = 1 + D // 4           # 3

IN_PAD = 128                         # xyz encoding padded 63 -> 128 lanes
VIEWS_PAD = 128                      # view encoding padded 27 -> 128 lanes
XIN_W = IN_PAD + VIEWS_PAD           # 256-lane combined data operand
OUT_PAD = 128                        # lane-dense output slab (real outputs in [:4])


# ----------------------------------- kernel ----------------------------------------

def face_nerf_kernel(xin_ref, w_in_ref, b_pts_ref, w_pts_ref, w_v0a_ref, w_v_ref,
                     b_v_ref, out_ref):
    f32 = jnp.float32
    bf16 = jnp.bfloat16

    xin = xin_ref[...]                       # (TB, 256) bf16
    pts = xin[:, :IN_PAD]                    # lanes 0..62 real (aud folded into biases)
    views = xin[:, IN_PAD:]                  # lanes 0..26 real

    # ---- pts stack: 8 Linear+ReLU layers, skip re-injection at layer 5 via a split
    # matmul (concat-free).  The row-constant audio contribution is pre-folded into
    # b_pts rows 0 and 5.  Bias+ReLU+bf16-cast are fused so only the bf16 activation
    # survives between layers.
    h = jnp.maximum(
        jnp.dot(pts, w_in_ref[0], preferred_element_type=f32) + b_pts_ref[0], 0.0
    ).astype(bf16)
    for i in range(1, D):
        acc = jnp.dot(h, w_pts_ref[i - 1], preferred_element_type=f32)
        if (i - 1) in SKIPS:
            acc = acc + jnp.dot(pts, w_in_ref[1], preferred_element_type=f32)
        h = jnp.maximum(acc + b_pts_ref[i], 0.0).astype(bf16)

    # use_viewdirs branch.  feature_linear is defined but never used by the PyTorch
    # forward (feature = h), so no extra matmul here.

    # Packed matmul: cols 0..127 = view-layer-0 h-part, col 131 = alpha head column.
    # One K=256,N=256 MXU pass replaces two half-occupancy K=256,N=128 passes.
    r = jnp.dot(h, w_v0a_ref[...], preferred_element_type=f32)      # (TB, 256)
    out_acc = r[:, W_HALF:]                                         # lane 3 = alpha

    # ---- view stack (layer 0 split into h-part + views-part, concat-free) ----
    hv = jnp.maximum(
        r[:, :W_HALF]
        + jnp.dot(views, w_v_ref[0], preferred_element_type=f32)
        + b_v_ref[0], 0.0
    ).astype(bf16)
    for i in range(1, N_VIEW_LAYERS):
        hv = jnp.maximum(
            jnp.dot(hv, w_v_ref[i], preferred_element_type=f32) + b_v_ref[i], 0.0
        ).astype(bf16)

    # rgb head -> lanes 0..2; alpha already sits in lane 3 of out_acc.
    out_acc = out_acc + jnp.dot(hv, w_v_ref[N_VIEW_LAYERS], preferred_element_type=f32)

    # single unmasked lane-dense 128-wide store: [rgb(3) | alpha(1) | zeros(124)]
    out_ref[...] = (out_acc + b_v_ref[N_VIEW_LAYERS]).astype(out_ref.dtype)


# ----------------------------- parameter construction -----------------------------

def _linear(key, fan_in, fan_out):
    """PyTorch-style nn.Linear init, stored as [in, out]."""
    kw, kb = jax.random.split(key)
    bound = 1.0 / np.sqrt(fan_in)
    w = jax.random.uniform(kw, (fan_in, fan_out), jnp.float32, -bound, bound)
    b = jax.random.uniform(kb, (1, fan_out), jnp.float32, -bound, bound)
    return w, b


def init_raw_params(key):
    keys = jax.random.split(key, D + N_VIEW_LAYERS + 3)
    k = iter(keys)
    pw, pb = [], []
    # pts_linears: layer 0: IN_ALL -> W; layer 5 (after skip at 4): IN_ALL + W -> W; else W -> W
    for i in range(D):
        if i == 0:
            fin = IN_ALL
        elif (i - 1) in SKIPS:
            fin = SKIP_IN
        else:
            fin = W
        w, b = _linear(next(k), fin, W)
        pw.append(w); pb.append(b)
    vw, vb = [], []
    for i in range(N_VIEW_LAYERS):
        fin = VIEWS_IN if i == 0 else W_HALF
        w, b = _linear(next(k), fin, W_HALF)
        vw.append(w); vb.append(b)
    aw, ab = _linear(next(k), W, 1)
    rw, rb = _linear(next(k), W_HALF, 3)
    # feature_linear (W -> W) exists in __init__ but is never used in forward.
    _ = _linear(next(k), W, W)
    return pw, pb, vw, vb, aw, ab, rw, rb


def prepare_params(raw):
    """Pad / split / stack / cast weights for the kernel.

    - zero-pad weight rows so padded activation lanes contribute exactly 0
    - split the skip layer and the first view layer to avoid in-kernel concatenates
    - keep the aud weight rows separate (folded into biases per forward call)
    - pack the alpha head into the first view-layer weight (cols 128..255, col 131)
    - stack like-shaped weights/biases to minimize ref / DMA-descriptor count
    - matmul weights in bf16; biases in f32
    """
    pw, pb, vw, vb, aw, ab, rw, rb = raw
    bf16 = jnp.bfloat16
    f32 = jnp.float32

    # input-side weights (xyz part only; aud rows handled via bias fold)
    w0 = pw[0]                                  # (127, 256)
    w5 = pw[1 + SKIPS[0]]                       # (383, 256): [initial(127) | h(256)]
    w0_pts = jnp.zeros((IN_PAD, W), f32).at[:INPUT_CH].set(w0[:INPUT_CH])
    w5_pts = jnp.zeros((IN_PAD, W), f32).at[:INPUT_CH].set(w5[:INPUT_CH])
    w_in = jnp.stack([w0_pts, w5_pts], 0).astype(bf16)                   # (2,128,256)

    # aud weight rows (bf16 so the wrapper-side fold matches the MXU's bf16 operands)
    w_aud = jnp.stack([w0[INPUT_CH:IN_ALL], w5[INPUT_CH:IN_ALL]], 0).astype(bf16)  # (2,64,256)

    # hidden-to-hidden pts weights: layers 1..7 (skip layer uses only its h-part here)
    hs = []
    for i in range(1, D):
        wi = pw[i]
        if (i - 1) in SKIPS:
            wi = wi[IN_ALL:]                    # (256, 256) h-part
        hs.append(wi)
    w_pts = jnp.stack(hs, 0).astype(bf16)                                 # (7,256,256)

    b_pts = jnp.stack([b.reshape(1, W) for b in pb], 0).astype(f32)       # (8,1,256)

    # packed first view-layer h-part + alpha head column (lane 131 -> output lane 3)
    v0 = vw[0]                                  # (283, 128): [h(256) | views(27)]
    w_v0a = (jnp.zeros((W, 2 * W_HALF), f32)
             .at[:, :W_HALF].set(v0[:W])
             .at[:, W_HALF + 3:W_HALF + 4].set(aw)).astype(bf16)          # (256,256)

    v0_views = jnp.zeros((VIEWS_PAD, W_HALF), f32).at[:INPUT_CH_VIEWS].set(v0[W:])
    rgb_pad = jnp.zeros((W_HALF, OUT_PAD), f32).at[:, :3].set(rw)
    w_v = jnp.stack([v0_views] + [vw[i] for i in range(1, N_VIEW_LAYERS)] + [rgb_pad],
                    0).astype(bf16)                                       # (4,128,128)

    head_b = jnp.zeros((1, OUT_PAD), f32).at[:, 0:3].set(rb).at[:, 3:4].set(ab)
    b_v = jnp.stack([vb[i].reshape(1, W_HALF) for i in range(N_VIEW_LAYERS)] + [head_b],
                    0).astype(f32)                                        # (4,1,128)

    return dict(w_in=w_in, w_aud=w_aud, w_pts=w_pts, b_pts=b_pts,
                w_v0a=w_v0a, w_v=w_v, b_v=b_v)


# ----------------------------------- wrapper ---------------------------------------

def _choose_tiling(n):
    """Pick (row_tile, padded_rows).

    - rows are zero-padded to a multiple of the tile (padded rows are sliced off)
    - tile capped at 2048 rows: amortizes the ~0.35us/step fixed cost while keeping
      the VMEM footprint ~12 MiB, well under the 32 MiB limit
    - when n permits, the grid has >= 2 "parallel" steps so both v7x TensorCores get
      work; harmless on 1-TC v5e/v6e.
    """
    if n <= 16:
        tb = -(-n // 8) * 8
    elif n <= 4096:
        tb = -(-(n // 2) // 8) * 8
    else:
        tb = 2048
    n_pad = -(-n // tb) * tb
    return tb, n_pad


def _const_spec(arr):
    zeros = (0,) * arr.ndim
    return pl.BlockSpec(arr.shape, lambda i: zeros)


def face_nerf_forward(x, aud, params):
    N = x.shape[0]
    tb, n_pad = _choose_tiling(N)
    grid_len = n_pad // tb

    bf16 = jnp.bfloat16
    f32 = jnp.float32

    # one lane-dense (n_pad, 256) bf16 operand: xyz enc in lanes 0..62, views in 128..154
    pts = x[:, :INPUT_CH]
    views = x[:, INPUT_CH:INPUT_CH + INPUT_CH_VIEWS]
    xin = (jnp.zeros((n_pad, XIN_W), f32)
           .at[:N, :INPUT_CH].set(pts)
           .at[:N, IN_PAD:IN_PAD + INPUT_CH_VIEWS].set(views)).astype(bf16)

    # fold the row-constant audio contribution into the layer-0 / skip-layer biases
    # (bf16 operands + f32 accumulation, matching the in-kernel MXU numerics)
    aud_b = aud.astype(bf16).reshape(1, DIM_AUD)
    aud0 = jnp.dot(aud_b, params["w_aud"][0], preferred_element_type=f32)     # (1,256)
    aud5 = jnp.dot(aud_b, params["w_aud"][1], preferred_element_type=f32)     # (1,256)
    b_pts = params["b_pts"].at[0].add(aud0).at[1 + SKIPS[0]].add(aud5)

    weights = [params["w_in"], b_pts, params["w_pts"],
               params["w_v0a"], params["w_v"], params["b_v"]]

    data_spec = pl.BlockSpec((tb, XIN_W), lambda i: (i, 0))
    # constant index_map => weights are DMA'd once and stay resident across grid steps.
    # TODO(synk): pipeline_mode=pl.Buffered(1) here would save ~1.3 MiB of double-buffer
    # VMEM; not load-bearing at the current footprint.
    weight_specs = [_const_spec(w) for w in weights]

    out = pl.pallas_call(
        face_nerf_kernel,
        out_shape=jax.ShapeDtypeStruct((n_pad, OUT_PAD), jnp.float32),
        grid_spec=pltpu.PrefetchScalarGridSpec(
            num_scalar_prefetch=0,
            grid=(grid_len,),
            in_specs=[data_spec] + weight_specs,
            out_specs=pl.BlockSpec((tb, OUT_PAD), lambda i: (i, 0)),
        ),
        compiler_params=pltpu.CompilerParams(
            dimension_semantics=("parallel",),
            vmem_limit_bytes=32 << 20,
        ),
    )(xin, *weights)
    return out[:N, :4]


# -------------------------- pure-JAX reference (unpadded) ---------------------------

def reference_forward(x, aud, raw, matmul_dtype=jnp.float32):
    """Reference forward.  matmul_dtype=jnp.bfloat16 mimics the kernel's MXU numerics
    (bf16 operands, f32 accumulation); jnp.float32 is the exact original math."""
    pw, pb, vw, vb, aw, ab, rw, rb = raw
    N = x.shape[0]

    def mm(a, w):
        return jnp.dot(a.astype(matmul_dtype), w.astype(matmul_dtype),
                       preferred_element_type=jnp.float32)

    pts = x[:, :INPUT_CH]
    views = x[:, INPUT_CH:INPUT_CH + INPUT_CH_VIEWS]
    initial = jnp.concatenate([pts, jnp.broadcast_to(aud[None, :], (N, DIM_AUD))], -1)
    h = initial
    for i in range(D):
        h = jnp.maximum(mm(h, pw[i]) + pb[i], 0.0)
        if i in SKIPS:
            h = jnp.concatenate([initial, h], -1)
    alpha = mm(h, aw) + ab
    hv = jnp.concatenate([h, views], -1)
    for i in range(N_VIEW_LAYERS):
        hv = jnp.maximum(mm(hv, vw[i]) + vb[i], 0.0)
    rgb = mm(hv, rw) + rb
    return jnp.concatenate([rgb, alpha], -1)


if __name__ == "__main__":
    key = jax.random.PRNGKey(0)
    k_param, k_x, k_aud = jax.random.split(key, 3)

    N = 256  # number of sampled points (rows)
    x = jax.random.normal(k_x, (N, INPUT_CH + INPUT_CH_VIEWS), jnp.float32)   # (256, 90)
    aud = jax.random.normal(k_aud, (DIM_AUD,), jnp.float32)                   # (64,)

    raw = init_raw_params(k_param)
    params = prepare_params(raw)

    out = jax.block_until_ready(face_nerf_forward(x, aud, params))

    # Tight check against a reference with the same bf16-operand / f32-accumulate matmuls.
    ref_bf16 = jax.block_until_ready(reference_forward(x, aud, raw, jnp.bfloat16))
    np.testing.assert_allclose(np.asarray(out), np.asarray(ref_bf16), rtol=1e-2, atol=5e-4)

    # Loose sanity check against the exact f32 reference (bf16 rounding over a 13-matmul chain).
    ref_f32 = jax.block_until_ready(reference_forward(x, aud, raw, jnp.float32))
    np.testing.assert_allclose(np.asarray(out), np.asarray(ref_f32), rtol=1e-1, atol=2e-2)

    print("KERNEL_OK")
</pallas_src>

<mosaic_0001>
module attributes {stable_mosaic.version = 11 : i64} {
  func.func @face_nerf_kernel(%arg0: i32, %arg1: memref<128x256xbf16, #tpu.memory_space<vmem>>, %arg2: memref<2x128x256xbf16, #tpu.memory_space<vmem>>, %arg3: memref<8x1x256xf32, #tpu.memory_space<vmem>>, %arg4: memref<7x256x256xbf16, #tpu.memory_space<vmem>>, %arg5: memref<256x256xbf16, #tpu.memory_space<vmem>>, %arg6: memref<4x128x128xbf16, #tpu.memory_space<vmem>>, %arg7: memref<4x1x128xf32, #tpu.memory_space<vmem>>, %arg8: memref<128x128xf32, #tpu.memory_space<vmem>>) attributes {dimension_semantics = [#tpu.dimension_semantics<parallel>], iteration_bounds = array<i64: 2>, scalar_prefetch = 0 : i64, scratch_operands = 0 : i64, tpu.core_type = #tpu.core_type<tc>, window_params = [{transform_indices = @transform_0, window_bounds = array<i64: 128, 256>}, {pipeline_mode = #tpu.pipeline_mode<synchronous>, transform_indices = @transform_1, window_bounds = array<i64: 2, 128, 256>}, {pipeline_mode = #tpu.pipeline_mode<synchronous>, transform_indices = @transform_2, window_bounds = array<i64: 8, 1, 256>}, {pipeline_mode = #tpu.pipeline_mode<synchronous>, transform_indices = @transform_3, window_bounds = array<i64: 7, 256, 256>}, {pipeline_mode = #tpu.pipeline_mode<synchronous>, transform_indices = @transform_4, window_bounds = array<i64: 256, 256>}, {pipeline_mode = #tpu.pipeline_mode<synchronous>, transform_indices = @transform_5, window_bounds = array<i64: 4, 128, 128>}, {pipeline_mode = #tpu.pipeline_mode<synchronous>, transform_indices = @transform_6, window_bounds = array<i64: 4, 1, 128>}, {transform_indices = @transform_7, window_bounds = array<i64: 128, 128>}]} {
    %c0 = arith.constant 0 : index
    %c0_0 = arith.constant 0 : index
    %0 = vector.load %arg1[%c0, %c0_0] : memref<128x256xbf16, #tpu.memory_space<vmem>>, vector<128x256xbf16>
    %1 = vector.extract_strided_slice %0 {offsets = [0, 0], sizes = [128, 128], strides = [1, 1]} : vector<128x256xbf16> to vector<128x128xbf16>
    %2 = vector.extract_strided_slice %0 {offsets = [0, 128], sizes = [128, 128], strides = [1, 1]} : vector<128x256xbf16> to vector<128x128xbf16>
    %c0_1 = arith.constant 0 : index
    %c0_2 = arith.constant 0 : index
    %c0_3 = arith.constant 0 : index
    %3 = vector.load %arg2[%c0_1, %c0_2, %c0_3] : memref<2x128x256xbf16, #tpu.memory_space<vmem>>, vector<1x128x256xbf16>
    %4 = vector.shape_cast %3 : vector<1x128x256xbf16> to vector<128x256xbf16>
    %cst = arith.constant dense<0.000000e+00> : vector<128x256xf32>
    %5 = tpu.matmul %1, %4, %cst {dimension_numbers = #tpu.dot_dimension_numbers<[1], [0], [0], [1], [0, 0, 1, 1], [], []>} : vector<128x128xbf16>, vector<128x256xbf16>, vector<128x256xf32> -> vector<128x256xf32>
    %c0_4 = arith.constant 0 : index
    %c0_5 = arith.constant 0 : index
    %c0_6 = arith.constant 0 : index
    %6 = vector.load %arg3[%c0_4, %c0_5, %c0_6] : memref<8x1x256xf32, #tpu.memory_space<vmem>>, vector<1x1x256xf32>
    %7 = vector.shape_cast %6 : vector<1x1x256xf32> to vector<1x256xf32>
    %8 = vector.broadcast %7 : vector<1x256xf32> to vector<128x256xf32>
    %9 = arith.addf %5, %8 : vector<128x256xf32>
    %cst_7 = arith.constant 0.000000e+00 : f32
    %10 = vector.broadcast %cst_7 : f32 to vector<128x256xf32>
    %11 = arith.maximumf %9, %10 : vector<128x256xf32>
    %12 = arith.truncf %11 : vector<128x256xf32> to vector<128x256xbf16>
    %c0_8 = arith.constant 0 : index
    %c0_9 = arith.constant 0 : index
    %c0_10 = arith.constant 0 : index
    %13 = vector.load %arg4[%c0_8, %c0_9, %c0_10] : memref<7x256x256xbf16, #tpu.memory_space<vmem>>, vector<1x256x256xbf16>
    %14 = vector.shape_cast %13 : vector<1x256x256xbf16> to vector<256x256xbf16>
    %cst_11 = arith.constant dense<0.000000e+00> : vector<128x256xf32>
    %15 = tpu.matmul %12, %14, %cst_11 {dimension_numbers = #tpu.dot_dimension_numbers<[1], [0], [0], [1], [0, 0, 1, 1], [], []>} : vector<128x256xbf16>, vector<256x256xbf16>, vector<128x256xf32> -> vector<128x256xf32>
    %c1 = arith.constant 1 : index
    %c0_12 = arith.constant 0 : index
    %c0_13 = arith.constant 0 : index
    %16 = vector.load %arg3[%c1, %c0_12, %c0_13] : memref<8x1x256xf32, #tpu.memory_space<vmem>>, vector<1x1x256xf32>
    %17 = vector.shape_cast %16 : vector<1x1x256xf32> to vector<1x256xf32>
    %18 = vector.broadcast %17 : vector<1x256xf32> to vector<128x256xf32>
    %19 = arith.addf %15, %18 : vector<128x256xf32>
    %cst_14 = arith.constant 0.000000e+00 : f32
    %20 = vector.broadcast %cst_14 : f32 to vector<128x256xf32>
    %21 = arith.maximumf %19, %20 : vector<128x256xf32>
    %22 = arith.truncf %21 : vector<128x256xf32> to vector<128x256xbf16>
    %c1_15 = arith.constant 1 : index
    %c0_16 = arith.constant 0 : index
    %c0_17 = arith.constant 0 : index
    %23 = vector.load %arg4[%c1_15, %c0_16, %c0_17] : memref<7x256x256xbf16, #tpu.memory_space<vmem>>, vector<1x256x256xbf16>
    %24 = vector.shape_cast %23 : vector<1x256x256xbf16> to vector<256x256xbf16>
    %cst_18 = arith.constant dense<0.000000e+00> : vector<128x256xf32>
    %25 = tpu.matmul %22, %24, %cst_18 {dimension_numbers = #tpu.dot_dimension_numbers<[1], [0], [0], [1], [0, 0, 1, 1], [], []>} : vector<128x256xbf16>, vector<256x256xbf16>, vector<128x256xf32> -> vector<128x256xf32>
    %c2 = arith.constant 2 : index
    %c0_19 = arith.constant 0 : index
    %c0_20 = arith.constant 0 : index
    %26 = vector.load %arg3[%c2, %c0_19, %c0_20] : memref<8x1x256xf32, #tpu.memory_space<vmem>>, vector<1x1x256xf32>
    %27 = vector.shape_cast %26 : vector<1x1x256xf32> to vector<1x256xf32>
    %28 = vector.broadcast %27 : vector<1x256xf32> to vector<128x256xf32>
    %29 = arith.addf %25, %28 : vector<128x256xf32>
    %cst_21 = arith.constant 0.000000e+00 : f32
    %30 = vector.broadcast %cst_21 : f32 to vector<128x256xf32>
    %31 = arith.maximumf %29, %30 : vector<128x256xf32>
    %32 = arith.truncf %31 : vector<128x256xf32> to vector<128x256xbf16>
    %c2_22 = arith.constant 2 : index
    %c0_23 = arith.constant 0 : index
    %c0_24 = arith.constant 0 : index
    %33 = vector.load %arg4[%c2_22, %c0_23, %c0_24] : memref<7x256x256xbf16, #tpu.memory_space<vmem>>, vector<1x256x256xbf16>
    %34 = vector.shape_cast %33 : vector<1x256x256xbf16> to vector<256x256xbf16>
    %cst_25 = arith.constant dense<0.000000e+00> : vector<128x256xf32>
    %35 = tpu.matmul %32, %34, %cst_25 {dimension_numbers = #tpu.dot_dimension_numbers<[1], [0], [0], [1], [0, 0, 1, 1], [], []>} : vector<128x256xbf16>, vector<256x256xbf16>, vector<128x256xf32> -> vector<128x256xf32>
    %c3 = arith.constant 3 : index
    %c0_26 = arith.constant 0 : index
    %c0_27 = arith.constant 0 : index
    %36 = vector.load %arg3[%c3, %c0_26, %c0_27] : memref<8x1x256xf32, #tpu.memory_space<vmem>>, vector<1x1x256xf32>
    %37 = vector.shape_cast %36 : vector<1x1x256xf32> to vector<1x256xf32>
    %38 = vector.broadcast %37 : vector<1x256xf32> to vector<128x256xf32>
    %39 = arith.addf %35, %38 : vector<128x256xf32>
    %cst_28 = arith.constant 0.000000e+00 : f32
    %40 = vector.broadcast %cst_28 : f32 to vector<128x256xf32>
    %41 = arith.maximumf %39, %40 : vector<128x256xf32>
    %42 = arith.truncf %41 : vector<128x256xf32> to vector<128x256xbf16>
    %c3_29 = arith.constant 3 : index
    %c0_30 = arith.constant 0 : index
    %c0_31 = arith.constant 0 : index
    %43 = vector.load %arg4[%c3_29, %c0_30, %c0_31] : memref<7x256x256xbf16, #tpu.memory_space<vmem>>, vector<1x256x256xbf16>
    %44 = vector.shape_cast %43 : vector<1x256x256xbf16> to vector<256x256xbf16>
    %cst_32 = arith.constant dense<0.000000e+00> : vector<128x256xf32>
    %45 = tpu.matmul %42, %44, %cst_32 {dimension_numbers = #tpu.dot_dimension_numbers<[1], [0], [0], [1], [0, 0, 1, 1], [], []>} : vector<128x256xbf16>, vector<256x256xbf16>, vector<128x256xf32> -> vector<128x256xf32>
    %c4 = arith.constant 4 : index
    %c0_33 = arith.constant 0 : index
    %c0_34 = arith.constant 0 : index
    %46 = vector.load %arg3[%c4, %c0_33, %c0_34] : memref<8x1x256xf32, #tpu.memory_space<vmem>>, vector<1x1x256xf32>
    %47 = vector.shape_cast %46 : vector<1x1x256xf32> to vector<1x256xf32>
    %48 = vector.broadcast %47 : vector<1x256xf32> to vector<128x256xf32>
    %49 = arith.addf %45, %48 : vector<128x256xf32>
    %cst_35 = arith.constant 0.000000e+00 : f32
    %50 = vector.broadcast %cst_35 : f32 to vector<128x256xf32>
    %51 = arith.maximumf %49, %50 : vector<128x256xf32>
    %52 = arith.truncf %51 : vector<128x256xf32> to vector<128x256xbf16>
    %c4_36 = arith.constant 4 : index
    %c0_37 = arith.constant 0 : index
    %c0_38 = arith.constant 0 : index
    %53 = vector.load %arg4[%c4_36, %c0_37, %c0_38] : memref<7x256x256xbf16, #tpu.memory_space<vmem>>, vector<1x256x256xbf16>
    %54 = vector.shape_cast %53 : vector<1x256x256xbf16> to vector<256x256xbf16>
    %cst_39 = arith.constant dense<0.000000e+00> : vector<128x256xf32>
    %55 = tpu.matmul %52, %54, %cst_39 {dimension_numbers = #tpu.dot_dimension_numbers<[1], [0], [0], [1], [0, 0, 1, 1], [], []>} : vector<128x256xbf16>, vector<256x256xbf16>, vector<128x256xf32> -> vector<128x256xf32>
    %c1_40 = arith.constant 1 : index
    %c0_41 = arith.constant 0 : index
    %c0_42 = arith.constant 0 : index
    %56 = vector.load %arg2[%c1_40, %c0_41, %c0_42] : memref<2x128x256xbf16, #tpu.memory_space<vmem>>, vector<1x128x256xbf16>
    %57 = vector.shape_cast %56 : vector<1x128x256xbf16> to vector<128x256xbf16>
    %cst_43 = arith.constant dense<0.000000e+00> : vector<128x256xf32>
    %58 = tpu.matmul %1, %57, %cst_43 {dimension_numbers = #tpu.dot_dimension_numbers<[1], [0], [0], [1], [0, 0, 1, 1], [], []>} : vector<128x128xbf16>, vector<128x256xbf16>, vector<128x256xf32> -> vector<128x256xf32>
    %59 = arith.addf %55, %58 : vector<128x256xf32>
    %c5 = arith.constant 5 : index
    %c0_44 = arith.constant 0 : index
    %c0_45 = arith.constant 0 : index
    %60 = vector.load %arg3[%c5, %c0_44, %c0_45] : memref<8x1x256xf32, #tpu.memory_space<vmem>>, vector<1x1x256xf32>
    %61 = vector.shape_cast %60 : vector<1x1x256xf32> to vector<1x256xf32>
    %62 = vector.broadcast %61 : vector<1x256xf32> to vector<128x256xf32>
    %63 = arith.addf %59, %62 : vector<128x256xf32>
    %cst_46 = arith.constant 0.000000e+00 : f32
    %64 = vector.broadcast %cst_46 : f32 to vector<128x256xf32>
    %65 = arith.maximumf %63, %64 : vector<128x256xf32>
    %66 = arith.truncf %65 : vector<128x256xf32> to vector<128x256xbf16>
    %c5_47 = arith.constant 5 : index
    %c0_48 = arith.constant 0 : index
    %c0_49 = arith.constant 0 : index
    %67 = vector.load %arg4[%c5_47, %c0_48, %c0_49] : memref<7x256x256xbf16, #tpu.memory_space<vmem>>, vector<1x256x256xbf16>
    %68 = vector.shape_cast %67 : vector<1x256x256xbf16> to vector<256x256xbf16>
    %cst_50 = arith.constant dense<0.000000e+00> : vector<128x256xf32>
    %69 = tpu.matmul %66, %68, %cst_50 {dimension_numbers = #tpu.dot_dimension_numbers<[1], [0], [0], [1], [0, 0, 1, 1], [], []>} : vector<128x256xbf16>, vector<256x256xbf16>, vector<128x256xf32> -> vector<128x256xf32>
    %c6 = arith.constant 6 : index
    %c0_51 = arith.constant 0 : index
    %c0_52 = arith.constant 0 : index
    %70 = vector.load %arg3[%c6, %c0_51, %c0_52] : memref<8x1x256xf32, #tpu.memory_space<vmem>>, vector<1x1x256xf32>
    %71 = vector.shape_cast %70 : vector<1x1x256xf32> to vector<1x256xf32>
    %72 = vector.broadcast %71 : vector<1x256xf32> to vector<128x256xf32>
    %73 = arith.addf %69, %72 : vector<128x256xf32>
    %cst_53 = arith.constant 0.000000e+00 : f32
    %74 = vector.broadcast %cst_53 : f32 to vector<128x256xf32>
    %75 = arith.maximumf %73, %74 : vector<128x256xf32>
    %76 = arith.truncf %75 : vector<128x256xf32> to vector<128x256xbf16>
    %c6_54 = arith.constant 6 : index
    %c0_55 = arith.constant 0 : index
    %c0_56 = arith.constant 0 : index
    %77 = vector.load %arg4[%c6_54, %c0_55, %c0_56] : memref<7x256x256xbf16, #tpu.memory_space<vmem>>, vector<1x256x256xbf16>
    %78 = vector.shape_cast %77 : vector<1x256x256xbf16> to vector<256x256xbf16>
    %cst_57 = arith.constant dense<0.000000e+00> : vector<128x256xf32>
    %79 = tpu.matmul %76, %78, %cst_57 {dimension_numbers = #tpu.dot_dimension_numbers<[1], [0], [0], [1], [0, 0, 1, 1], [], []>} : vector<128x256xbf16>, vector<256x256xbf16>, vector<128x256xf32> -> vector<128x256xf32>
    %c7 = arith.constant 7 : index
    %c0_58 = arith.constant 0 : index
    %c0_59 = arith.constant 0 : index
    %80 = vector.load %arg3[%c7, %c0_58, %c0_59] : memref<8x1x256xf32, #tpu.memory_space<vmem>>, vector<1x1x256xf32>
    %81 = vector.shape_cast %80 : vector<1x1x256xf32> to vector<1x256xf32>
    %82 = vector.broadcast %81 : vector<1x256xf32> to vector<128x256xf32>
    %83 = arith.addf %79, %82 : vector<128x256xf32>
    %cst_60 = arith.constant 0.000000e+00 : f32
    %84 = vector.broadcast %cst_60 : f32 to vector<128x256xf32>
    %85 = arith.maximumf %83, %84 : vector<128x256xf32>
    %86 = arith.truncf %85 : vector<128x256xf32> to vector<128x256xbf16>
    %c0_61 = arith.constant 0 : index
    %c0_62 = arith.constant 0 : index
    %87 = vector.load %arg5[%c0_61, %c0_62] : memref<256x256xbf16, #tpu.memory_space<vmem>>, vector<256x256xbf16>
    %cst_63 = arith.constant dense<0.000000e+00> : vector<128x256xf32>
    %88 = tpu.matmul %86, %87, %cst_63 {dimension_numbers = #tpu.dot_dimension_numbers<[1], [0], [0], [1], [0, 0, 1, 1], [], []>} : vector<128x256xbf16>, vector<256x256xbf16>, vector<128x256xf32> -> vector<128x256xf32>
    %89 = vector.extract_strided_slice %88 {offsets = [0, 128], sizes = [128, 128], strides = [1, 1]} : vector<128x256xf32> to vector<128x128xf32>
    %90 = vector.extract_strided_slice %88 {offsets = [0, 0], sizes = [128, 128], strides = [1, 1]} : vector<128x256xf32> to vector<128x128xf32>
    %c0_64 = arith.constant 0 : index
    %c0_65 = arith.constant 0 : index
    %c0_66 = arith.constant 0 : index
    %91 = vector.load %arg6[%c0_64, %c0_65, %c0_66] : memref<4x128x128xbf16, #tpu.memory_space<vmem>>, vector<1x128x128xbf16>
    %92 = vector.shape_cast %91 : vector<1x128x128xbf16> to vector<128x128xbf16>
    %cst_67 = arith.constant dense<0.000000e+00> : vector<128x128xf32>
    %93 = tpu.matmul %2, %92, %cst_67 {dimension_numbers = #tpu.dot_dimension_numbers<[1], [0], [0], [1], [0, 0, 1, 1], [], []>} : vector<128x128xbf16>, vector<128x128xbf16>, vector<128x128xf32> -> vector<128x128xf32>
    %94 = arith.addf %90, %93 : vector<128x128xf32>
    %c0_68 = arith.constant 0 : index
    %c0_69 = arith.constant 0 : index
    %c0_70 = arith.constant 0 : index
    %95 = vector.load %arg7[%c0_68, %c0_69, %c0_70] : memref<4x1x128xf32, #tpu.memory_space<vmem>>, vector<1x1x128xf32>
    %96 = vector.shape_cast %95 : vector<1x1x128xf32> to vector<1x128xf32>
    %97 = vector.broadcast %96 : vector<1x128xf32> to vector<128x128xf32>
    %98 = arith.addf %94, %97 : vector<128x128xf32>
    %cst_71 = arith.constant 0.000000e+00 : f32
    %99 = vector.broadcast %cst_71 : f32 to vector<128x128xf32>
    %100 = arith.maximumf %98, %99 : vector<128x128xf32>
    %101 = arith.truncf %100 : vector<128x128xf32> to vector<128x128xbf16>
    %c1_72 = arith.constant 1 : index
    %c0_73 = arith.constant 0 : index
    %c0_74 = arith.constant 0 : index
    %102 = vector.load %arg6[%c1_72, %c0_73, %c0_74] : memref<4x128x128xbf16, #tpu.memory_space<vmem>>, vector<1x128x128xbf16>
    %103 = vector.shape_cast %102 : vector<1x128x128xbf16> to vector<128x128xbf16>
    %cst_75 = arith.constant dense<0.000000e+00> : vector<128x128xf32>
    %104 = tpu.matmul %101, %103, %cst_75 {dimension_numbers = #tpu.dot_dimension_numbers<[1], [0], [0], [1], [0, 0, 1, 1], [], []>} : vector<128x128xbf16>, vector<128x128xbf16>, vector<128x128xf32> -> vector<128x128xf32>
    %c1_76 = arith.constant 1 : index
    %c0_77 = arith.constant 0 : index
    %c0_78 = arith.constant 0 : index
    %105 = vector.load %arg7[%c1_76, %c0_77, %c0_78] : memref<4x1x128xf32, #tpu.memory_space<vmem>>, vector<1x1x128xf32>
    %106 = vector.shape_cast %105 : vector<1x1x128xf32> to vector<1x128xf32>
    %107 = vector.broadcast %106 : vector<1x128xf32> to vector<128x128xf32>
    %108 = arith.addf %104, %107 : vector<128x128xf32>
    %cst_79 = arith.constant 0.000000e+00 : f32
    %109 = vector.broadcast %cst_79 : f32 to vector<128x128xf32>
    %110 = arith.maximumf %108, %109 : vector<128x128xf32>
    %111 = arith.truncf %110 : vector<128x128xf32> to vector<128x128xbf16>
    %c2_80 = arith.constant 2 : index
    %c0_81 = arith.constant 0 : index
    %c0_82 = arith.constant 0 : index
    %112 = vector.load %arg6[%c2_80, %c0_81, %c0_82] : memref<4x128x128xbf16, #tpu.memory_space<vmem>>, vector<1x128x128xbf16>
    %113 = vector.shape_cast %112 : vector<1x128x128xbf16> to vector<128x128xbf16>
    %cst_83 = arith.constant dense<0.000000e+00> : vector<128x128xf32>
    %114 = tpu.matmul %111, %113, %cst_83 {dimension_numbers = #tpu.dot_dimension_numbers<[1], [0], [0], [1], [0, 0, 1, 1], [], []>} : vector<128x128xbf16>, vector<128x128xbf16>, vector<128x128xf32> -> vector<128x128xf32>
    %c2_84 = arith.constant 2 : index
    %c0_85 = arith.constant 0 : index
    %c0_86 = arith.constant 0 : index
    %115 = vector.load %arg7[%c2_84, %c0_85, %c0_86] : memref<4x1x128xf32, #tpu.memory_space<vmem>>, vector<1x1x128xf32>
    %116 = vector.shape_cast %115 : vector<1x1x128xf32> to vector<1x128xf32>
    %117 = vector.broadcast %116 : vector<1x128xf32> to vector<128x128xf32>
    %118 = arith.addf %114, %117 : vector<128x128xf32>
    %cst_87 = arith.constant 0.000000e+00 : f32
    %119 = vector.broadcast %cst_87 : f32 to vector<128x128xf32>
    %120 = arith.maximumf %118, %119 : vector<128x128xf32>
    %121 = arith.truncf %120 : vector<128x128xf32> to vector<128x128xbf16>
    %c3_88 = arith.constant 3 : index
    %c0_89 = arith.constant 0 : index
    %c0_90 = arith.constant 0 : index
    %122 = vector.load %arg6[%c3_88, %c0_89, %c0_90] : memref<4x128x128xbf16, #tpu.memory_space<vmem>>, vector<1x128x128xbf16>
    %123 = vector.shape_cast %122 : vector<1x128x128xbf16> to vector<128x128xbf16>
    %cst_91 = arith.constant dense<0.000000e+00> : vector<128x128xf32>
    %124 = tpu.matmul %121, %123, %cst_91 {dimension_numbers = #tpu.dot_dimension_numbers<[1], [0], [0], [1], [0, 0, 1, 1], [], []>} : vector<128x128xbf16>, vector<128x128xbf16>, vector<128x128xf32> -> vector<128x128xf32>
    %125 = arith.addf %89, %124 : vector<128x128xf32>
    %c3_92 = arith.constant 3 : index
    %c0_93 = arith.constant 0 : index
    %c0_94 = arith.constant 0 : index
    %126 = vector.load %arg7[%c3_92, %c0_93, %c0_94] : memref<4x1x128xf32, #tpu.memory_space<vmem>>, vector<1x1x128xf32>
    %127 = vector.shape_cast %126 : vector<1x1x128xf32> to vector<1x128xf32>
    %128 = vector.broadcast %127 : vector<1x128xf32> to vector<128x128xf32>
    %129 = arith.addf %125, %128 : vector<128x128xf32>
    %c0_95 = arith.constant 0 : index
    %c0_96 = arith.constant 0 : index
    %130 = vector.load %arg8[%c0_95, %c0_96] : memref<128x128xf32, #tpu.memory_space<vmem>>, vector<128x128xf32>
    tpu.vector_store %arg8[%c0_95, %c0_96], %129 {strides = array<i32>} : memref<128x128xf32, #tpu.memory_space<vmem>>, vector<128x128xf32>,
    return
  }
  func.func @transform_0(%arg0: i32) -> (i32, i32) {
    %c0_i32 = arith.constant 0 : i32
    %c0_i32_0 = arith.constant 0 : i32
    return %arg0, %c0_i32 : i32, i32
  }
  func.func @transform_1(%arg0: i32) -> (i32, i32, i32) {
    %c0_i32 = arith.constant 0 : i32
    %c0_i32_0 = arith.constant 0 : i32
    %c0_i32_1 = arith.constant 0 : i32
    %c0_i32_2 = arith.constant 0 : i32
    return %c0_i32, %c0_i32_0, %c0_i32_1 : i32, i32, i32
  }
  func.func @transform_2(%arg0: i32) -> (i32, i32, i32) {
    %c0_i32 = arith.constant 0 : i32
    %c0_i32_0 = arith.constant 0 : i32
    %c0_i32_1 = arith.constant 0 : i32
    %c0_i32_2 = arith.constant 0 : i32
    return %c0_i32, %c0_i32_0, %c0_i32_1 : i32, i32, i32
  }
  func.func @transform_3(%arg0: i32) -> (i32, i32, i32) {
    %c0_i32 = arith.constant 0 : i32
    %c0_i32_0 = arith.constant 0 : i32
    %c0_i32_1 = arith.constant 0 : i32
    %c0_i32_2 = arith.constant 0 : i32
    return %c0_i32, %c0_i32_0, %c0_i32_1 : i32, i32, i32
  }
  func.func @transform_4(%arg0: i32) -> (i32, i32) {
    %c0_i32 = arith.constant 0 : i32
    %c0_i32_0 = arith.constant 0 : i32
    %c0_i32_1 = arith.constant 0 : i32
    return %c0_i32, %c0_i32_0 : i32, i32
  }
  func.func @transform_5(%arg0: i32) -> (i32, i32, i32) {
    %c0_i32 = arith.constant 0 : i32
    %c0_i32_0 = arith.constant 0 : i32
    %c0_i32_1 = arith.constant 0 : i32
    %c0_i32_2 = arith.constant 0 : i32
    return %c0_i32, %c0_i32_0, %c0_i32_1 : i32, i32, i32
  }
  func.func @transform_6(%arg0: i32) -> (i32, i32, i32) {
    %c0_i32 = arith.constant 0 : i32
    %c0_i32_0 = arith.constant 0 : i32
    %c0_i32_1 = arith.constant 0 : i32
    %c0_i32_2 = arith.constant 0 : i32
    return %c0_i32, %c0_i32_0, %c0_i32_1 : i32, i32, i32
  }
  func.func @transform_7(%arg0: i32) -> (i32, i32) {
    %c0_i32 = arith.constant 0 : i32
    %c0_i32_0 = arith.constant 0 : i32
    return %arg0, %c0_i32 : i32, i32
  }
}

</mosaic_0001>

<bundles_post_ra>
// kernel: tpu_custom_call.1
= control target key start
LH: loop header
LB: loop body
LE: loop exit
PB: predicated region body
PF: predicated region fallthrough
CT: control target
= control target key end

     0   :  { %s7172_s0 = inlined_call_operand.hbm [shape: bf16[256,256], index: 0, kind: input, shape index: {}]   ;;  %s7173_s1 = inlined_call_operand.hbm [shape: bf16[2,128,256], index: 1, kind: input, shape index: {}]   ;;  %s7174_s2 = inlined_call_operand.hbm [shape: f32[8,1,256], index: 2, kind: input, shape index: {}]   ;;  %s7175_s3 = inlined_call_operand.hbm [shape: bf16[7,256,256], index: 3, kind: input, shape index: {}]   ;;  %s7176_s4 = inlined_call_operand.hbm [shape: bf16[256,256], index: 4, kind: input, shape index: {}]   ;;  %s7177_s5 = inlined_call_operand.hbm [shape: bf16[4,128,128], index: 5, kind: input, shape index: {}]   ;;  %s7178_s6 = inlined_call_operand.vmem [shape: f32[4,1,128], index: 6, kind: input, shape index: {}]   ;;  %s7179_s7 = inlined_call_operand.hbm [shape: f32[256,128], index: 7, kind: output, shape index: {}]  }
   0x1   :  { %7187 = sst [smem:[#allocation19_spill]] %s7173_s1 }
   0x2   :  { %12 = vsyncpa [#allocation3], 0 }
   0x3   :  { %14 = vsyncpa [#allocation3 + $0x1], 0 }
   0x4   :  { %15 = vsyncpa [#allocation6], 0 }
   0x5   :  { %16 = vsyncpa [#allocation9], 0 }
   0x6   :  { %17 = vsyncpa [#allocation12], 0 }
   0x7   :  { %18 = vsyncpa [#allocation4], 0 }
   0x8   :  { %20 = vsyncpa [#allocation4 + $0x1], 0  ;;  %s6338_s24 = smov 0   ;;  %s6340_s25 = smov 0  }
   0x9   :  { %s6342_s26 = smov 0   ;;  %s6344_s27 = smov 0  }
   0xa LB: > { %s6282_s28 = smov [#allocation5]   ;;  %s6359_s30 = sadd.s32 4294967295, %s6280_s27   ;;  %s6280_s27 = sphi %s6344_s27, %s7212_s27   ;;  %s6276_s26 = sphi %s6342_s26, %s7211_s26   ;;  %s6272_s25 = sphi %s6340_s25, %s7210_s25   ;;  %s6268_s24 = sphi %s6338_s24, %s7209_s24  }
   0xb   : > { %s221_s29 = sshll.u32 %s6282_s28, 4  ;;  %p4820_p0 = scmp.ge.s32.totalorder %s6280_s27, 1  ;;  %s6364_s29 = int_to_ptr.vmem [resolvable:$true] %s221_s29 }
   0xc   : > { %p7184_p1 = scmp.eq.s32.totalorder %s6359_s30, 0  ;;  %p209_p2 = scmp.lt.s32.totalorder %s6280_s27, 3 }
   0xd   : > { %s6283_s9 = smov [#allocation8]   ;;  %s6284_s12 = smov [#allocation7]  }
   0xe   : > { %p6366_p3 = pnand %p4820_p0, %p209_p2  ;;  %s247_s10 = sshll.u32 %s6283_s9, 4  ;;  %s6379_s10 = int_to_ptr.vmem [resolvable:$true] %s247_s10 }
   0xf   : > { %s234_s13 = sshll.u32 %s6284_s12, 4  ;;  %s7190_s1 = sld [smem:[#allocation19_spill]]  ;;  %s6381_s13 = int_to_ptr.vmem [resolvable:$true] %s234_s13 }
  0x10   : > { %s7188_s8 = scalar_select %p6366_p3, 1, 0 }
  0x11   : > { %p5454_p5 = pneg %p6366_p3 }
  0x13   : > { %p6375_p6 = pnand %p5454_p5, %p7184_p1 }
  0x15   : > { %s6032_s16 = scalar_lea.hbm %s7190_s1, 4096  ;;  %p6391_p8 = pneg %p6375_p6 }
  0x16   : > { %p6033_p7 = scmp.ne.s32.totalorder %s7190_s1, %s6032_s16  ;;  %p6039_p11 = scmp.lt.u32.totalorder %s6032_s16, %s7190_s1 }
  0x18   : > { %p6035_p9 = pnand %p6391_p8, %p6033_p7 }
  0x1a   : > { %p6036_p10 = pneg %p6035_p9 }
  0x1c   : > { %p6041_p12 = pnand %p6039_p11, %p6036_p10 }
  0x1e   : > { %6044 = shalt.err (!%p6041_p12)
}
  0x1f   : > { %s6045_s22 = scalar_lea.vmem %s6364_s29, 4096  ;;  %p6053_p5 = scmp.lt.s32.totalorder %s6364_s29, %s6364_s29 }
  0x20   : > { %p6046_p13 = scmp.ne.s32.totalorder %s6364_s29, %s6045_s22  ;;  %p6054_p4 = scmp.lt.s32.totalorder %s6045_s22, %s6045_s22 }
  0x22   : > { %p6048_p0 = pnand %p6046_p13, %p6391_p8  ;;  %p6055_p7 = por %p6054_p4, %p6053_p5 }
  0x24   : > { %p6049_p2 = pneg %p6048_p0 }
  0x26   : > { %p6056_p9 = pnand %p6055_p7, %p6049_p2 }
  0x28   : > { %6059 = shalt.err (!%p6056_p9)
}
  0x29   : > { %s7180_s23 = smov 128   ;;  %s7182_s28 = smov 8  }
  0x2a   : > { %5457 = dma.hbm_to_vmem [thread:$0]  (!%p6375_p6), %s7190_s1, 4096, %s6364_s29, [#allocation6], %s7180_s23, %s7180_s23, %s7182_s28  }
  0x2b   : > { %s6060_s16 = scalar_lea.hbm %s7175_s3, 28672 }
  0x2c   : > { %p6061_p4 = scmp.ne.s32.totalorder %s7175_s3, %s6060_s16  ;;  %p6067_p12 = scmp.lt.u32.totalorder %s6060_s16, %s7175_s3 }
  0x2e   : > { %p6063_p10 = pnand %p6061_p4, %p6391_p8 }
  0x30   : > { %p6064_p11 = pneg %p6063_p10 }
  0x32   : > { %p6069_p13 = pnand %p6067_p12, %p6064_p11 }
  0x34   : > { %6072 = shalt.err (!%p6069_p13)
}
  0x35   : > { %s6073_s29 = scalar_lea.vmem %s6379_s10, 28672  ;;  %p6081_p7 = scmp.lt.s32.totalorder %s6379_s10, %s6379_s10 }
  0x36   : > { %p6074_p0 = scmp.ne.s32.totalorder %s6379_s10, %s6073_s29  ;;  %p6082_p9 = scmp.lt.s32.totalorder %s6073_s29, %s6073_s29 }
  0x38   : > { %p6076_p2 = pnand %p6074_p0, %p6391_p8  ;;  %p6083_p4 = por %p6082_p9, %p6081_p7 }
  0x3a   : > { %p6077_p5 = pneg %p6076_p2 }
  0x3c   : > { %p6084_p10 = pnand %p6083_p4, %p6077_p5 }
  0x3e   : > { %6087 = shalt.err (!%p6084_p10)
}
  0x3f   : > { %5463 = dma.hbm_to_vmem [thread:$0]  (!%p6375_p6), %s7175_s3, 28672, %s6379_s10, [#allocation9], %s7180_s23, %s7180_s23, %s7182_s28  }
  0x40   : > { %s6088_s15 = scalar_lea.hbm %s7174_s2, 256 }
  0x41   : > { %p6089_p11 = scmp.ne.s32.totalorder %s7174_s2, %s6088_s15  ;;  %p6095_p0 = scmp.lt.u32.totalorder %s6088_s15, %s7174_s2 }
  0x43   : > { %p6091_p12 = pnand %p6089_p11, %p6391_p8 }
  0x45   : > { %p6092_p13 = pneg %p6091_p12 }
  0x47   : > { %p6097_p2 = pnand %p6095_p0, %p6092_p13 }
  0x49   : > { %6100 = shalt.err (!%p6097_p2)
}
  0x4a   : > { %s6101_s10 = scalar_lea.vmem %s6381_s13, 256  ;;  %p6109_p4 = scmp.lt.s32.totalorder %s6381_s13, %s6381_s13 }
  0x4b   : > { %p6102_p5 = scmp.ne.s32.totalorder %s6381_s13, %s6101_s10  ;;  %p6110_p10 = scmp.lt.s32.totalorder %s6101_s10, %s6101_s10 }
  0x4d   : > { %p6104_p7 = pnand %p6102_p5, %p6391_p8  ;;  %p6111_p11 = por %p6110_p10, %p6109_p4 }
  0x4f   : > { %p6105_p9 = pneg %p6104_p7 }
  0x51   : > { %p6112_p12 = pnand %p6111_p11, %p6105_p9 }
  0x53   : > { %6115 = shalt.err (!%p6112_p12)
}
  0x54   : > { %s6287_s21 = smov 32   ;;  %s6288_s29 = smov 2  }
  0x55   : > { %5460 = dma.hbm_to_vmem [thread:$0]  (!%p6375_p6), %s7174_s2, 256, %s6381_s13, [#allocation6], %s6287_s21, %s6287_s21, %s6288_s29  }
  0x56   : > { %s6289_s12 = smov [#allocation10]   ;;  %s6290_s15 = smov [#allocation11]  }
  0x57   : > { %s260_s14 = sshll.u32 %s6289_s12, 4  ;;  %s273_s16 = sshll.u32 %s6290_s15, 4  ;;  %s261_s14 = int_to_ptr.vmem [resolvable:$true] %s260_s14  ;;  %s274_s16 = int_to_ptr.vmem [resolvable:$true] %s273_s16 }
  0x58   : > { %s6116_s20 = scalar_lea.hbm %s7176_s4, 4096 }
  0x59   : > { %p6117_p13 = scmp.ne.s32.totalorder %s7176_s4, %s6116_s20  ;;  %p6123_p5 = scmp.lt.u32.totalorder %s6116_s20, %s7176_s4 }
  0x5b   : > { %p6119_p0 = pnand %p6117_p13, %p6391_p8 }
  0x5d   : > { %p6120_p2 = pneg %p6119_p0 }
  0x5f   : > { %p6125_p7 = pnand %p6123_p5, %p6120_p2 }
  0x61   : > { %6128 = shalt.err (!%p6125_p7)
}
  0x62   : > { %s6129_s13 = scalar_lea.vmem %s261_s14, 4096  ;;  %p6137_p11 = scmp.lt.s32.totalorder %s261_s14, %s261_s14 }
  0x63   : > { %p6130_p9 = scmp.ne.s32.totalorder %s261_s14, %s6129_s13  ;;  %p6138_p12 = scmp.lt.s32.totalorder %s6129_s13, %s6129_s13 }
  0x65   : > { %p6132_p4 = pnand %p6130_p9, %p6391_p8  ;;  %p6139_p1 = por %p6138_p12, %p6137_p11 }
  0x67   : > { %p6133_p10 = pneg %p6132_p4 }
  0x69   : > { %p6140_p3 = pnand %p6139_p1, %p6133_p10 }
  0x6b   : > { %6143 = shalt.err (!%p6140_p3)
}
  0x6c   : > { %s7192_s23 = smov 8   ;;  %s7193_s21 = smov 128  }
  0x6d   : > { %5466 = dma.hbm_to_vmem [thread:$0]  (!%p6375_p6), %s7176_s4, 4096, %s261_s14, [#allocation9], %s7193_s21, %s7193_s21, %s7192_s23  }
  0x6e   : > { %s6144_s9 = scalar_lea.hbm %s7177_s5, 4096 }
  0x6f   : > { %p6145_p1 = scmp.ne.s32.totalorder %s7177_s5, %s6144_s9  ;;  %p6151_p0 = scmp.lt.u32.totalorder %s6144_s9, %s7177_s5 }
  0x71   : > { %p6147_p3 = pnand %p6145_p1, %p6391_p8 }
  0x73   : > { %p6148_p13 = pneg %p6147_p3 }
  0x75   : > { %p6153_p2 = pnand %p6151_p0, %p6148_p13 }
  0x77   : > { %6156 = shalt.err (!%p6153_p2)
}
  0x78   : > { %s6157_s20 = scalar_lea.vmem %s274_s16, 4096  ;;  %p6165_p4 = scmp.lt.s32.totalorder %s274_s16, %s274_s16 }
  0x79   : > { %p6158_p5 = scmp.ne.s32.totalorder %s274_s16, %s6157_s20  ;;  %p6166_p10 = scmp.lt.s32.totalorder %s6157_s20, %s6157_s20 }
  0x7b   : > { %p6160_p7 = pnand %p6158_p5, %p6391_p8  ;;  %p6167_p11 = por %p6166_p10, %p6165_p4 }
  0x7d   : > { %p6161_p9 = pneg %p6160_p7 }
  0x7f   : > { %p6168_p12 = pnand %p6167_p11, %p6161_p9 }
  0x81   : > { %6171 = shalt.err (!%p6168_p12)
}
  0x82   : > { %s6291_s14 = smov 64   ;;  %s6292_s19 = smov 4  }
  0x83   : > { %5469 = dma.hbm_to_vmem [thread:$0]  (!%p6375_p6), %s7177_s5, 4096, %s274_s16, [#allocation12], %s6291_s14, %s6291_s14, %s6292_s19  }
  0x84   : > { %s4819_s1 = sadd.s32 4294967294, %s6280_s27   ;;  %s6505_s28 = sadd.s32 1, %s6280_s27  }
  0x85   : > { %s33_s29 = sadd.s32 1, %s6276_s26  ;;  %s30_s22 = ssub.s32 %s6280_s27, %s6505_s28 }
  0x86   : > { %p40_p8 = scmp.ne.s32.totalorder %s6276_s26, %s6272_s25  ;;  %p31_p1 = scmp.eq.s32.totalorder %s30_s22, 0 }
  0x87   : > { %p41_p3 = scmp.eq.s32.totalorder %s6280_s27, 0  ;;  %p46_p13 = scmp.ne.s32.totalorder %s6272_s25, %s6268_s24 }
  0x88   : > { %p196_p0 = scmp.eq.s32.totalorder %s6359_s30, 1  ;;  %p7194_p5 = scmp.eq.s32.totalorder %s6359_s30, 0 }
  0x89   : > { %s6517_s9 = scalar_select %p31_p1, %s6276_s26, %s33_s29  }
  0x8a   : > { %p42_p2 = por %p41_p3, %p40_p8  ;;  %p6521_p7 = por %p7194_p5, %p46_p13 }
  0x8b   : > { %p6525_p6 = por %p196_p0, %p40_p8  ;;  %p202_p9 = scmp.eq.s32.totalorder %s4819_s1, 1 }
  0x8c   : > { %p5483_p4 = scmp.lt.s32.totalorder %s6280_s27, 2  ;;  %s290_s12 = sand.u32 1, %s6276_s26  }
  0x8d   : > { %s7196_s16 = scalar_select %p6525_p6, 1, 0 }
  0x8e   : > { %p6531_p10 = por %p202_p9, %p46_p13  ;;  %s4827_s17 = sshll.u32 %s290_s12, 7 }
  0x8f   : > { %s5188_s18 = sshll.u32 %s6280_s27, 11  ;;  %s294_s10 = scalar_lea.vmem [#allocation2], %s4827_s17 }
  0x90   : > { %s7197_s15 = scalar_select %p6531_p10, 1, 0 }
  0x91   : > { %s6539_s19 = scalar_lea.hbm %s7172_s0, %s5188_s18  ;;  %s302_s13 = sshll.u32 %s294_s10, 4  ;;  %s6545_s13 = int_to_ptr.vmem [resolvable:$true] %s302_s13 }
  0x92   : > { %p6541_p11 = pnand %p5483_p4, %p42_p2  ;;  %s6547_s29 = scalar_lea.sflag [#allocation3], %s290_s12 }
  0x93   : > { %s6172_s22 = scalar_lea.hbm %s6539_s19, 2048  ;;  %s6177_s20 = scalar_lea.hbm %s7172_s0, 4096 }
  0x94   : > { %p6173_p12 = scmp.ne.s32.totalorder %s6539_s19, %s6172_s22  ;;  %p6174_p8 = pneg %p6541_p11 }
  0x95   : > { %p6178_p13 = scmp.lt.u32.totalorder %s6539_s19, %s7172_s0  ;;  %p6179_p0 = scmp.lt.u32.totalorder %s6177_s20, %s6172_s22 }
  0x96   : > { %p6175_p1 = pnand %p6174_p8, %p6173_p12  ;;  %p6181_p5 = scmp.lt.u32.totalorder %s6172_s22, %s6539_s19 }
  0x97   : > { %p6180_p2 = por %p6179_p0, %p6178_p13 }
  0x98   : > { %p6176_p3 = pneg %p6175_p1 }
  0x99   : > { %p6182_p9 = por %p6181_p5, %p6180_p2 }
  0x9b   : > { %p6183_p4 = pnand %p6182_p9, %p6176_p3 }
  0x9d   : > { %6186 = shalt.err (!%p6183_p4)
}
  0x9e   : > { %s6187_s12 = scalar_lea.vmem %s6545_s13, 2048  ;;  %s6293_s17 = smov [#allocation2]  }
  0x9f   : > { %p6188_p12 = scmp.ne.s32.totalorder %s6545_s13, %s6187_s12  ;;  %s6192_s18 = sshll.u32 %s6293_s17, 4  ;;  %s6193_s18 = int_to_ptr.vmem [resolvable:$false] %s6192_s18 }
  0xa0   : > { %s6194_s14 = scalar_lea.vmem %s6193_s18, 4096  ;;  %p6195_p6 = scmp.lt.s32.totalorder %s6545_s13, %s6193_s18 }
  0xa1   : > { %p6190_p1 = pnand %p6188_p12, %p6174_p8  ;;  %p6196_p13 = scmp.lt.s32.totalorder %s6194_s14, %s6187_s12 }
  0xa3   : > { %p6191_p10 = pneg %p6190_p1  ;;  %p6197_p0 = por %p6196_p13, %p6195_p6 }
  0xa5   : > { %p6198_p2 = pnand %p6197_p0, %p6191_p10 }
  0xa7   : > { %6201 = shalt.err (!%p6198_p2)
}
  0xa8   : > { %5473 = dma.hbm_to_vmem [thread:$0]  (!%p6541_p11), %s6539_s19, 2048, %s6545_s13, %s6547_s29, %s7193_s21, %s7193_s21, %s7192_s23  }
  0xa9   : > { %p7199_p8 = scmp.ne.s32.totalorder %s7188_s8, 0 }
  0xaa   : > { %s6581_s22 = sand.u32 (!%p7199_p8), 1, %s6272_s25  }
  0xab   : > { %314 = sbr.rel (%p7199_p8) target bundleno = 2954 (0xb8a), region = 48  ;;  %s4832_s20 = sshll.u32 (!%p7199_p8), %s6581_s22, 7 }
  0xac   : > { %s317_s10 = scalar_lea.sflag (!%p7199_p8), [#allocation3], %s6581_s22  ;;  %s6587_s1 = scalar_lea.vmem (!%p7199_p8), [#allocation2], %s4832_s20 }
  0xb2   : > { %6247 = dma.done.wait (%p6521_p7), %s317_s10, 2048  }
  0xb3   : > { %6249 = vsyncadd (%p6521_p7), %s317_s10, 4294965248  ;;  %p7200_p6 = scmp.eq.s32.totalorder %s6359_s30, 0 }
  0xb5   : > { %6251 = dma.done.wait (%p7200_p6), [#allocation6], 4352   ;;  %p7201_p10 = pmov %p7200_p6 }
  0xb6   : > { %p7202_p11 = pmov %p7200_p6 }
  0xb7   : > { %6253 = vsyncadd (%p7201_p10), [#allocation6], 4294962944 }
  0xb8   : > { %6255 = dma.done.wait (%p7202_p11), [#allocation9], 32768   ;;  %p7203_p3 = pmov %p7200_p6 }
  0xba   : > { %6257 = vsyncadd (%p7203_p3), [#allocation9], 4294934528  ;;  %p7204_p5 = pmov %p7203_p3 }
  0xbb   : > { %p7205_p9 = pmov %p7203_p3 }
  0xbc   : > { %6259 = dma.done.wait (%p7204_p5), [#allocation12], 4096  }
  0xbd   : > { %6261 = vsyncadd (%p7205_p9), [#allocation12], 4294963200  ;;  %v6294_v0 = vmov 0   ;;  %v5536_v1 = vld [vmem:[#allocation5 + $0x4] ss:$8 sps:$4 sm:$0xff]   ;;  %s7077_s17 = scalar_lea.vmem [#allocation13], %s4832_s20 }
  0xbe   : > { %578 = vmatprep.mubr.bf16.mxu0 %v6294_v0  ;;  %v5538_v2 = vld [vmem:[#allocation5] ss:$8 sps:$4 sm:$0xff]   ;;  %546 = vmatprep.subr.bf16.mxu0 %v5536_v1  ;;  %v5539_v3 = vld [vmem:[#allocation5 + $0x14] ss:$8 sps:$4 sm:$0xff]   ;;  %v5541_v4 = vld [vmem:[#allocation5 + $0x10] ss:$8 sps:$4 sm:$0xff]  }
  0xbf   : > { %547 = vmatpush1.bf16.msra.mxu0 %v5538_v2  ;;  %v5542_v5 = vld [vmem:[#allocation5 + $0x24] ss:$8 sps:$4 sm:$0xff]   ;;  %v5544_v6 = vld [vmem:[#allocation5 + $0x20] ss:$8 sps:$4 sm:$0xff]   ;;  %v5545_v7 = vld [vmem:[#allocation5 + $0x34] ss:$8 sps:$4 sm:$0xff]  }
  0xc0   : > { %548 = vmatprep.subr.bf16.mxu0 %v5539_v3  ;;  %v5547_v8 = vld [vmem:[#allocation5 + $0x30] ss:$8 sps:$4 sm:$0xff]   ;;  %v5548_v9 = vld [vmem:[#allocation5 + $0x44] ss:$8 sps:$4 sm:$0xff]   ;;  %v5550_v10 = vld [vmem:[#allocation5 + $0x40] ss:$8 sps:$4 sm:$0xff]  }
  0xc1   : > { %v5551_v11 = vld [vmem:[#allocation5 + $0x54] ss:$8 sps:$4 sm:$0xff]   ;;  %v5553_v12 = vld [vmem:[#allocation5 + $0x50] ss:$8 sps:$4 sm:$0xff]   ;;  %v5554_v13 = vld [vmem:[#allocation5 + $0x64] ss:$8 sps:$4 sm:$0xff]  }
  0xc2   : > { %v5577_v14 = vld [vmem:[#allocation8 + $0x4] ss:$8 sps:$4 sm:$0xff]   ;;  %v5579_v15 = vld [vmem:[#allocation8] ss:$8 sps:$4 sm:$0xff]   ;;  %v5580_v16 = vld [vmem:[#allocation8 + $0x14] ss:$8 sps:$4 sm:$0xff]  }
  0xc3   : > { %549 = vmatpush1.bf16.msra.mxu0 %v5541_v4  ;;  %912 = vmatprep.subr.bf16.mxu1 %v5577_v14  ;;  %v5556_v17 = vld [vmem:[#allocation5 + $0x60] ss:$8 sps:$4 sm:$0xff]   ;;  %v5583_v19 = vld [vmem:[#allocation8 + $0x24] ss:$8 sps:$4 sm:$0xff]   ;;  %v5559_v21 = vld [vmem:[#allocation5 + $0x70] ss:$8 sps:$4 sm:$0xff]  }
  0xc4   : > { %550 = vmatprep.subr.bf16.mxu0 %v5542_v5  ;;  %913 = vmatpush1.bf16.msra.mxu1 %v5579_v15  ;;  %v5582_v18 = vld [vmem:[#allocation8 + $0x10] ss:$8 sps:$4 sm:$0xff]   ;;  %v5557_v20 = vld [vmem:[#allocation5 + $0x74] ss:$8 sps:$4 sm:$0xff]   ;;  %v5585_v22 = vld [vmem:[#allocation8 + $0x20] ss:$8 sps:$4 sm:$0xff]  }
  0xc5   : > { %914 = vmatprep.subr.bf16.mxu1 %v5580_v16  ;;  %v5586_v23 = vld [vmem:[#allocation8 + $0x34] ss:$8 sps:$4 sm:$0xff]   ;;  %v5560_v24 = vld [vmem:[%s6587_s1] ss:$8 sps:$4 sm:$0xff]   ;;  %v5589_v26 = vld [vmem:[#allocation8 + $0x44] ss:$8 sps:$4 sm:$0xff]  }
  0xc6   : > { %v5588_v25 = vld [vmem:[#allocation8 + $0x30] ss:$8 sps:$4 sm:$0xff]   ;;  %v5591_v27 = vld [vmem:[#allocation8 + $0x40] ss:$8 sps:$4 sm:$0xff]   ;;  %v5592_v28 = vld [vmem:[#allocation8 + $0x54] ss:$8 sps:$4 sm:$0xff]  }
  0xc7   : > { %551 = vmatpush1.bf16.msra.mxu0 %v5544_v6  ;;  %v5562_v29 = vld [vmem:[%s6587_s1 + $0x10] ss:$8 sps:$4 sm:$0xff]   ;;  %v5594_v30 = vld [vmem:[#allocation8 + $0x50] ss:$8 sps:$4 sm:$0xff]   ;;  %v5595_v31 = vld [vmem:[#allocation8 + $0x64] ss:$8 sps:$4 sm:$0xff]  }
  0xc8   : > { %552 = vmatprep.subr.bf16.mxu0 %v5545_v7  ;;  %915 = vmatpush1.bf16.msra.mxu1 %v5582_v18  ;;  %v5597_v32 = vld [vmem:[#allocation8 + $0x60] ss:$8 sps:$4 sm:$0xff]   ;;  %v5598_v33 = vld [vmem:[#allocation8 + $0x74] ss:$8 sps:$4 sm:$0xff]   ;;  %v5565_v34 = vld [vmem:[%s6587_s1 + $0x20] ss:$8 sps:$4 sm:$0xff]  }
  0xc9   : > { %916 = vmatprep.subr.bf16.mxu1 %v5583_v19  ;;  %v5600_v35 = vld [vmem:[#allocation8 + $0x70] ss:$8 sps:$4 sm:$0xff]   ;;  %v5601_v36 = vld [vmem:[#allocation8 + $0x84] ss:$8 sps:$4 sm:$0xff]   ;;  %v5603_v37 = vld [vmem:[#allocation8 + $0x80] ss:$8 sps:$4 sm:$0xff]   ;;  %v408_v19 = vlaneseq }
  0xca   : > { %v5604_v38 = vld [vmem:[#allocation8 + $0x94] ss:$8 sps:$4 sm:$0xff]   ;;  %v5567_v39 = vld [vmem:[%s6587_s1 + $0x30] ss:$8 sps:$4 sm:$0xff]   ;;  %v5606_v40 = vld [vmem:[#allocation8 + $0x90] ss:$8 sps:$4 sm:$0xff]  }
  0xcb   : > { %553 = vmatpush1.bf16.msra.mxu0 %v5547_v8  ;;  %v5607_v41 = vld [vmem:[#allocation8 + $0xa4] ss:$8 sps:$4 sm:$0xff]   ;;  %v5609_v42 = vld [vmem:[#allocation8 + $0xa0] ss:$8 sps:$4 sm:$0xff]   ;;  %v5610_v43 = vld [vmem:[#allocation8 + $0xb4] ss:$8 sps:$4 sm:$0xff]  }
  0xcc   : > { %554 = vmatprep.subr.bf16.mxu0 %v5548_v9  ;;  %917 = vmatpush1.bf16.msra.mxu1 %v5585_v22  ;;  %v5569_v44 = vld [vmem:[%s6587_s1 + $0x40] ss:$8 sps:$4 sm:$0xff]   ;;  %v5613_v46 = vld [vmem:[#allocation8 + $0xc4] ss:$8 sps:$4 sm:$0xff]   ;;  %v5615_v47 = vld [vmem:[#allocation8 + $0xc0] ss:$8 sps:$4 sm:$0xff]  }
  0xcd   : > { %918 = vmatprep.subr.bf16.mxu1 %v5586_v23  ;;  %v5612_v45 = vld [vmem:[#allocation8 + $0xb0] ss:$8 sps:$4 sm:$0xff]   ;;  %v5616_v48 = vld [vmem:[#allocation8 + $0xd4] ss:$8 sps:$4 sm:$0xff]   ;;  %v5571_v49 = vld [vmem:[%s6587_s1 + $0x50] ss:$8 sps:$4 sm:$0xff]  }
  0xce   : > { %v5573_v50 = vld [vmem:[%s6587_s1 + $0x60] ss:$8 sps:$4 sm:$0xff]   ;;  %v5575_v51 = vld [vmem:[%s6587_s1 + $0x70] ss:$8 sps:$4 sm:$0xff]   ;;  %v5619_v53 = vld [vmem:[#allocation8 + $0xe4] ss:$8 sps:$4 sm:$0xff]  }
  0xcf   : > { %555 = vmatpush1.bf16.msra.mxu0 %v5550_v10  ;;  %v5618_v52 = vld [vmem:[#allocation8 + $0xd0] ss:$8 sps:$4 sm:$0xff]   ;;  %v5621_v54 = vld [vmem:[#allocation8 + $0xe0] ss:$8 sps:$4 sm:$0xff]   ;;  %v5622_v55 = vld [vmem:[#allocation8 + $0xf4] ss:$8 sps:$4 sm:$0xff]  }
  0xd0   : > { %556 = vmatprep.subr.bf16.mxu0 %v5551_v11  ;;  %919 = vmatpush1.bf16.msra.mxu1 %v5588_v25  ;;  %v5624_v56 = vld [vmem:[#allocation8 + $0xf0] ss:$8 sps:$4 sm:$0xff]   ;;  %v5625_v57 = vld [vmem:[#allocation8 + $0x100] ss:$8 sps:$4 sm:$0xff]   ;;  %v5627_v58 = vld [vmem:[#allocation8 + $0x104] ss:$8 sps:$4 sm:$0xff]  }
  0xd1   : > { %920 = vmatprep.subr.bf16.mxu1 %v5589_v26  ;;  %v5630_v59 = vld [vmem:[#allocation8 + $0x114] ss:$8 sps:$4 sm:$0xff]   ;;  %v5628_v60 = vld [vmem:[#allocation8 + $0x110] ss:$8 sps:$4 sm:$0xff]   ;;  %v5633_v61 = vld [vmem:[#allocation8 + $0x124] ss:$8 sps:$4 sm:$0xff]  }
  0xd2   : > { %v5631_v62 = vld [vmem:[#allocation8 + $0x120] ss:$8 sps:$4 sm:$0xff]   ;;  %v5636_v63 = vld [vmem:[#allocation8 + $0x134] ss:$8 sps:$4 sm:$0xff]   ;;  %v5634_v1 = vld [vmem:[#allocation8 + $0x130] ss:$8 sps:$4 sm:$0xff]  }
  0xd3   : > { %557 = vmatpush1.bf16.msra.mxu0 %v5553_v12  ;;  %v5639_v2 = vld [vmem:[#allocation8 + $0x144] ss:$8 sps:$4 sm:$0xff]   ;;  %v5637_v3 = vld [vmem:[#allocation8 + $0x140] ss:$8 sps:$4 sm:$0xff]   ;;  %v5642_v4 = vld [vmem:[#allocation8 + $0x154] ss:$8 sps:$4 sm:$0xff]  }
  0xd4   : > { %558 = vmatprep.subr.bf16.mxu0 %v5554_v13  ;;  %921 = vmatpush1.bf16.msra.mxu1 %v5591_v27  ;;  %v5640_v5 = vld [vmem:[#allocation8 + $0x150] ss:$8 sps:$4 sm:$0xff]   ;;  %v5645_v6 = vld [vmem:[#allocation8 + $0x164] ss:$8 sps:$4 sm:$0xff]   ;;  %v5643_v7 = vld [vmem:[#allocation8 + $0x160] ss:$8 sps:$4 sm:$0xff]  }
  0xd5   : > { %922 = vmatprep.subr.bf16.mxu1 %v5592_v28  ;;  %v5648_v8 = vld [vmem:[#allocation8 + $0x174] ss:$8 sps:$4 sm:$0xff]   ;;  %v5646_v9 = vld [vmem:[#allocation8 + $0x170] ss:$8 sps:$4 sm:$0xff]   ;;  %v5651_v10 = vld [vmem:[#allocation8 + $0x184] ss:$8 sps:$4 sm:$0xff]  }
  0xd6   : > { %v5649_v11 = vld [vmem:[#allocation8 + $0x180] ss:$8 sps:$4 sm:$0xff]   ;;  %v5654_v12 = vld [vmem:[#allocation8 + $0x194] ss:$8 sps:$4 sm:$0xff]   ;;  %v5652_v13 = vld [vmem:[#allocation8 + $0x190] ss:$8 sps:$4 sm:$0xff]  }
  0xd7   : > { %559 = vmatpush1.bf16.msra.mxu0 %v5556_v17  ;;  %v5657_v14 = vld [vmem:[#allocation8 + $0x1a4] ss:$8 sps:$4 sm:$0xff]   ;;  %v5655_v15 = vld [vmem:[#allocation8 + $0x1a0] ss:$8 sps:$4 sm:$0xff]   ;;  %v5660_v16 = vld [vmem:[#allocation8 + $0x1b4] ss:$8 sps:$4 sm:$0xff]  }
  0xd8   : > { %560 = vmatprep.subr.bf16.mxu0 %v5557_v20  ;;  %923 = vmatpush1.bf16.msra.mxu1 %v5594_v30  ;;  %v5658_v17 = vld [vmem:[#allocation8 + $0x1b0] ss:$8 sps:$4 sm:$0xff]   ;;  %v5663_v18 = vld [vmem:[#allocation8 + $0x1c4] ss:$8 sps:$4 sm:$0xff]   ;;  %v5661_v20 = vld [vmem:[#allocation8 + $0x1c0] ss:$8 sps:$4 sm:$0xff]  }
  0xd9   : > { %924 = vmatprep.subr.bf16.mxu1 %v5595_v31  ;;  %v409_v22 = vshrl.u32 %v408_v19, 7  ;;  %v5664_v23 = vld [vmem:[#allocation8 + $0x1d0] ss:$8 sps:$4 sm:$0xff]   ;;  %s5189_s18 = sshll.u32 %s6359_s30, 11  ;;  %s4698_s14 = sshll.u32 %s7077_s17, 4  ;;  %s7124_s14 = int_to_ptr.vmem [resolvable:$true] %s4698_s14 }
  0xda   : > { %v406_v25 = vld [vmem:[#allocation7] sm:$0x3]  ;;  %s4685_s30 = scalar_lea.sflag [#allocation4], %s6581_s22  ;;  %s6202_s8 = scalar_lea.vmem %s7124_s14, 2048 }
  0xdb   : > { %561 = vmatpush1.bf16.msra.mxu0 %v5559_v21  ;;  %v5666_v21 = vld [vmem:[#allocation8 + $0x1d4] ss:$8 sps:$4 sm:$0xff]   ;;  %v6623_v26 = vsub.s32 1, %v409_v22  ;;  %p6203_p7 = scmp.ne.s32.totalorder %s7124_s14, %s6202_s8  ;;  %p7206_p4 = scmp.ne.s32.totalorder %s7196_s16, 0 }
  0xdc   : > { %925 = vmatpush1.bf16.msra.mxu1 %v5597_v32  ;;  %1279 = vmatprep.subr.bf16.mxu0 %v5627_v58  ;;  %s6295_s23 = smov [#allocation13]  }
  0xdd   : > { %926 = vmatprep.subr.bf16.mxu1 %v5598_v33  ;;  %v6629_v28 = vrot.slane %v406_v25, %v6623_v26  ;;  %p6204_p12 = pnand %p6203_p7, %p7206_p4  ;;  %s6206_s21 = sshll.u32 %s6295_s23, 4  ;;  %s6207_s21 = int_to_ptr.vmem [resolvable:$false] %s6206_s21 }
  0xde   : > { %579 = vmatmul.mubr.bf16.vlgmr.msra.gmra.mrb[0].mxu0 %v5560_v24  ;;  %v6621_v24 = vsub.s32 0, %v409_v22  ;;  %s6208_s11 = scalar_lea.vmem %s6207_s21, 4096  ;;  %p6209_p13 = scmp.lt.s32.totalorder %s7124_s14, %s6207_s21 }
  0xdf   : > { %588 = vmatprep.mubr.bf16.mxu0 %v6294_v0  ;;  %1280 = vmatpush1.bf16.msra.mxu0 %v5625_v57  ;;  %p6205_p1 = pneg %p6204_p12  ;;  %p6210_p0 = scmp.lt.s32.totalorder %s6208_s11, %s6202_s8 }
  0xe0   : > { %927 = vmatpush1.bf16.msra.mxu1 %v5600_v35  ;;  %1281 = vmatprep.subr.bf16.mxu0 %v5630_v59  ;;  %v6626_v27 = vrot.slane %v406_v25, %v6621_v24 }
  0xe1   : > { %928 = vmatprep.subr.bf16.mxu1 %v5601_v36  ;;  %p6211_p2 = por %p6210_p0, %p6209_p13 }
  0xe3   : > { %1282 = vmatpush1.bf16.msra.mxu0 %v5628_v60  ;;  %p6212_p8 = pnand %p6211_p2, %p6205_p1 }
  0xe4   : > { %929 = vmatpush1.bf16.msra.mxu1 %v5603_v37  ;;  %1283 = vmatprep.subr.bf16.mxu0 %v5633_v61 }
  0xe5   : > { %930 = vmatprep.subr.bf16.mxu1 %v5604_v38 }
  0xe6   : > { %589 = vmatmul.mubr.bf16.gmra.mrb[4].mxu0 %v5562_v29 }
  0xe7   : > { %598 = vmatprep.mubr.bf16.mxu0 %v6294_v0  ;;  %1284 = vmatpush1.bf16.msra.mxu0 %v5631_v62 }
  0xe8   : > { %931 = vmatpush1.bf16.msra.mxu1 %v5606_v40  ;;  %1285 = vmatprep.subr.bf16.mxu0 %v5636_v63 }
  0xe9   : > { %932 = vmatprep.subr.bf16.mxu1 %v5607_v41 }
  0xeb   : > { %1286 = vmatpush1.bf16.msra.mxu0 %v5634_v1 }
  0xec   : > { %933 = vmatpush1.bf16.msra.mxu1 %v5609_v42  ;;  %1287 = vmatprep.subr.bf16.mxu0 %v5639_v2 }
  0xed   : > { %934 = vmatprep.subr.bf16.mxu1 %v5610_v43 }
  0xee   : > { %599 = vmatmul.mubr.bf16.gmra.mrb[8].mxu0 %v5565_v34 }
  0xef   : > { %608 = vmatprep.mubr.bf16.mxu0 %v6294_v0  ;;  %1288 = vmatpush1.bf16.msra.mxu0 %v5637_v3 }
  0xf0   : > { %935 = vmatpush1.bf16.msra.mxu1 %v5612_v45  ;;  %1289 = vmatprep.subr.bf16.mxu0 %v5642_v4 }
  0xf1   : > { %936 = vmatprep.subr.bf16.mxu1 %v5613_v46 }
  0xf3   : > { %1290 = vmatpush1.bf16.msra.mxu0 %v5640_v5 }
  0xf4   : > { %937 = vmatpush1.bf16.msra.mxu1 %v5615_v47  ;;  %1291 = vmatprep.subr.bf16.mxu0 %v5645_v6 }
  0xf5   : > { %938 = vmatprep.subr.bf16.mxu1 %v5616_v48 }
  0xf6   : > { %609 = vmatmul.mubr.bf16.gmra.mrb[12].mxu0 %v5567_v39 }
  0xf7   : > { %618 = vmatprep.mubr.bf16.mxu0 %v6294_v0  ;;  %1292 = vmatpush1.bf16.msra.mxu0 %v5643_v7 }
  0xf8   : > { %939 = vmatpush1.bf16.msra.mxu1 %v5618_v52  ;;  %1293 = vmatprep.subr.bf16.mxu0 %v5648_v8 }
  0xf9   : > { %940 = vmatprep.subr.bf16.mxu1 %v5619_v53 }
  0xfb   : > { %1294 = vmatpush1.bf16.msra.mxu0 %v5646_v9 }
  0xfc   : > { %941 = vmatpush1.bf16.msra.mxu1 %v5621_v54  ;;  %1295 = vmatprep.subr.bf16.mxu0 %v5651_v10 }
  0xfd   : > { %942 = vmatprep.subr.bf16.mxu1 %v5622_v55 }
  0xfe   : > { %619 = vmatmul.mubr.bf16.gmra.mrb[16].mxu0 %v5569_v44 }
  0xff   : > { %628 = vmatprep.mubr.bf16.mxu0 %v6294_v0  ;;  %1296 = vmatpush1.bf16.msra.mxu0 %v5649_v11 }
 0x100   : > { %943 = vmatpush1.bf16.msra.mxu1 %v5624_v56  ;;  %1297 = vmatprep.subr.bf16.mxu0 %v5654_v12 }
 0x103   : > { %1298 = vmatpush1.bf16.msra.mxu0 %v5652_v13 }
 0x104   : > { %1299 = vmatprep.subr.bf16.mxu0 %v5657_v14 }
 0x106   : > { %629 = vmatmul.mubr.bf16.gmra.mrb[20].mxu0 %v5571_v49 }
 0x107   : > { %638 = vmatprep.mubr.bf16.mxu0 %v6294_v0  ;;  %1300 = vmatpush1.bf16.msra.mxu0 %v5655_v15 }
 0x108   : > { %1301 = vmatprep.subr.bf16.mxu0 %v5660_v16 }
 0x10b   : > { %1302 = vmatpush1.bf16.msra.mxu0 %v5658_v17 }
 0x10c   : > { %1303 = vmatprep.subr.bf16.mxu0 %v5663_v18 }
 0x10e   : > { %639 = vmatmul.mubr.bf16.gmra.mrb[24].mxu0 %v5573_v50 }
 0x10f   : > { %648 = vmatprep.mubr.bf16.mxu0 %v6294_v0  ;;  %1304 = vmatpush1.bf16.msra.mxu0 %v5661_v20 }
 0x110   : > { %1305 = vmatprep.subr.bf16.mxu0 %v5666_v21 }
 0x113   : > { %1306 = vmatpush1.bf16.msra.mxu0 %v5664_v23 }
 0x116   : > { %649 = vmatmul.mubr.bf16.gmra.mrb[28].mxu0 %v5575_v51 }
 0x1b1   : > { %v580_v29 = vpop.f32.mrb[0].mxu0 }
 0x1b2   : > { %v581_v30 = vadd.f32 %v580_v29, %v6626_v27  ;;  %v582_v31 = vpop.f32.mrb[1].mxu0 }
 0x1b3   : > { %v583_v32 = vadd.f32 %v582_v31, %v6629_v28  ;;  %v584_v33 = vpop.f32.mrb[2].mxu0 }
 0x1b4   : > { %v585_v34 = vadd.f32 %v584_v33, %v6626_v27  ;;  %v586_v35 = vpop.f32.mrb[3].mxu0  ;;  %v659_v37 = vmax.f32 %v581_v30, 0.0 }
 0x1b5   : > { %v587_v36 = vadd.f32 %v586_v35, %v6629_v28  ;;  %v660_v39 = vmax.f32 %v583_v32, 0.0 }
 0x1b6   : > { %v661_v38 = vmax.f32 %v585_v34, 0.0 }
 0x1b7   : > { %v662_v40 = vmax.f32 %v587_v36, 0.0 }
 0x1b8   : > { %v691_v41 = vpack.c.bf16 %v661_v38, %v659_v37 }
 0x1b9   : > { %v590_v42 = vpop.f32.mrb[4].mxu0  ;;  %v692_v43 = vpack.c.bf16 %v662_v40, %v660_v39 }
 0x1ba   : > { %v591_v44 = vadd.f32 %v590_v42, %v6626_v27  ;;  %v592_v45 = vpop.f32.mrb[5].mxu0 }
 0x1bb   : > { %v593_v46 = vadd.f32 %v592_v45, %v6629_v28  ;;  %v594_v47 = vpop.f32.mrb[6].mxu0  ;;  %944 = vmatprep.mubr.bf16.mxu1 %v692_v43 }
 0x1bc   : > { %v595_v48 = vadd.f32 %v594_v47, %v6626_v27  ;;  %v596_v49 = vpop.f32.mrb[7].mxu0  ;;  %945 = vmatmul.mubr.bf16.vlgmr.msra.gmra.mrb[0].mxu1 %v691_v41  ;;  %v663_v51 = vmax.f32 %v591_v44, 0.0 }
 0x1bd   : > { %v597_v50 = vadd.f32 %v596_v49, %v6629_v28  ;;  %v664_v53 = vmax.f32 %v593_v46, 0.0 }
 0x1be   : > { %v665_v52 = vmax.f32 %v595_v48, 0.0 }
 0x1bf   : > { %v666_v54 = vmax.f32 %v597_v50, 0.0 }
 0x1c0   : > { %v693_v55 = vpack.c.bf16 %v665_v52, %v663_v51 }
 0x1c1   : > { %v694_v56 = vpack.c.bf16 %v666_v54, %v664_v53  ;;  %v600_v57 = vpop.f32.mrb[8].mxu0 }
 0x1c2   : > { %v601_v58 = vadd.f32 %v600_v57, %v6626_v27  ;;  %v602_v59 = vpop.f32.mrb[9].mxu0 }
 0x1c3   : > { %v603_v60 = vadd.f32 %v602_v59, %v6629_v28  ;;  %v604_v61 = vpop.f32.mrb[10].mxu0  ;;  %954 = vmatprep.mubr.bf16.mxu1 %v694_v56 }
 0x1c4   : > { %v605_v62 = vadd.f32 %v604_v61, %v6626_v27  ;;  %v606_v63 = vpop.f32.mrb[11].mxu0  ;;  %955 = vmatmul.mubr.bf16.gmra.mrb[4].mxu1 %v693_v55  ;;  %v667_v2 = vmax.f32 %v601_v58, 0.0 }
 0x1c5   : > { %v607_v1 = vadd.f32 %v606_v63, %v6629_v28  ;;  %v668_v4 = vmax.f32 %v603_v60, 0.0 }
 0x1c6   : > { %v669_v3 = vmax.f32 %v605_v62, 0.0 }
 0x1c7   : > { %v670_v5 = vmax.f32 %v607_v1, 0.0 }
 0x1c8   : > { %v695_v6 = vpack.c.bf16 %v669_v3, %v667_v2 }
 0x1c9   : > { %v696_v7 = vpack.c.bf16 %v670_v5, %v668_v4  ;;  %v610_v8 = vpop.f32.mrb[12].mxu0 }
 0x1ca   : > { %v611_v9 = vadd.f32 %v610_v8, %v6626_v27  ;;  %v612_v10 = vpop.f32.mrb[13].mxu0 }
 0x1cb   : > { %v613_v11 = vadd.f32 %v612_v10, %v6629_v28  ;;  %v614_v12 = vpop.f32.mrb[14].mxu0  ;;  %964 = vmatprep.mubr.bf16.mxu1 %v696_v7 }
 0x1cc   : > { %v615_v13 = vadd.f32 %v614_v12, %v6626_v27  ;;  %v616_v14 = vpop.f32.mrb[15].mxu0  ;;  %965 = vmatmul.mubr.bf16.gmra.mrb[8].mxu1 %v695_v6  ;;  %v671_v16 = vmax.f32 %v611_v9, 0.0 }
 0x1cd   : > { %v617_v15 = vadd.f32 %v616_v14, %v6629_v28  ;;  %v672_v18 = vmax.f32 %v613_v11, 0.0 }
 0x1ce   : > { %v673_v17 = vmax.f32 %v615_v13, 0.0 }
 0x1cf   : > { %v674_v19 = vmax.f32 %v617_v15, 0.0 }
 0x1d0   : > { %v697_v20 = vpack.c.bf16 %v673_v17, %v671_v16 }
 0x1d1   : > { %v698_v21 = vpack.c.bf16 %v674_v19, %v672_v18  ;;  %v620_v22 = vpop.f32.mrb[16].mxu0  ;;  %v5669_v19 = vld [vmem:[#allocation8 + $0x1e4] ss:$8 sps:$4 sm:$0xff]  }
 0x1d2   : > { %v621_v23 = vadd.f32 %v620_v22, %v6626_v27  ;;  %v622_v25 = vpop.f32.mrb[17].mxu0  ;;  %1307 = vmatprep.subr.bf16.mxu0 %v5669_v19  ;;  %v5670_v22 = vld [vmem:[#allocation8 + $0x1f0] ss:$8 sps:$4 sm:$0xff]  }
 0x1d3   : > { %v623_v29 = vadd.f32 %v622_v25, %v6629_v28  ;;  %v624_v30 = vpop.f32.mrb[18].mxu0  ;;  %974 = vmatprep.mubr.bf16.mxu1 %v698_v21  ;;  %v5672_v21 = vld [vmem:[#allocation8 + $0x1f4] ss:$8 sps:$4 sm:$0xff]  }
 0x1d4   : > { %v625_v31 = vadd.f32 %v624_v30, %v6626_v27  ;;  %v626_v32 = vpop.f32.mrb[19].mxu0  ;;  %975 = vmatmul.mubr.bf16.gmra.mrb[12].mxu1 %v697_v20  ;;  %v675_v34 = vmax.f32 %v621_v23, 0.0  ;;  %v5667_v20 = vld [vmem:[#allocation8 + $0x1e0] ss:$8 sps:$4 sm:$0xff]   ;;  %v5675_v23 = vld [vmem:[#allocation8 + $0x204] ss:$8 sps:$4 sm:$0xff]  }
 0x1d5   : > { %v627_v33 = vadd.f32 %v626_v32, %v6629_v28  ;;  %v676_v36 = vmax.f32 %v623_v29, 0.0  ;;  %1308 = vmatpush1.bf16.msra.mxu0 %v5667_v20  ;;  %v5678_v25 = vld [vmem:[#allocation8 + $0x214] ss:$8 sps:$4 sm:$0xff]   ;;  %1646 = vmatprep.subr.bf16.mxu1 %v5675_v23  ;;  %v5681_v29 = vld [vmem:[#allocation8 + $0x224] ss:$8 sps:$4 sm:$0xff]  }
 0x1d6   : > { %v677_v35 = vmax.f32 %v625_v31, 0.0  ;;  %1309 = vmatprep.subr.bf16.mxu0 %v5672_v21  ;;  %v5679_v30 = vld [vmem:[#allocation8 + $0x220] ss:$8 sps:$4 sm:$0xff]   ;;  %v5684_v31 = vld [vmem:[#allocation8 + $0x234] ss:$8 sps:$4 sm:$0xff]  }
 0x1d7   : > { %v678_v37 = vmax.f32 %v627_v33, 0.0  ;;  %v5682_v32 = vld [vmem:[#allocation8 + $0x230] ss:$8 sps:$4 sm:$0xff]   ;;  %v5687_v33 = vld [vmem:[#allocation8 + $0x244] ss:$8 sps:$4 sm:$0xff]  }
 0x1d8   : > { %v699_v38 = vpack.c.bf16 %v677_v35, %v675_v34  ;;  %v5685_v34 = vld [vmem:[#allocation8 + $0x240] ss:$8 sps:$4 sm:$0xff]   ;;  %v5690_v35 = vld [vmem:[#allocation8 + $0x254] ss:$8 sps:$4 sm:$0xff]  }
 0x1d9   : > { %v700_v39 = vpack.c.bf16 %v678_v37, %v676_v36  ;;  %v630_v40 = vpop.f32.mrb[20].mxu0  ;;  %1310 = vmatpush1.bf16.msra.mxu0 %v5670_v22  ;;  %v5688_v36 = vld [vmem:[#allocation8 + $0x250] ss:$8 sps:$4 sm:$0xff]   ;;  %v5693_v37 = vld [vmem:[#allocation8 + $0x264] ss:$8 sps:$4 sm:$0xff]  }
 0x1da   : > { %v631_v41 = vadd.f32 %v630_v40, %v6626_v27  ;;  %v632_v42 = vpop.f32.mrb[21].mxu0  ;;  %v5694_v40 = vld [vmem:[#allocation8 + $0x270] ss:$8 sps:$4 sm:$0xff]  }
 0x1db   : > { %v633_v43 = vadd.f32 %v632_v42, %v6629_v28  ;;  %v634_v44 = vpop.f32.mrb[22].mxu0  ;;  %984 = vmatprep.mubr.bf16.mxu1 %v700_v39  ;;  %v5696_v39 = vld [vmem:[#allocation8 + $0x274] ss:$8 sps:$4 sm:$0xff]   ;;  %v5697_v42 = vld [vmem:[#allocation8 + $0x280] ss:$8 sps:$4 sm:$0xff]  }
 0x1dc   : > { %v635_v45 = vadd.f32 %v634_v44, %v6626_v27  ;;  %v636_v46 = vpop.f32.mrb[23].mxu0  ;;  %985 = vmatmul.mubr.bf16.gmra.mrb[16].mxu1 %v699_v38  ;;  %v679_v48 = vmax.f32 %v631_v41, 0.0  ;;  %v5691_v38 = vld [vmem:[#allocation8 + $0x260] ss:$8 sps:$4 sm:$0xff]   ;;  %v5699_v41 = vld [vmem:[#allocation8 + $0x284] ss:$8 sps:$4 sm:$0xff]  }
 0x1dd   : > { %v637_v47 = vadd.f32 %v636_v46, %v6629_v28  ;;  %v680_v50 = vmax.f32 %v633_v43, 0.0  ;;  %v5702_v43 = vld [vmem:[#allocation8 + $0x294] ss:$8 sps:$4 sm:$0xff]   ;;  %v5700_v44 = vld [vmem:[#allocation8 + $0x290] ss:$8 sps:$4 sm:$0xff]  }
 0x1de   : > { %v681_v49 = vmax.f32 %v635_v45, 0.0  ;;  %v5705_v45 = vld [vmem:[#allocation8 + $0x2a4] ss:$8 sps:$4 sm:$0xff]   ;;  %v5703_v46 = vld [vmem:[#allocation8 + $0x2a0] ss:$8 sps:$4 sm:$0xff]  }
 0x1df   : > { %v682_v51 = vmax.f32 %v637_v47, 0.0  ;;  %v5708_v47 = vld [vmem:[#allocation8 + $0x2b4] ss:$8 sps:$4 sm:$0xff]  }
 0x1e0   : > { %v701_v52 = vpack.c.bf16 %v681_v49, %v679_v48  ;;  %v5706_v48 = vld [vmem:[#allocation8 + $0x2b0] ss:$8 sps:$4 sm:$0xff]   ;;  %v5711_v49 = vld [vmem:[#allocation8 + $0x2c4] ss:$8 sps:$4 sm:$0xff]  }
 0x1e1   : > { %v702_v53 = vpack.c.bf16 %v682_v51, %v680_v50  ;;  %v640_v54 = vpop.f32.mrb[24].mxu0  ;;  %v5709_v50 = vld [vmem:[#allocation8 + $0x2c0] ss:$8 sps:$4 sm:$0xff]   ;;  %v5714_v51 = vld [vmem:[#allocation8 + $0x2d4] ss:$8 sps:$4 sm:$0xff]  }
 0x1e2   : > { %v641_v55 = vadd.f32 %v640_v54, %v6626_v27  ;;  %v642_v56 = vpop.f32.mrb[25].mxu0 }
 0x1e3   : > { %v643_v57 = vadd.f32 %v642_v56, %v6629_v28  ;;  %v644_v58 = vpop.f32.mrb[26].mxu0  ;;  %994 = vmatprep.mubr.bf16.mxu1 %v702_v53  ;;  %v740_v53 = vld [vmem:[#allocation7 + $0x2] sm:$0x3] }
 0x1e4   : > { %v645_v59 = vadd.f32 %v644_v58, %v6626_v27  ;;  %v646_v60 = vpop.f32.mrb[27].mxu0  ;;  %995 = vmatmul.mubr.bf16.gmra.mrb[20].mxu1 %v701_v52  ;;  %v683_v62 = vmax.f32 %v641_v55, 0.0  ;;  %v5712_v52 = vld [vmem:[#allocation8 + $0x2d0] ss:$8 sps:$4 sm:$0xff]   ;;  %v6664_v54 = vrot.slane %v740_v53, %v6621_v24  ;;  %v6667_v55 = vrot.slane %v740_v53, %v6623_v26 }
 0x1e5   : > { %v647_v61 = vadd.f32 %v646_v60, %v6629_v28  ;;  %v684_v1 = vmax.f32 %v643_v57, 0.0 }
 0x1e6   : > { %v685_v63 = vmax.f32 %v645_v59, 0.0 }
 0x1e7   : > { %v686_v2 = vmax.f32 %v647_v61, 0.0 }
 0x1e8   : > { %v703_v3 = vpack.c.bf16 %v685_v63, %v683_v62 }
 0x1e9   : > { %v704_v4 = vpack.c.bf16 %v686_v2, %v684_v1  ;;  %v650_v5 = vpop.f32.mrb[28].mxu0 }
 0x1ea   : > { %v651_v6 = vadd.f32 %v650_v5, %v6626_v27  ;;  %v652_v7 = vpop.f32.mrb[29].mxu0 }
 0x1eb   : > { %v653_v8 = vadd.f32 %v652_v7, %v6629_v28  ;;  %v654_v9 = vpop.f32.mrb[30].mxu0  ;;  %1004 = vmatprep.mubr.bf16.mxu1 %v704_v4 }
 0x1ec   : > { %v655_v10 = vadd.f32 %v654_v9, %v6626_v27  ;;  %v656_v11 = vpop.f32.mrb[31].mxu0  ;;  %1005 = vmatmul.mubr.bf16.gmra.mrb[24].mxu1 %v703_v3  ;;  %v687_v13 = vmax.f32 %v651_v6, 0.0  ;;  %v5673_v27 = vld [vmem:[#allocation8 + $0x200] ss:$8 sps:$4 sm:$0xff]  }
 0x1ed   : > { %v657_v12 = vadd.f32 %v656_v11, %v6629_v28  ;;  %v688_v15 = vmax.f32 %v653_v8, 0.0  ;;  %1647 = vmatpush1.bf16.msra.mxu1 %v5673_v27  ;;  %v5676_v28 = vld [vmem:[#allocation8 + $0x210] ss:$8 sps:$4 sm:$0xff]  }
 0x1ee   : > { %v689_v14 = vmax.f32 %v655_v10, 0.0  ;;  %1648 = vmatprep.subr.bf16.mxu1 %v5678_v25 }
 0x1ef   : > { %v690_v16 = vmax.f32 %v657_v12, 0.0 }
 0x1f0   : > { %v705_v17 = vpack.c.bf16 %v689_v14, %v687_v13 }
 0x1f1   : > { %v706_v18 = vpack.c.bf16 %v690_v16, %v688_v15  ;;  %1649 = vmatpush1.bf16.msra.mxu1 %v5676_v28 }
 0x1f2   : > { %1650 = vmatprep.subr.bf16.mxu1 %v5681_v29 }
 0x1f3   : > { %1014 = vmatprep.mubr.bf16.mxu1 %v706_v18 }
 0x1f4   : > { %1015 = vmatmul.mubr.bf16.gmra.mrb[28].mxu1 %v705_v17 }
 0x1f5   : > { %1651 = vmatpush1.bf16.msra.mxu1 %v5679_v30 }
 0x1f6   : > { %1652 = vmatprep.subr.bf16.mxu1 %v5684_v31 }
 0x1f9   : > { %1653 = vmatpush1.bf16.msra.mxu1 %v5682_v32 }
 0x1fa   : > { %1654 = vmatprep.subr.bf16.mxu1 %v5687_v33 }
 0x1fd   : > { %1655 = vmatpush1.bf16.msra.mxu1 %v5685_v34 }
 0x1fe   : > { %1656 = vmatprep.subr.bf16.mxu1 %v5690_v35 }
 0x201   : > { %1657 = vmatpush1.bf16.msra.mxu1 %v5688_v36 }
 0x202   : > { %1658 = vmatprep.subr.bf16.mxu1 %v5693_v37 }
 0x205   : > { %1659 = vmatpush1.bf16.msra.mxu1 %v5691_v38 }
 0x206   : > { %1660 = vmatprep.subr.bf16.mxu1 %v5696_v39 }
 0x209   : > { %1661 = vmatpush1.bf16.msra.mxu1 %v5694_v40 }
 0x20a   : > { %1662 = vmatprep.subr.bf16.mxu1 %v5699_v41 }
 0x20d   : > { %1663 = vmatpush1.bf16.msra.mxu1 %v5697_v42 }
 0x20e   : > { %1664 = vmatprep.subr.bf16.mxu1 %v5702_v43 }
 0x211   : > { %1665 = vmatpush1.bf16.msra.mxu1 %v5700_v44 }
 0x212   : > { %1666 = vmatprep.subr.bf16.mxu1 %v5705_v45 }
 0x215   : > { %1667 = vmatpush1.bf16.msra.mxu1 %v5703_v46 }
 0x216   : > { %1668 = vmatprep.subr.bf16.mxu1 %v5708_v47 }
 0x219   : > { %1669 = vmatpush1.bf16.msra.mxu1 %v5706_v48 }
 0x21a   : > { %1670 = vmatprep.subr.bf16.mxu1 %v5711_v49 }
 0x21d   : > { %1671 = vmatpush1.bf16.msra.mxu1 %v5709_v50 }
 0x21e   : > { %1672 = vmatprep.subr.bf16.mxu1 %v5714_v51 }
 0x221   : > { %1673 = vmatpush1.bf16.msra.mxu1 %v5712_v52 }
 0x28f   : > { %v946_v56 = vpop.f32.mrb[0].mxu1 }
 0x290   : > { %v947_v57 = vadd.f32 %v946_v56, %v6664_v54  ;;  %v948_v58 = vpop.f32.mrb[1].mxu1 }
 0x291   : > { %v949_v59 = vadd.f32 %v948_v58, %v6667_v55  ;;  %v950_v60 = vpop.f32.mrb[2].mxu1 }
 0x292   : > { %v951_v61 = vadd.f32 %v950_v60, %v6664_v54  ;;  %v952_v62 = vpop.f32.mrb[3].mxu1  ;;  %v1025_v1 = vmax.f32 %v947_v57, 0.0 }
 0x293   : > { %v953_v63 = vadd.f32 %v952_v62, %v6667_v55  ;;  %v1026_v3 = vmax.f32 %v949_v59, 0.0 }
 0x294   : > { %v1027_v2 = vmax.f32 %v951_v61, 0.0 }
 0x295   : > { %v1028_v4 = vmax.f32 %v953_v63, 0.0 }
 0x296   : > { %v1057_v5 = vpack.c.bf16 %v1027_v2, %v1025_v1 }
 0x297   : > { %v1058_v6 = vpack.c.bf16 %v1028_v4, %v1026_v3  ;;  %v956_v7 = vpop.f32.mrb[4].mxu1 }
 0x298   : > { %v957_v8 = vadd.f32 %v956_v7, %v6664_v54  ;;  %v958_v9 = vpop.f32.mrb[5].mxu1 }
 0x299   : > { %v959_v10 = vadd.f32 %v958_v9, %v6667_v55  ;;  %v960_v11 = vpop.f32.mrb[6].mxu1  ;;  %1311 = vmatprep.mubr.bf16.mxu0 %v1058_v6 }
 0x29a   : > { %v961_v12 = vadd.f32 %v960_v11, %v6664_v54  ;;  %v962_v13 = vpop.f32.mrb[7].mxu1  ;;  %1312 = vmatmul.mubr.bf16.vlgmr.msra.gmra.mrb[32].mxu0 %v1057_v5  ;;  %v1029_v15 = vmax.f32 %v957_v8, 0.0 }
 0x29b   : > { %v963_v14 = vadd.f32 %v962_v13, %v6667_v55  ;;  %v1030_v17 = vmax.f32 %v959_v10, 0.0 }
 0x29c   : > { %v1031_v16 = vmax.f32 %v961_v12, 0.0 }
 0x29d   : > { %v1032_v18 = vmax.f32 %v963_v14, 0.0 }
 0x29e   : > { %v1059_v19 = vpack.c.bf16 %v1031_v16, %v1029_v15 }
 0x29f   : > { %v1060_v20 = vpack.c.bf16 %v1032_v18, %v1030_v17  ;;  %v966_v21 = vpop.f32.mrb[8].mxu1 }
 0x2a0   : > { %v967_v22 = vadd.f32 %v966_v21, %v6664_v54  ;;  %v968_v27 = vpop.f32.mrb[9].mxu1 }
 0x2a1   : > { %v969_v23 = vadd.f32 %v968_v27, %v6667_v55  ;;  %v970_v25 = vpop.f32.mrb[10].mxu1  ;;  %1321 = vmatprep.mubr.bf16.mxu0 %v1060_v20 }
 0x2a2   : > { %v971_v28 = vadd.f32 %v970_v25, %v6664_v54  ;;  %v972_v29 = vpop.f32.mrb[11].mxu1  ;;  %1322 = vmatmul.mubr.bf16.gmra.mrb[36].mxu0 %v1059_v19  ;;  %v1033_v31 = vmax.f32 %v967_v22, 0.0 }
 0x2a3   : > { %v973_v30 = vadd.f32 %v972_v29, %v6667_v55  ;;  %v1034_v33 = vmax.f32 %v969_v23, 0.0 }
 0x2a4   : > { %v1035_v32 = vmax.f32 %v971_v28, 0.0 }
 0x2a5   : > { %v1036_v34 = vmax.f32 %v973_v30, 0.0 }
 0x2a6   : > { %v1061_v35 = vpack.c.bf16 %v1035_v32, %v1033_v31 }
 0x2a7   : > { %v1062_v36 = vpack.c.bf16 %v1036_v34, %v1034_v33  ;;  %v976_v37 = vpop.f32.mrb[12].mxu1 }
 0x2a8   : > { %v977_v38 = vadd.f32 %v976_v37, %v6664_v54  ;;  %v978_v39 = vpop.f32.mrb[13].mxu1 }
 0x2a9   : > { %v979_v40 = vadd.f32 %v978_v39, %v6667_v55  ;;  %v980_v41 = vpop.f32.mrb[14].mxu1  ;;  %1331 = vmatprep.mubr.bf16.mxu0 %v1062_v36 }
 0x2aa   : > { %v981_v42 = vadd.f32 %v980_v41, %v6664_v54  ;;  %v982_v43 = vpop.f32.mrb[15].mxu1  ;;  %1332 = vmatmul.mubr.bf16.gmra.mrb[40].mxu0 %v1061_v35  ;;  %v1037_v45 = vmax.f32 %v977_v38, 0.0 }
 0x2ab   : > { %v983_v44 = vadd.f32 %v982_v43, %v6667_v55  ;;  %v1038_v47 = vmax.f32 %v979_v40, 0.0 }
 0x2ac   : > { %v1039_v46 = vmax.f32 %v981_v42, 0.0 }
 0x2ad   : > { %v1040_v48 = vmax.f32 %v983_v44, 0.0 }
 0x2ae   : > { %v1063_v49 = vpack.c.bf16 %v1039_v46, %v1037_v45 }
 0x2af   : > { %v1064_v50 = vpack.c.bf16 %v1040_v48, %v1038_v47  ;;  %v986_v51 = vpop.f32.mrb[16].mxu1  ;;  %v5717_v48 = vld [vmem:[#allocation8 + $0x2e4] ss:$8 sps:$4 sm:$0xff]  }
 0x2b0   : > { %v987_v52 = vadd.f32 %v986_v51, %v6664_v54  ;;  %v988_v53 = vpop.f32.mrb[17].mxu1  ;;  %1674 = vmatprep.subr.bf16.mxu1 %v5717_v48  ;;  %v5718_v51 = vld [vmem:[#allocation8 + $0x2f0] ss:$8 sps:$4 sm:$0xff]  }
 0x2b1   : > { %v989_v56 = vadd.f32 %v988_v53, %v6667_v55  ;;  %v990_v57 = vpop.f32.mrb[18].mxu1  ;;  %1341 = vmatprep.mubr.bf16.mxu0 %v1064_v50  ;;  %v5720_v50 = vld [vmem:[#allocation8 + $0x2f4] ss:$8 sps:$4 sm:$0xff]  }
 0x2b2   : > { %v991_v58 = vadd.f32 %v990_v57, %v6664_v54  ;;  %v992_v59 = vpop.f32.mrb[19].mxu1  ;;  %1342 = vmatmul.mubr.bf16.gmra.mrb[44].mxu0 %v1063_v49  ;;  %v1041_v61 = vmax.f32 %v987_v52, 0.0  ;;  %v5715_v49 = vld [vmem:[#allocation8 + $0x2e0] ss:$8 sps:$4 sm:$0xff]   ;;  %v5723_v52 = vld [vmem:[#allocation8 + $0x304] ss:$8 sps:$4 sm:$0xff]  }
 0x2b3   : > { %v993_v60 = vadd.f32 %v992_v59, %v6667_v55  ;;  %v1042_v63 = vmax.f32 %v989_v56, 0.0  ;;  %1675 = vmatpush1.bf16.msra.mxu1 %v5715_v49  ;;  %v5726_v53 = vld [vmem:[#allocation8 + $0x314] ss:$8 sps:$4 sm:$0xff]   ;;  %2013 = vmatprep.subr.bf16.mxu0 %v5723_v52  ;;  %v5729_v56 = vld [vmem:[#allocation8 + $0x324] ss:$8 sps:$4 sm:$0xff]  }
 0x2b4   : > { %v1043_v62 = vmax.f32 %v991_v58, 0.0  ;;  %1676 = vmatprep.subr.bf16.mxu1 %v5720_v50  ;;  %v5727_v57 = vld [vmem:[#allocation8 + $0x320] ss:$8 sps:$4 sm:$0xff]   ;;  %v5732_v58 = vld [vmem:[#allocation8 + $0x334] ss:$8 sps:$4 sm:$0xff]  }
 0x2b5   : > { %v1044_v1 = vmax.f32 %v993_v60, 0.0  ;;  %v5730_v59 = vld [vmem:[#allocation8 + $0x330] ss:$8 sps:$4 sm:$0xff]   ;;  %v5735_v60 = vld [vmem:[#allocation8 + $0x344] ss:$8 sps:$4 sm:$0xff]  }
 0x2b6   : > { %v1065_v2 = vpack.c.bf16 %v1043_v62, %v1041_v61  ;;  %v5733_v61 = vld [vmem:[#allocation8 + $0x340] ss:$8 sps:$4 sm:$0xff]   ;;  %v5738_v62 = vld [vmem:[#allocation8 + $0x354] ss:$8 sps:$4 sm:$0xff]  }
 0x2b7   : > { %v1066_v3 = vpack.c.bf16 %v1044_v1, %v1042_v63  ;;  %v996_v4 = vpop.f32.mrb[20].mxu1  ;;  %1677 = vmatpush1.bf16.msra.mxu1 %v5718_v51  ;;  %v5736_v63 = vld [vmem:[#allocation8 + $0x350] ss:$8 sps:$4 sm:$0xff]   ;;  %v5741_v1 = vld [vmem:[#allocation8 + $0x364] ss:$8 sps:$4 sm:$0xff]  }
 0x2b8   : > { %v997_v5 = vadd.f32 %v996_v4, %v6664_v54  ;;  %v998_v6 = vpop.f32.mrb[21].mxu1  ;;  %v5742_v4 = vld [vmem:[#allocation8 + $0x370] ss:$8 sps:$4 sm:$0xff]  }
 0x2b9   : > { %v999_v7 = vadd.f32 %v998_v6, %v6667_v55  ;;  %v1000_v8 = vpop.f32.mrb[22].mxu1  ;;  %1351 = vmatprep.mubr.bf16.mxu0 %v1066_v3  ;;  %v5744_v3 = vld [vmem:[#allocation8 + $0x374] ss:$8 sps:$4 sm:$0xff]   ;;  %v5745_v6 = vld [vmem:[#allocation8 + $0x380] ss:$8 sps:$4 sm:$0xff]  }
 0x2ba   : > { %v1001_v9 = vadd.f32 %v1000_v8, %v6664_v54  ;;  %v1002_v10 = vpop.f32.mrb[23].mxu1  ;;  %1352 = vmatmul.mubr.bf16.gmra.mrb[48].mxu0 %v1065_v2  ;;  %v1045_v12 = vmax.f32 %v997_v5, 0.0  ;;  %v5739_v2 = vld [vmem:[#allocation8 + $0x360] ss:$8 sps:$4 sm:$0xff]   ;;  %v5747_v5 = vld [vmem:[#allocation8 + $0x384] ss:$8 sps:$4 sm:$0xff]  }
 0x2bb   : > { %v1003_v11 = vadd.f32 %v1002_v10, %v6667_v55  ;;  %v1046_v14 = vmax.f32 %v999_v7, 0.0  ;;  %v5750_v7 = vld [vmem:[#allocation8 + $0x394] ss:$8 sps:$4 sm:$0xff]   ;;  %v5748_v8 = vld [vmem:[#allocation8 + $0x390] ss:$8 sps:$4 sm:$0xff]  }
 0x2bc   : > { %v1047_v13 = vmax.f32 %v1001_v9, 0.0  ;;  %v5753_v9 = vld [vmem:[#allocation8 + $0x3a4] ss:$8 sps:$4 sm:$0xff]   ;;  %v5751_v10 = vld [vmem:[#allocation8 + $0x3a0] ss:$8 sps:$4 sm:$0xff]  }
 0x2bd   : > { %v1048_v15 = vmax.f32 %v1003_v11, 0.0  ;;  %v5756_v11 = vld [vmem:[#allocation8 + $0x3b4] ss:$8 sps:$4 sm:$0xff]  }
 0x2be   : > { %v1067_v16 = vpack.c.bf16 %v1047_v13, %v1045_v12  ;;  %v5754_v12 = vld [vmem:[#allocation8 + $0x3b0] ss:$8 sps:$4 sm:$0xff]   ;;  %v5759_v13 = vld [vmem:[#allocation8 + $0x3c4] ss:$8 sps:$4 sm:$0xff]  }
 0x2bf   : > { %v1068_v17 = vpack.c.bf16 %v1048_v15, %v1046_v14  ;;  %v1006_v18 = vpop.f32.mrb[24].mxu1  ;;  %v5757_v14 = vld [vmem:[#allocation8 + $0x3c0] ss:$8 sps:$4 sm:$0xff]   ;;  %v5762_v15 = vld [vmem:[#allocation8 + $0x3d4] ss:$8 sps:$4 sm:$0xff]  }
 0x2c0   : > { %v1007_v19 = vadd.f32 %v1006_v18, %v6664_v54  ;;  %v1008_v20 = vpop.f32.mrb[25].mxu1 }
 0x2c1   : > { %v1009_v21 = vadd.f32 %v1008_v20, %v6667_v55  ;;  %v1010_v22 = vpop.f32.mrb[26].mxu1  ;;  %1361 = vmatprep.mubr.bf16.mxu0 %v1068_v17  ;;  %v1107_v17 = vld [vmem:[#allocation7 + $0x4] sm:$0x3] }
 0x2c2   : > { %v1011_v27 = vadd.f32 %v1010_v22, %v6664_v54  ;;  %v1012_v23 = vpop.f32.mrb[27].mxu1  ;;  %1362 = vmatmul.mubr.bf16.gmra.mrb[52].mxu0 %v1067_v16  ;;  %v1049_v28 = vmax.f32 %v1007_v19, 0.0  ;;  %v5760_v16 = vld [vmem:[#allocation8 + $0x3d0] ss:$8 sps:$4 sm:$0xff]   ;;  %v6702_v18 = vrot.slane %v1107_v17, %v6621_v24  ;;  %v6705_v19 = vrot.slane %v1107_v17, %v6623_v26 }
 0x2c3   : > { %v1013_v25 = vadd.f32 %v1012_v23, %v6667_v55  ;;  %v1050_v30 = vmax.f32 %v1009_v21, 0.0 }
 0x2c4   : > { %v1051_v29 = vmax.f32 %v1011_v27, 0.0 }
 0x2c5   : > { %v1052_v31 = vmax.f32 %v1013_v25, 0.0 }
 0x2c6   : > { %v1069_v32 = vpack.c.bf16 %v1051_v29, %v1049_v28 }
 0x2c7   : > { %v1070_v33 = vpack.c.bf16 %v1052_v31, %v1050_v30  ;;  %v1016_v34 = vpop.f32.mrb[28].mxu1 }
 0x2c8   : > { %v1017_v35 = vadd.f32 %v1016_v34, %v6664_v54  ;;  %v1018_v36 = vpop.f32.mrb[29].mxu1 }
 0x2c9   : > { %v1019_v37 = vadd.f32 %v1018_v36, %v6667_v55  ;;  %v1020_v38 = vpop.f32.mrb[30].mxu1  ;;  %1371 = vmatprep.mubr.bf16.mxu0 %v1070_v33 }
 0x2ca   : > { %v1021_v39 = vadd.f32 %v1020_v38, %v6664_v54  ;;  %v1022_v40 = vpop.f32.mrb[31].mxu1  ;;  %1372 = vmatmul.mubr.bf16.gmra.mrb[56].mxu0 %v1069_v32  ;;  %v1053_v42 = vmax.f32 %v1017_v35, 0.0  ;;  %v5721_v54 = vld [vmem:[#allocation8 + $0x300] ss:$8 sps:$4 sm:$0xff]  }
 0x2cb   : > { %v1023_v41 = vadd.f32 %v1022_v40, %v6667_v55  ;;  %v1054_v44 = vmax.f32 %v1019_v37, 0.0  ;;  %2014 = vmatpush1.bf16.msra.mxu0 %v5721_v54  ;;  %v5724_v55 = vld [vmem:[#allocation8 + $0x310] ss:$8 sps:$4 sm:$0xff]  }
 0x2cc   : > { %v1055_v43 = vmax.f32 %v1021_v39, 0.0  ;;  %2015 = vmatprep.subr.bf16.mxu0 %v5726_v53 }
 0x2cd   : > { %v1056_v45 = vmax.f32 %v1023_v41, 0.0 }
 0x2ce   : > { %v1071_v46 = vpack.c.bf16 %v1055_v43, %v1053_v42 }
 0x2cf   : > { %v1072_v47 = vpack.c.bf16 %v1056_v45, %v1054_v44  ;;  %2016 = vmatpush1.bf16.msra.mxu0 %v5724_v55 }
 0x2d0   : > { %2017 = vmatprep.subr.bf16.mxu0 %v5729_v56 }
 0x2d1   : > { %1381 = vmatprep.mubr.bf16.mxu0 %v1072_v47 }
 0x2d2   : > { %1382 = vmatmul.mubr.bf16.gmra.mrb[60].mxu0 %v1071_v46 }
 0x2d3   : > { %2018 = vmatpush1.bf16.msra.mxu0 %v5727_v57 }
 0x2d4   : > { %2019 = vmatprep.subr.bf16.mxu0 %v5732_v58 }
 0x2d7   : > { %2020 = vmatpush1.bf16.msra.mxu0 %v5730_v59 }
 0x2d8   : > { %2021 = vmatprep.subr.bf16.mxu0 %v5735_v60 }
 0x2db   : > { %2022 = vmatpush1.bf16.msra.mxu0 %v5733_v61 }
 0x2dc   : > { %2023 = vmatprep.subr.bf16.mxu0 %v5738_v62 }
 0x2df   : > { %2024 = vmatpush1.bf16.msra.mxu0 %v5736_v63 }
 0x2e0   : > { %2025 = vmatprep.subr.bf16.mxu0 %v5741_v1 }
 0x2e3   : > { %2026 = vmatpush1.bf16.msra.mxu0 %v5739_v2 }
 0x2e4   : > { %2027 = vmatprep.subr.bf16.mxu0 %v5744_v3 }
 0x2e7   : > { %2028 = vmatpush1.bf16.msra.mxu0 %v5742_v4 }
 0x2e8   : > { %2029 = vmatprep.subr.bf16.mxu0 %v5747_v5 }
 0x2eb   : > { %2030 = vmatpush1.bf16.msra.mxu0 %v5745_v6 }
 0x2ec   : > { %2031 = vmatprep.subr.bf16.mxu0 %v5750_v7 }
 0x2ef   : > { %2032 = vmatpush1.bf16.msra.mxu0 %v5748_v8 }
 0x2f0   : > { %2033 = vmatprep.subr.bf16.mxu0 %v5753_v9 }
 0x2f3   : > { %2034 = vmatpush1.bf16.msra.mxu0 %v5751_v10 }
 0x2f4   : > { %2035 = vmatprep.subr.bf16.mxu0 %v5756_v11 }
 0x2f7   : > { %2036 = vmatpush1.bf16.msra.mxu0 %v5754_v12 }
 0x2f8   : > { %2037 = vmatprep.subr.bf16.mxu0 %v5759_v13 }
 0x2fb   : > { %2038 = vmatpush1.bf16.msra.mxu0 %v5757_v14 }
 0x2fc   : > { %2039 = vmatprep.subr.bf16.mxu0 %v5762_v15 }
 0x2ff   : > { %2040 = vmatpush1.bf16.msra.mxu0 %v5760_v16 }
 0x36d   : > { %v1313_v20 = vpop.f32.mrb[32].mxu0 }
 0x36e   : > { %v1314_v21 = vadd.f32 %v1313_v20, %v6702_v18  ;;  %v1315_v22 = vpop.f32.mrb[33].mxu0 }
 0x36f   : > { %v1316_v27 = vadd.f32 %v1315_v22, %v6705_v19  ;;  %v1317_v23 = vpop.f32.mrb[34].mxu0 }
 0x370   : > { %v1318_v25 = vadd.f32 %v1317_v23, %v6702_v18  ;;  %v1319_v28 = vpop.f32.mrb[35].mxu0  ;;  %v1392_v30 = vmax.f32 %v1314_v21, 0.0 }
 0x371   : > { %v1320_v29 = vadd.f32 %v1319_v28, %v6705_v19  ;;  %v1393_v32 = vmax.f32 %v1316_v27, 0.0 }
 0x372   : > { %v1394_v31 = vmax.f32 %v1318_v25, 0.0 }
 0x373   : > { %v1395_v33 = vmax.f32 %v1320_v29, 0.0 }
 0x374   : > { %v1424_v34 = vpack.c.bf16 %v1394_v31, %v1392_v30 }
 0x375   : > { %v1425_v35 = vpack.c.bf16 %v1395_v33, %v1393_v32  ;;  %v1323_v36 = vpop.f32.mrb[36].mxu0 }
 0x376   : > { %v1324_v37 = vadd.f32 %v1323_v36, %v6702_v18  ;;  %v1325_v38 = vpop.f32.mrb[37].mxu0 }
 0x377   : > { %v1326_v39 = vadd.f32 %v1325_v38, %v6705_v19  ;;  %v1327_v40 = vpop.f32.mrb[38].mxu0  ;;  %1678 = vmatprep.mubr.bf16.mxu1 %v1425_v35 }
 0x378   : > { %v1328_v41 = vadd.f32 %v1327_v40, %v6702_v18  ;;  %v1329_v42 = vpop.f32.mrb[39].mxu0  ;;  %1679 = vmatmul.mubr.bf16.vlgmr.msra.gmra.mrb[32].mxu1 %v1424_v34  ;;  %v1396_v44 = vmax.f32 %v1324_v37, 0.0 }
 0x379   : > { %v1330_v43 = vadd.f32 %v1329_v42, %v6705_v19  ;;  %v1397_v46 = vmax.f32 %v1326_v39, 0.0 }
 0x37a   : > { %v1398_v45 = vmax.f32 %v1328_v41, 0.0 }
 0x37b   : > { %v1399_v47 = vmax.f32 %v1330_v43, 0.0 }
 0x37c   : > { %v1426_v48 = vpack.c.bf16 %v1398_v45, %v1396_v44 }
 0x37d   : > { %v1427_v49 = vpack.c.bf16 %v1399_v47, %v1397_v46  ;;  %v1333_v50 = vpop.f32.mrb[40].mxu0 }
 0x37e   : > { %v1334_v51 = vadd.f32 %v1333_v50, %v6702_v18  ;;  %v1335_v54 = vpop.f32.mrb[41].mxu0 }
 0x37f   : > { %v1336_v52 = vadd.f32 %v1335_v54, %v6705_v19  ;;  %v1337_v53 = vpop.f32.mrb[42].mxu0  ;;  %1688 = vmatprep.mubr.bf16.mxu1 %v1427_v49 }
 0x380   : > { %v1338_v55 = vadd.f32 %v1337_v53, %v6702_v18  ;;  %v1339_v56 = vpop.f32.mrb[43].mxu0  ;;  %1689 = vmatmul.mubr.bf16.gmra.mrb[36].mxu1 %v1426_v48  ;;  %v1400_v58 = vmax.f32 %v1334_v51, 0.0 }
 0x381   : > { %v1340_v57 = vadd.f32 %v1339_v56, %v6705_v19  ;;  %v1401_v60 = vmax.f32 %v1336_v52, 0.0 }
 0x382   : > { %v1402_v59 = vmax.f32 %v1338_v55, 0.0 }
 0x383   : > { %v1403_v61 = vmax.f32 %v1340_v57, 0.0 }
 0x384   : > { %v1428_v62 = vpack.c.bf16 %v1402_v59, %v1400_v58 }
 0x385   : > { %v1429_v63 = vpack.c.bf16 %v1403_v61, %v1401_v60  ;;  %v1343_v1 = vpop.f32.mrb[44].mxu0 }
 0x386   : > { %v1344_v2 = vadd.f32 %v1343_v1, %v6702_v18  ;;  %v1345_v3 = vpop.f32.mrb[45].mxu0 }
 0x387   : > { %v1346_v4 = vadd.f32 %v1345_v3, %v6705_v19  ;;  %v1347_v5 = vpop.f32.mrb[46].mxu0  ;;  %1698 = vmatprep.mubr.bf16.mxu1 %v1429_v63 }
 0x388   : > { %v1348_v6 = vadd.f32 %v1347_v5, %v6702_v18  ;;  %v1349_v7 = vpop.f32.mrb[47].mxu0  ;;  %1699 = vmatmul.mubr.bf16.gmra.mrb[40].mxu1 %v1428_v62  ;;  %v1404_v9 = vmax.f32 %v1344_v2, 0.0 }
 0x389   : > { %v1350_v8 = vadd.f32 %v1349_v7, %v6705_v19  ;;  %v1405_v11 = vmax.f32 %v1346_v4, 0.0 }
 0x38a   : > { %v1406_v10 = vmax.f32 %v1348_v6, 0.0 }
 0x38b   : > { %v1407_v12 = vmax.f32 %v1350_v8, 0.0 }
 0x38c   : > { %v1430_v13 = vpack.c.bf16 %v1406_v10, %v1404_v9 }
 0x38d   : > { %v1431_v14 = vpack.c.bf16 %v1407_v12, %v1405_v11  ;;  %v1353_v15 = vpop.f32.mrb[48].mxu0  ;;  %v5765_v12 = vld [vmem:[#allocation8 + $0x3e4] ss:$8 sps:$4 sm:$0xff]  }
 0x38e   : > { %v1354_v16 = vadd.f32 %v1353_v15, %v6702_v18  ;;  %v1355_v17 = vpop.f32.mrb[49].mxu0  ;;  %2041 = vmatprep.subr.bf16.mxu0 %v5765_v12  ;;  %v5769_v15 = vld [vmem:[#allocation5 + $0x80] ss:$8 sps:$4 sm:$0xff]   ;;  %v5825_v12 = vld [vmem:[#allocation8 + $0x4a4] ss:$8 sps:$4 sm:$0xff]  }
 0x38f   : > { %v1356_v20 = vadd.f32 %v1355_v17, %v6705_v19  ;;  %v1357_v21 = vpop.f32.mrb[50].mxu0  ;;  %1708 = vmatprep.mubr.bf16.mxu1 %v1431_v14  ;;  %v5768_v14 = vld [vmem:[#allocation8 + $0x3f4] ss:$8 sps:$4 sm:$0xff]   ;;  %v5772_v17 = vld [vmem:[#allocation5 + $0x90] ss:$8 sps:$4 sm:$0xff]  }
 0x390   : > { %v1358_v22 = vadd.f32 %v1357_v21, %v6702_v18  ;;  %v1359_v27 = vpop.f32.mrb[51].mxu0  ;;  %1709 = vmatmul.mubr.bf16.gmra.mrb[44].mxu1 %v1430_v13  ;;  %v1408_v25 = vmax.f32 %v1354_v16, 0.0  ;;  %v5763_v13 = vld [vmem:[#allocation8 + $0x3e0] ss:$8 sps:$4 sm:$0xff]   ;;  %v5774_v16 = vld [vmem:[#allocation5 + $0x94] ss:$8 sps:$4 sm:$0xff]  }
 0x391   : > { %v1360_v23 = vadd.f32 %v1359_v27, %v6705_v19  ;;  %v1409_v29 = vmax.f32 %v1356_v20, 0.0  ;;  %2042 = vmatpush1.bf16.msra.mxu0 %v5763_v13  ;;  %v5777_v20 = vld [vmem:[#allocation5 + $0xa4] ss:$8 sps:$4 sm:$0xff]   ;;  %v5775_v21 = vld [vmem:[#allocation5 + $0xa0] ss:$8 sps:$4 sm:$0xff]  }
 0x392   : > { %v1410_v28 = vmax.f32 %v1358_v22, 0.0  ;;  %2043 = vmatprep.subr.bf16.mxu0 %v5768_v14  ;;  %v5780_v22 = vld [vmem:[#allocation5 + $0xb4] ss:$8 sps:$4 sm:$0xff]   ;;  %v5778_v27 = vld [vmem:[#allocation5 + $0xb0] ss:$8 sps:$4 sm:$0xff]  }
 0x393   : > { %v1411_v30 = vmax.f32 %v1360_v23, 0.0  ;;  %v5783_v23 = vld [vmem:[#allocation5 + $0xc4] ss:$8 sps:$4 sm:$0xff]  }
 0x394   : > { %v1432_v31 = vpack.c.bf16 %v1410_v28, %v1408_v25  ;;  %v5781_v25 = vld [vmem:[#allocation5 + $0xc0] ss:$8 sps:$4 sm:$0xff]   ;;  %v5786_v28 = vld [vmem:[#allocation5 + $0xd4] ss:$8 sps:$4 sm:$0xff]  }
 0x395   : > { %v1433_v32 = vpack.c.bf16 %v1411_v30, %v1409_v29  ;;  %v1363_v33 = vpop.f32.mrb[52].mxu0  ;;  %v5784_v29 = vld [vmem:[#allocation5 + $0xd0] ss:$8 sps:$4 sm:$0xff]   ;;  %v5789_v30 = vld [vmem:[#allocation5 + $0xe4] ss:$8 sps:$4 sm:$0xff]  }
 0x396   : > { %v1364_v34 = vadd.f32 %v1363_v33, %v6702_v18  ;;  %v1365_v35 = vpop.f32.mrb[53].mxu0  ;;  %v5790_v33 = vld [vmem:[#allocation5 + $0xf0] ss:$8 sps:$4 sm:$0xff]  }
 0x397   : > { %v1366_v36 = vadd.f32 %v1365_v35, %v6705_v19  ;;  %v1367_v37 = vpop.f32.mrb[54].mxu0  ;;  %1718 = vmatprep.mubr.bf16.mxu1 %v1433_v32  ;;  %v5792_v32 = vld [vmem:[#allocation5 + $0xf4] ss:$8 sps:$4 sm:$0xff]   ;;  %v5793_v35 = vld [vmem:[#allocation8 + $0x400] ss:$8 sps:$4 sm:$0xff]  }
 0x398   : > { %v1368_v38 = vadd.f32 %v1367_v37, %v6702_v18  ;;  %v1369_v39 = vpop.f32.mrb[55].mxu0  ;;  %1719 = vmatmul.mubr.bf16.gmra.mrb[48].mxu1 %v1432_v31  ;;  %v1412_v41 = vmax.f32 %v1364_v34, 0.0  ;;  %v5787_v31 = vld [vmem:[#allocation5 + $0xe0] ss:$8 sps:$4 sm:$0xff]   ;;  %v5795_v34 = vld [vmem:[#allocation8 + $0x404] ss:$8 sps:$4 sm:$0xff]  }
 0x399   : > { %v1370_v40 = vadd.f32 %v1369_v39, %v6705_v19  ;;  %v1413_v43 = vmax.f32 %v1366_v36, 0.0  ;;  %v5798_v36 = vld [vmem:[#allocation8 + $0x414] ss:$8 sps:$4 sm:$0xff]   ;;  %v6024_v37 = vld [vmem:[%s6587_s1] ss:$8 sps:$4 sm:$0xff]  }
 0x39a   : > { %v1414_v42 = vmax.f32 %v1368_v38, 0.0  ;;  %v5796_v38 = vld [vmem:[#allocation8 + $0x410] ss:$8 sps:$4 sm:$0xff]   ;;  %v5801_v39 = vld [vmem:[#allocation8 + $0x424] ss:$8 sps:$4 sm:$0xff]  }
 0x39b   : > { %v1415_v44 = vmax.f32 %v1370_v40, 0.0  ;;  %v5799_v40 = vld [vmem:[#allocation8 + $0x420] ss:$8 sps:$4 sm:$0xff]  }
 0x39c   : > { %v1434_v45 = vpack.c.bf16 %v1414_v42, %v1412_v41  ;;  %v5804_v41 = vld [vmem:[#allocation8 + $0x434] ss:$8 sps:$4 sm:$0xff]   ;;  %v6025_v42 = vld [vmem:[%s6587_s1 + $0x10] ss:$8 sps:$4 sm:$0xff]  }
 0x39d   : > { %v1435_v46 = vpack.c.bf16 %v1415_v44, %v1413_v43  ;;  %v1373_v47 = vpop.f32.mrb[56].mxu0  ;;  %v5802_v43 = vld [vmem:[#allocation8 + $0x430] ss:$8 sps:$4 sm:$0xff]   ;;  %v5807_v44 = vld [vmem:[#allocation8 + $0x444] ss:$8 sps:$4 sm:$0xff]  }
 0x39e   : > { %v1374_v48 = vadd.f32 %v1373_v47, %v6702_v18  ;;  %v1375_v49 = vpop.f32.mrb[57].mxu0  ;;  %v6026_v47 = vld [vmem:[%s6587_s1 + $0x20] ss:$8 sps:$4 sm:$0xff]  }
 0x39f   : > { %v1376_v50 = vadd.f32 %v1375_v49, %v6705_v19  ;;  %v1377_v51 = vpop.f32.mrb[58].mxu0  ;;  %1728 = vmatprep.mubr.bf16.mxu1 %v1435_v46  ;;  %v5810_v46 = vld [vmem:[#allocation8 + $0x454] ss:$8 sps:$4 sm:$0xff]   ;;  %v5813_v49 = vld [vmem:[#allocation8 + $0x464] ss:$8 sps:$4 sm:$0xff]  }
 0x3a0   : > { %v1378_v54 = vadd.f32 %v1377_v51, %v6702_v18  ;;  %v1379_v52 = vpop.f32.mrb[59].mxu0  ;;  %1729 = vmatmul.mubr.bf16.gmra.mrb[52].mxu1 %v1434_v45  ;;  %v1416_v55 = vmax.f32 %v1374_v48, 0.0  ;;  %v5805_v45 = vld [vmem:[#allocation8 + $0x440] ss:$8 sps:$4 sm:$0xff]   ;;  %v5808_v48 = vld [vmem:[#allocation8 + $0x450] ss:$8 sps:$4 sm:$0xff]  }
 0x3a1   : > { %v1380_v53 = vadd.f32 %v1379_v52, %v6705_v19  ;;  %v1417_v57 = vmax.f32 %v1376_v50, 0.0  ;;  %v1474_v50 = vld [vmem:[#allocation7 + $0x6] sm:$0x3]  ;;  %v5811_v51 = vld [vmem:[#allocation8 + $0x460] ss:$8 sps:$4 sm:$0xff]  }
 0x3a2   : > { %v1418_v56 = vmax.f32 %v1378_v54, 0.0  ;;  %v5816_v54 = vld [vmem:[#allocation8 + $0x474] ss:$8 sps:$4 sm:$0xff]   ;;  %v6747_v52 = vrot.slane %v1474_v50, %v6621_v24 }
 0x3a3   : > { %v1419_v58 = vmax.f32 %v1380_v53, 0.0  ;;  %v6027_v53 = vld [vmem:[%s6587_s1 + $0x30] ss:$8 sps:$4 sm:$0xff]  }
 0x3a4   : > { %v1436_v59 = vpack.c.bf16 %v1418_v56, %v1416_v55  ;;  %v6751_v55 = vrot.slane %v1474_v50, %v6623_v26  ;;  %v5814_v56 = vld [vmem:[#allocation8 + $0x470] ss:$8 sps:$4 sm:$0xff]  }
 0x3a5   : > { %v1437_v60 = vpack.c.bf16 %v1419_v58, %v1417_v57  ;;  %v1383_v61 = vpop.f32.mrb[60].mxu0  ;;  %v5819_v57 = vld [vmem:[#allocation8 + $0x484] ss:$8 sps:$4 sm:$0xff]   ;;  %v5832_v50 = vld [vmem:[#allocation8 + $0x4d0] ss:$8 sps:$4 sm:$0xff]  }
 0x3a6   : > { %v1384_v62 = vadd.f32 %v1383_v61, %v6702_v18  ;;  %v1385_v63 = vpop.f32.mrb[61].mxu0 }
 0x3a7   : > { %v1386_v1 = vadd.f32 %v1385_v63, %v6705_v19  ;;  %v1387_v2 = vpop.f32.mrb[62].mxu0  ;;  %1738 = vmatprep.mubr.bf16.mxu1 %v1437_v60  ;;  %v5817_v63 = vld [vmem:[#allocation8 + $0x480] ss:$8 sps:$4 sm:$0xff]  }
 0x3a8   : > { %v1388_v3 = vadd.f32 %v1387_v2, %v6702_v18  ;;  %v1389_v4 = vpop.f32.mrb[63].mxu0  ;;  %1739 = vmatmul.mubr.bf16.gmra.mrb[56].mxu1 %v1436_v59  ;;  %v1420_v6 = vmax.f32 %v1384_v62, 0.0  ;;  %v5766_v18 = vld [vmem:[#allocation8 + $0x3f0] ss:$8 sps:$4 sm:$0xff]  }
 0x3a9   : > { %v1390_v5 = vadd.f32 %v1389_v4, %v6705_v19  ;;  %v1421_v8 = vmax.f32 %v1386_v1, 0.0  ;;  %2044 = vmatpush1.bf16.msra.mxu0 %v5766_v18  ;;  %v5771_v19 = vld [vmem:[#allocation5 + $0x84] ss:$8 sps:$4 sm:$0xff]  }
 0x3aa   : > { %v1422_v7 = vmax.f32 %v1388_v3, 0.0  ;;  %2304 = vmatprep.subr.bf16.mxu1 %v5771_v19  ;;  %v5822_v3 = vld [vmem:[#allocation8 + $0x494] ss:$8 sps:$4 sm:$0xff]  }
 0x3ab   : > { %v1423_v9 = vmax.f32 %v1390_v5, 0.0  ;;  %2305 = vmatpush1.bf16.msra.mxu1 %v5769_v15 }
 0x3ac   : > { %v1438_v10 = vpack.c.bf16 %v1422_v7, %v1420_v6  ;;  %2306 = vmatprep.subr.bf16.mxu1 %v5774_v16  ;;  %v6028_v7 = vld [vmem:[%s6587_s1 + $0x40] ss:$8 sps:$4 sm:$0xff]  }
 0x3ad   : > { %v1439_v11 = vpack.c.bf16 %v1423_v9, %v1421_v8 }
 0x3af   : > { %1748 = vmatprep.mubr.bf16.mxu1 %v1439_v11  ;;  %2307 = vmatpush1.bf16.msra.mxu1 %v5772_v17  ;;  %v5823_v17 = vld [vmem:[#allocation8 + $0x4a0] ss:$8 sps:$4 sm:$0xff]  }
 0x3b0   : > { %1749 = vmatmul.mubr.bf16.gmra.mrb[60].mxu1 %v1438_v10  ;;  %2308 = vmatprep.subr.bf16.mxu1 %v5777_v20  ;;  %v5820_v10 = vld [vmem:[#allocation8 + $0x490] ss:$8 sps:$4 sm:$0xff]  }
 0x3b1   : > { %2336 = vmatprep.mubr.bf16.mxu1 %v6294_v0 }
 0x3b3   : > { %2309 = vmatpush1.bf16.msra.mxu1 %v5775_v21 }
 0x3b4   : > { %2310 = vmatprep.subr.bf16.mxu1 %v5780_v22  ;;  %v5828_v22 = vld [vmem:[#allocation8 + $0x4b4] ss:$8 sps:$4 sm:$0xff]  }
 0x3b7   : > { %2311 = vmatpush1.bf16.msra.mxu1 %v5778_v27 }
 0x3b8   : > { %2312 = vmatprep.subr.bf16.mxu1 %v5783_v23 }
 0x3bb   : > { %2313 = vmatpush1.bf16.msra.mxu1 %v5781_v25 }
 0x3bc   : > { %2314 = vmatprep.subr.bf16.mxu1 %v5786_v28  ;;  %v6029_v28 = vld [vmem:[%s6587_s1 + $0x50] ss:$8 sps:$4 sm:$0xff]  }
 0x3bf   : > { %2315 = vmatpush1.bf16.msra.mxu1 %v5784_v29 }
 0x3c0   : > { %2316 = vmatprep.subr.bf16.mxu1 %v5789_v30 }
 0x3c3   : > { %2317 = vmatpush1.bf16.msra.mxu1 %v5787_v31  ;;  %v5826_v31 = vld [vmem:[#allocation8 + $0x4b0] ss:$8 sps:$4 sm:$0xff]  }
 0x3c4   : > { %2318 = vmatprep.subr.bf16.mxu1 %v5792_v32 }
 0x3c7   : > { %2319 = vmatpush1.bf16.msra.mxu1 %v5790_v33  ;;  %v5831_v33 = vld [vmem:[#allocation8 + $0x4c4] ss:$8 sps:$4 sm:$0xff]  }
 0x3c8   : > { %2577 = vmatprep.subr.bf16.mxu1 %v5795_v34 }
 0x3ca   : > { %2337 = vmatmul.mubr.bf16.vlgmr.msra.gmra.mrb[64].mxu1 %v6024_v37 }
 0x3cb   : > { %2578 = vmatpush1.bf16.msra.mxu1 %v5793_v35  ;;  %2346 = vmatprep.mubr.bf16.mxu1 %v6294_v0 }
 0x3cc   : > { %2579 = vmatprep.subr.bf16.mxu1 %v5798_v36 }
 0x3cf   : > { %2580 = vmatpush1.bf16.msra.mxu1 %v5796_v38 }
 0x3d0   : > { %2581 = vmatprep.subr.bf16.mxu1 %v5801_v39 }
 0x3d2   : > { %2347 = vmatmul.mubr.bf16.gmra.mrb[68].mxu1 %v6025_v42 }
 0x3d3   : > { %2582 = vmatpush1.bf16.msra.mxu1 %v5799_v40  ;;  %2356 = vmatprep.mubr.bf16.mxu1 %v6294_v0  ;;  %v5829_v40 = vld [vmem:[#allocation8 + $0x4c0] ss:$8 sps:$4 sm:$0xff]  }
 0x3d4   : > { %2583 = vmatprep.subr.bf16.mxu1 %v5804_v41 }
 0x3d7   : > { %2584 = vmatpush1.bf16.msra.mxu1 %v5802_v43  ;;  %v5834_v43 = vld [vmem:[#allocation8 + $0x4d4] ss:$8 sps:$4 sm:$0xff]  }
 0x3d8   : > { %2585 = vmatprep.subr.bf16.mxu1 %v5807_v44 }
 0x3da   : > { %2357 = vmatmul.mubr.bf16.gmra.mrb[72].mxu1 %v6026_v47  ;;  %v6030_v47 = vld [vmem:[%s6587_s1 + $0x60] ss:$8 sps:$4 sm:$0xff]  }
 0x3db   : > { %2586 = vmatpush1.bf16.msra.mxu1 %v5805_v45  ;;  %2366 = vmatprep.mubr.bf16.mxu1 %v6294_v0 }
 0x3dc   : > { %2587 = vmatprep.subr.bf16.mxu1 %v5810_v46 }
 0x3df   : > { %2588 = vmatpush1.bf16.msra.mxu1 %v5808_v48 }
 0x3e0   : > { %2589 = vmatprep.subr.bf16.mxu1 %v5813_v49 }
 0x3e2   : > { %2367 = vmatmul.mubr.bf16.gmra.mrb[76].mxu1 %v6027_v53 }
 0x3e3   : > { %2590 = vmatpush1.bf16.msra.mxu1 %v5811_v51  ;;  %2376 = vmatprep.mubr.bf16.mxu1 %v6294_v0 }
 0x3e4   : > { %2591 = vmatprep.subr.bf16.mxu1 %v5816_v54 }
 0x3e7   : > { %2592 = vmatpush1.bf16.msra.mxu1 %v5814_v56 }
 0x3e8   : > { %2593 = vmatprep.subr.bf16.mxu1 %v5819_v57 }
 0x3ea   : > { %2377 = vmatmul.mubr.bf16.gmra.mrb[80].mxu1 %v6028_v7 }
 0x3eb   : > { %2594 = vmatpush1.bf16.msra.mxu1 %v5817_v63  ;;  %2386 = vmatprep.mubr.bf16.mxu1 %v6294_v0 }
 0x3ec   : > { %2595 = vmatprep.subr.bf16.mxu1 %v5822_v3 }
 0x3ef   : > { %2596 = vmatpush1.bf16.msra.mxu1 %v5820_v10 }
 0x3f0   : > { %2597 = vmatprep.subr.bf16.mxu1 %v5825_v12 }
 0x3f2   : > { %2387 = vmatmul.mubr.bf16.gmra.mrb[84].mxu1 %v6029_v28 }
 0x3f3   : > { %2598 = vmatpush1.bf16.msra.mxu1 %v5823_v17  ;;  %2396 = vmatprep.mubr.bf16.mxu1 %v6294_v0 }
 0x3f4   : > { %2599 = vmatprep.subr.bf16.mxu1 %v5828_v22 }
 0x3f7   : > { %2600 = vmatpush1.bf16.msra.mxu1 %v5826_v31 }
 0x3f8   : > { %2601 = vmatprep.subr.bf16.mxu1 %v5831_v33 }
 0x3fa   : > { %2397 = vmatmul.mubr.bf16.gmra.mrb[88].mxu1 %v6030_v47 }
 0x3fb   : > { %2602 = vmatpush1.bf16.msra.mxu1 %v5829_v40  ;;  %2406 = vmatprep.mubr.bf16.mxu1 %v6294_v0 }
 0x3fc   : > { %2603 = vmatprep.subr.bf16.mxu1 %v5834_v43 }
 0x3ff   : > { %2604 = vmatpush1.bf16.msra.mxu1 %v5832_v50 }
 0x44b   : > { %v1680_v58 = vpop.f32.mrb[32].mxu1 }
 0x44c   : > { %v1681_v59 = vadd.f32 %v1680_v58, %v6747_v52  ;;  %v1682_v60 = vpop.f32.mrb[33].mxu1 }
 0x44d   : > { %v1683_v61 = vadd.f32 %v1682_v60, %v6751_v55  ;;  %v1684_v62 = vpop.f32.mrb[34].mxu1 }
 0x44e   : > { %v1685_v1 = vadd.f32 %v1684_v62, %v6747_v52  ;;  %v1686_v2 = vpop.f32.mrb[35].mxu1  ;;  %v1759_v5 = vmax.f32 %v1681_v59, 0.0 }
 0x44f   : > { %v1687_v4 = vadd.f32 %v1686_v2, %v6751_v55  ;;  %v1760_v8 = vmax.f32 %v1683_v61, 0.0 }
 0x450   : > { %v1761_v6 = vmax.f32 %v1685_v1, 0.0  ;;  %v6031_v1 = vld [vmem:[%s6587_s1 + $0x70] ss:$8 sps:$4 sm:$0xff]  }
 0x451   : > { %v1762_v9 = vmax.f32 %v1687_v4, 0.0  ;;  %2407 = vmatmul.mubr.bf16.gmra.mrb[92].mxu1 %v6031_v1 }
 0x452   : > { %v1791_v11 = vpack.c.bf16 %v1761_v6, %v1759_v5 }
 0x453   : > { %v1792_v13 = vpack.c.bf16 %v1762_v9, %v1760_v8  ;;  %v1690_v14 = vpop.f32.mrb[36].mxu1 }
 0x454   : > { %v1691_v18 = vadd.f32 %v1690_v14, %v6747_v52  ;;  %v1692_v15 = vpop.f32.mrb[37].mxu1 }
 0x455   : > { %v1693_v19 = vadd.f32 %v1692_v15, %v6751_v55  ;;  %v1694_v16 = vpop.f32.mrb[38].mxu1  ;;  %2045 = vmatprep.mubr.bf16.mxu0 %v1792_v13 }
 0x456   : > { %v1695_v20 = vadd.f32 %v1694_v16, %v6747_v52  ;;  %v1696_v21 = vpop.f32.mrb[39].mxu1  ;;  %2046 = vmatmul.mubr.bf16.vlgmr.msra.gmra.mrb[64].mxu0 %v1791_v11  ;;  %v1763_v23 = vmax.f32 %v1691_v18, 0.0 }
 0x457   : > { %v1697_v27 = vadd.f32 %v1696_v21, %v6751_v55  ;;  %v1764_v29 = vmax.f32 %v1693_v19, 0.0 }
 0x458   : > { %v1765_v25 = vmax.f32 %v1695_v20, 0.0 }
 0x459   : > { %v1766_v30 = vmax.f32 %v1697_v27, 0.0 }
 0x45a   : > { %v1793_v32 = vpack.c.bf16 %v1765_v25, %v1763_v23 }
 0x45b   : > { %v1794_v34 = vpack.c.bf16 %v1766_v30, %v1764_v29  ;;  %v1700_v35 = vpop.f32.mrb[40].mxu1 }
 0x45c   : > { %v1701_v36 = vadd.f32 %v1700_v35, %v6747_v52  ;;  %v1702_v37 = vpop.f32.mrb[41].mxu1 }
 0x45d   : > { %v1703_v38 = vadd.f32 %v1702_v37, %v6751_v55  ;;  %v1704_v39 = vpop.f32.mrb[42].mxu1  ;;  %2055 = vmatprep.mubr.bf16.mxu0 %v1794_v34 }
 0x45e   : > { %v1705_v41 = vadd.f32 %v1704_v39, %v6747_v52  ;;  %v1706_v42 = vpop.f32.mrb[43].mxu1  ;;  %2056 = vmatmul.mubr.bf16.gmra.mrb[68].mxu0 %v1793_v32  ;;  %v1767_v45 = vmax.f32 %v1701_v36, 0.0 }
 0x45f   : > { %v1707_v44 = vadd.f32 %v1706_v42, %v6751_v55  ;;  %v1768_v48 = vmax.f32 %v1703_v38, 0.0 }
 0x460   : > { %v1769_v46 = vmax.f32 %v1705_v41, 0.0 }
 0x461   : > { %v1770_v49 = vmax.f32 %v1707_v44, 0.0 }
 0x462   : > { %v1795_v51 = vpack.c.bf16 %v1769_v46, %v1767_v45 }
 0x463   : > { %v1796_v54 = vpack.c.bf16 %v1770_v49, %v1768_v48  ;;  %v1710_v53 = vpop.f32.mrb[44].mxu1 }
 0x464   : > { %v1711_v56 = vadd.f32 %v1710_v53, %v6747_v52  ;;  %v1712_v57 = vpop.f32.mrb[45].mxu1 }
 0x465   : > { %v1713_v58 = vadd.f32 %v1712_v57, %v6751_v55  ;;  %v1714_v59 = vpop.f32.mrb[46].mxu1  ;;  %2065 = vmatprep.mubr.bf16.mxu0 %v1796_v54 }
 0x466   : > { %v1715_v60 = vadd.f32 %v1714_v59, %v6747_v52  ;;  %v1716_v61 = vpop.f32.mrb[47].mxu1  ;;  %2066 = vmatmul.mubr.bf16.gmra.mrb[72].mxu0 %v1795_v51  ;;  %v1771_v0 = vmax.f32 %v1711_v56, 0.0 }
 0x467   : > { %v1717_v62 = vadd.f32 %v1716_v61, %v6751_v55  ;;  %v1772_v2 = vmax.f32 %v1713_v58, 0.0 }
 0x468   : > { %v1773_v63 = vmax.f32 %v1715_v60, 0.0 }
 0x469   : > { %v1774_v3 = vmax.f32 %v1717_v62, 0.0 }
 0x46a   : > { %v1797_v4 = vpack.c.bf16 %v1773_v63, %v1771_v0 }
 0x46b   : > { %v1798_v5 = vpack.c.bf16 %v1774_v3, %v1772_v2  ;;  %v1720_v6 = vpop.f32.mrb[48].mxu1  ;;  %v5837_v2 = vld [vmem:[#allocation8 + $0x4e4] ss:$8 sps:$4 sm:$0xff]   ;;  %v5835_v3 = vld [vmem:[#allocation8 + $0x4e0] ss:$8 sps:$4 sm:$0xff]  }
 0x46c   : > { %v1721_v7 = vadd.f32 %v1720_v6, %v6747_v52  ;;  %v1722_v8 = vpop.f32.mrb[49].mxu1  ;;  %2605 = vmatprep.subr.bf16.mxu1 %v5837_v2  ;;  %v5843_v6 = vld [vmem:[#allocation8 + $0x504] ss:$8 sps:$4 sm:$0xff]  }
 0x46d   : > { %v1723_v9 = vadd.f32 %v1722_v8, %v6751_v55  ;;  %v1724_v10 = vpop.f32.mrb[50].mxu1  ;;  %2075 = vmatprep.mubr.bf16.mxu0 %v1798_v5  ;;  %2606 = vmatpush1.bf16.msra.mxu1 %v5835_v3  ;;  %v5838_v5 = vld [vmem:[#allocation8 + $0x4f0] ss:$8 sps:$4 sm:$0xff]   ;;  %v5849_v8 = vld [vmem:[#allocation8 + $0x524] ss:$8 sps:$4 sm:$0xff]  }
 0x46e   : > { %v1725_v11 = vadd.f32 %v1724_v10, %v6747_v52  ;;  %v1726_v12 = vpop.f32.mrb[51].mxu1  ;;  %2076 = vmatmul.mubr.bf16.gmra.mrb[76].mxu0 %v1797_v4  ;;  %v1775_v14 = vmax.f32 %v1721_v7, 0.0  ;;  %v5840_v4 = vld [vmem:[#allocation8 + $0x4f4] ss:$8 sps:$4 sm:$0xff]   ;;  %2989 = vmatprep.subr.bf16.mxu0 %v5843_v6 }
 0x46f   : > { %v1727_v13 = vadd.f32 %v1726_v12, %v6751_v55  ;;  %v1776_v15 = vmax.f32 %v1723_v9, 0.0  ;;  %2607 = vmatprep.subr.bf16.mxu1 %v5840_v4  ;;  %v5846_v7 = vld [vmem:[#allocation8 + $0x514] ss:$8 sps:$4 sm:$0xff]   ;;  %v5847_v9 = vld [vmem:[#allocation8 + $0x520] ss:$8 sps:$4 sm:$0xff]  }
 0x470   : > { %v1777_v18 = vmax.f32 %v1725_v11, 0.0  ;;  %v5852_v10 = vld [vmem:[#allocation8 + $0x534] ss:$8 sps:$4 sm:$0xff]   ;;  %v5850_v11 = vld [vmem:[#allocation8 + $0x530] ss:$8 sps:$4 sm:$0xff]  }
 0x471   : > { %v1778_v19 = vmax.f32 %v1727_v13, 0.0  ;;  %2608 = vmatpush1.bf16.msra.mxu1 %v5838_v5  ;;  %v5855_v12 = vld [vmem:[#allocation8 + $0x544] ss:$8 sps:$4 sm:$0xff]   ;;  %v5853_v13 = vld [vmem:[#allocation8 + $0x540] ss:$8 sps:$4 sm:$0xff]  }
 0x472   : > { %v1799_v16 = vpack.c.bf16 %v1777_v18, %v1775_v14  ;;  %v5858_v14 = vld [vmem:[#allocation8 + $0x554] ss:$8 sps:$4 sm:$0xff]   ;;  %v5856_v18 = vld [vmem:[#allocation8 + $0x550] ss:$8 sps:$4 sm:$0xff]  }
 0x473   : > { %v1800_v17 = vpack.c.bf16 %v1778_v19, %v1776_v15  ;;  %v1730_v20 = vpop.f32.mrb[52].mxu1  ;;  %v5861_v15 = vld [vmem:[#allocation8 + $0x564] ss:$8 sps:$4 sm:$0xff]   ;;  %v5859_v19 = vld [vmem:[#allocation8 + $0x560] ss:$8 sps:$4 sm:$0xff]  }
 0x474   : > { %v1731_v21 = vadd.f32 %v1730_v20, %v6747_v52  ;;  %v1732_v22 = vpop.f32.mrb[53].mxu1  ;;  %v5867_v20 = vld [vmem:[#allocation8 + $0x584] ss:$8 sps:$4 sm:$0xff]  }
 0x475   : > { %v1733_v27 = vadd.f32 %v1732_v22, %v6751_v55  ;;  %v1734_v23 = vpop.f32.mrb[54].mxu1  ;;  %2085 = vmatprep.mubr.bf16.mxu0 %v1800_v17  ;;  %v5862_v17 = vld [vmem:[#allocation8 + $0x570] ss:$8 sps:$4 sm:$0xff]   ;;  %v5870_v22 = vld [vmem:[#allocation8 + $0x594] ss:$8 sps:$4 sm:$0xff]  }
 0x476   : > { %v1735_v25 = vadd.f32 %v1734_v23, %v6747_v52  ;;  %v1736_v28 = vpop.f32.mrb[55].mxu1  ;;  %2086 = vmatmul.mubr.bf16.gmra.mrb[80].mxu0 %v1799_v16  ;;  %v1779_v30 = vmax.f32 %v1731_v21, 0.0  ;;  %v5864_v16 = vld [vmem:[#allocation8 + $0x574] ss:$8 sps:$4 sm:$0xff]   ;;  %v5865_v21 = vld [vmem:[#allocation8 + $0x580] ss:$8 sps:$4 sm:$0xff]  }
 0x477   : > { %v1737_v29 = vadd.f32 %v1736_v28, %v6751_v55  ;;  %v1780_v32 = vmax.f32 %v1733_v27, 0.0  ;;  %v5868_v27 = vld [vmem:[#allocation8 + $0x590] ss:$8 sps:$4 sm:$0xff]   ;;  %v5873_v23 = vld [vmem:[#allocation8 + $0x5a4] ss:$8 sps:$4 sm:$0xff]  }
 0x478   : > { %v1781_v31 = vmax.f32 %v1735_v25, 0.0  ;;  %v5871_v25 = vld [vmem:[#allocation8 + $0x5a0] ss:$8 sps:$4 sm:$0xff]   ;;  %v5876_v28 = vld [vmem:[#allocation8 + $0x5b4] ss:$8 sps:$4 sm:$0xff]  }
 0x479   : > { %v1782_v33 = vmax.f32 %v1737_v29, 0.0  ;;  %v5874_v29 = vld [vmem:[#allocation8 + $0x5b0] ss:$8 sps:$4 sm:$0xff]  }
 0x47a   : > { %v1801_v34 = vpack.c.bf16 %v1781_v31, %v1779_v30  ;;  %v5879_v30 = vld [vmem:[#allocation8 + $0x5c4] ss:$8 sps:$4 sm:$0xff]   ;;  %v5877_v31 = vld [vmem:[#allocation8 + $0x5c0] ss:$8 sps:$4 sm:$0xff]  }
 0x47b   : > { %v1802_v35 = vpack.c.bf16 %v1782_v33, %v1780_v32  ;;  %v1740_v36 = vpop.f32.mrb[56].mxu1  ;;  %v5882_v32 = vld [vmem:[#allocation8 + $0x5d4] ss:$8 sps:$4 sm:$0xff]   ;;  %v5880_v33 = vld [vmem:[#allocation8 + $0x5d0] ss:$8 sps:$4 sm:$0xff]  }
 0x47c   : > { %v1741_v37 = vadd.f32 %v1740_v36, %v6747_v52  ;;  %v1742_v38 = vpop.f32.mrb[57].mxu1 }
 0x47d   : > { %v1743_v39 = vadd.f32 %v1742_v38, %v6751_v55  ;;  %v1744_v40 = vpop.f32.mrb[58].mxu1  ;;  %2095 = vmatprep.mubr.bf16.mxu0 %v1802_v35 }
 0x47e   : > { %v1745_v41 = vadd.f32 %v1744_v40, %v6747_v52  ;;  %v1746_v42 = vpop.f32.mrb[59].mxu1  ;;  %2096 = vmatmul.mubr.bf16.gmra.mrb[84].mxu0 %v1801_v34  ;;  %v1783_v44 = vmax.f32 %v1741_v37, 0.0  ;;  %v1841_v34 = vld [vmem:[#allocation7 + $0x8] sm:$0x3] }
 0x47f   : > { %v1747_v43 = vadd.f32 %v1746_v42, %v6751_v55  ;;  %v1784_v46 = vmax.f32 %v1743_v39, 0.0  ;;  %v6794_v35 = vrot.slane %v1841_v34, %v6621_v24  ;;  %v6797_v36 = vrot.slane %v1841_v34, %v6623_v26 }
 0x480   : > { %v1785_v45 = vmax.f32 %v1745_v41, 0.0 }
 0x481   : > { %v1786_v47 = vmax.f32 %v1747_v43, 0.0 }
 0x482   : > { %v1803_v48 = vpack.c.bf16 %v1785_v45, %v1783_v44 }
 0x483   : > { %v1804_v49 = vpack.c.bf16 %v1786_v47, %v1784_v46  ;;  %v1750_v50 = vpop.f32.mrb[60].mxu1 }
 0x484   : > { %v1751_v51 = vadd.f32 %v1750_v50, %v6747_v52  ;;  %v1752_v54 = vpop.f32.mrb[61].mxu1 }
 0x485   : > { %v1753_v53 = vadd.f32 %v1752_v54, %v6751_v55  ;;  %v1754_v56 = vpop.f32.mrb[62].mxu1  ;;  %2105 = vmatprep.mubr.bf16.mxu0 %v1804_v49 }
 0x486   : > { %v1755_v57 = vadd.f32 %v1754_v56, %v6747_v52  ;;  %v1756_v58 = vpop.f32.mrb[63].mxu1  ;;  %2106 = vmatmul.mubr.bf16.gmra.mrb[88].mxu0 %v1803_v48  ;;  %v1787_v60 = vmax.f32 %v1751_v51, 0.0  ;;  %v5841_v52 = vld [vmem:[#allocation8 + $0x500] ss:$8 sps:$4 sm:$0xff]  }
 0x487   : > { %v1757_v59 = vadd.f32 %v1756_v58, %v6751_v55  ;;  %v1788_v62 = vmax.f32 %v1753_v53, 0.0  ;;  %2990 = vmatpush1.bf16.msra.mxu0 %v5841_v52  ;;  %v5844_v55 = vld [vmem:[#allocation8 + $0x510] ss:$8 sps:$4 sm:$0xff]  }
 0x488   : > { %v1789_v61 = vmax.f32 %v1755_v57, 0.0  ;;  %2991 = vmatprep.subr.bf16.mxu0 %v5846_v7 }
 0x489   : > { %v1790_v0 = vmax.f32 %v1757_v59, 0.0 }
 0x48a   : > { %v1805_v63 = vpack.c.bf16 %v1789_v61, %v1787_v60 }
 0x48b   : > { %v1806_v1 = vpack.c.bf16 %v1790_v0, %v1788_v62  ;;  %2992 = vmatpush1.bf16.msra.mxu0 %v5844_v55 }
 0x48c   : > { %2993 = vmatprep.subr.bf16.mxu0 %v5849_v8 }
 0x48d   : > { %2115 = vmatprep.mubr.bf16.mxu0 %v1806_v1 }
 0x48e   : > { %2116 = vmatmul.mubr.bf16.gmra.mrb[92].mxu0 %v1805_v63 }
 0x48f   : > { %2994 = vmatpush1.bf16.msra.mxu0 %v5847_v9 }
 0x490   : > { %2995 = vmatprep.subr.bf16.mxu0 %v5852_v10 }
 0x493   : > { %2996 = vmatpush1.bf16.msra.mxu0 %v5850_v11 }
 0x494   : > { %2997 = vmatprep.subr.bf16.mxu0 %v5855_v12 }
 0x497   : > { %2998 = vmatpush1.bf16.msra.mxu0 %v5853_v13 }
 0x498   : > { %2999 = vmatprep.subr.bf16.mxu0 %v5858_v14 }
 0x49b   : > { %3000 = vmatpush1.bf16.msra.mxu0 %v5856_v18 }
 0x49c   : > { %3001 = vmatprep.subr.bf16.mxu0 %v5861_v15 }
 0x49f   : > { %3002 = vmatpush1.bf16.msra.mxu0 %v5859_v19 }
 0x4a0   : > { %3003 = vmatprep.subr.bf16.mxu0 %v5864_v16 }
 0x4a3   : > { %3004 = vmatpush1.bf16.msra.mxu0 %v5862_v17 }
 0x4a4   : > { %3005 = vmatprep.subr.bf16.mxu0 %v5867_v20 }
 0x4a7   : > { %3006 = vmatpush1.bf16.msra.mxu0 %v5865_v21 }
 0x4a8   : > { %3007 = vmatprep.subr.bf16.mxu0 %v5870_v22 }
 0x4ab   : > { %3008 = vmatpush1.bf16.msra.mxu0 %v5868_v27 }
 0x4ac   : > { %3009 = vmatprep.subr.bf16.mxu0 %v5873_v23 }
 0x4af   : > { %3010 = vmatpush1.bf16.msra.mxu0 %v5871_v25 }
 0x4b0   : > { %3011 = vmatprep.subr.bf16.mxu0 %v5876_v28 }
 0x4b3   : > { %3012 = vmatpush1.bf16.msra.mxu0 %v5874_v29 }
 0x4b4   : > { %3013 = vmatprep.subr.bf16.mxu0 %v5879_v30 }
 0x4b7   : > { %3014 = vmatpush1.bf16.msra.mxu0 %v5877_v31 }
 0x4b8   : > { %3015 = vmatprep.subr.bf16.mxu0 %v5882_v32 }
 0x4bb   : > { %3016 = vmatpush1.bf16.msra.mxu0 %v5880_v33 }
 0x529   : > { %v2047_v37 = vpop.f32.mrb[64].mxu0 }
 0x52a   : > { %v2048_v38 = vadd.f32 %v2047_v37, %v6794_v35  ;;  %v2049_v39 = vpop.f32.mrb[65].mxu0 }
 0x52b   : > { %v2050_v40 = vadd.f32 %v2049_v39, %v6797_v36  ;;  %v2051_v41 = vpop.f32.mrb[66].mxu0 }
 0x52c   : > { %v2052_v42 = vadd.f32 %v2051_v41, %v6794_v35  ;;  %v2053_v43 = vpop.f32.mrb[67].mxu0  ;;  %v2126_v45 = vmax.f32 %v2048_v38, 0.0 }
 0x52d   : > { %v2054_v44 = vadd.f32 %v2053_v43, %v6797_v36  ;;  %v2127_v47 = vmax.f32 %v2050_v40, 0.0 }
 0x52e   : > { %v2128_v46 = vmax.f32 %v2052_v42, 0.0 }
 0x52f   : > { %v2129_v48 = vmax.f32 %v2054_v44, 0.0 }
 0x530   : > { %v2158_v49 = vpack.c.bf16 %v2128_v46, %v2126_v45 }
 0x531   : > { %v2159_v50 = vpack.c.bf16 %v2129_v48, %v2127_v47  ;;  %v2057_v51 = vpop.f32.mrb[68].mxu0 }
 0x532   : > { %v2058_v54 = vadd.f32 %v2057_v51, %v6794_v35  ;;  %v2059_v53 = vpop.f32.mrb[69].mxu0 }
 0x533   : > { %v2060_v56 = vadd.f32 %v2059_v53, %v6797_v36  ;;  %v2061_v57 = vpop.f32.mrb[70].mxu0  ;;  %2609 = vmatprep.mubr.bf16.mxu1 %v2159_v50 }
 0x534   : > { %v2062_v58 = vadd.f32 %v2061_v57, %v6794_v35  ;;  %v2063_v59 = vpop.f32.mrb[71].mxu0  ;;  %2610 = vmatmul.mubr.bf16.vlgmr.msra.gmra.mrb[64].mxu1 %v2158_v49  ;;  %v2130_v61 = vmax.f32 %v2058_v54, 0.0 }
 0x535   : > { %v2064_v60 = vadd.f32 %v2063_v59, %v6797_v36  ;;  %v2131_v0 = vmax.f32 %v2060_v56, 0.0 }
 0x536   : > { %v2132_v62 = vmax.f32 %v2062_v58, 0.0 }
 0x537   : > { %v2133_v63 = vmax.f32 %v2064_v60, 0.0 }
 0x538   : > { %v2160_v1 = vpack.c.bf16 %v2132_v62, %v2130_v61 }
 0x539   : > { %v2161_v2 = vpack.c.bf16 %v2133_v63, %v2131_v0  ;;  %v2067_v3 = vpop.f32.mrb[72].mxu0 }
 0x53a   : > { %v2068_v4 = vadd.f32 %v2067_v3, %v6794_v35  ;;  %v2069_v5 = vpop.f32.mrb[73].mxu0 }
 0x53b   : > { %v2070_v52 = vadd.f32 %v2069_v5, %v6797_v36  ;;  %v2071_v6 = vpop.f32.mrb[74].mxu0  ;;  %2619 = vmatprep.mubr.bf16.mxu1 %v2161_v2 }
 0x53c   : > { %v2072_v7 = vadd.f32 %v2071_v6, %v6794_v35  ;;  %v2073_v55 = vpop.f32.mrb[75].mxu0  ;;  %2620 = vmatmul.mubr.bf16.gmra.mrb[68].mxu1 %v2160_v1  ;;  %v2134_v9 = vmax.f32 %v2068_v4, 0.0 }
 0x53d   : > { %v2074_v8 = vadd.f32 %v2073_v55, %v6797_v36  ;;  %v2135_v11 = vmax.f32 %v2070_v52, 0.0 }
 0x53e   : > { %v2136_v10 = vmax.f32 %v2072_v7, 0.0 }
 0x53f   : > { %v2137_v12 = vmax.f32 %v2074_v8, 0.0 }
 0x540   : > { %v2162_v13 = vpack.c.bf16 %v2136_v10, %v2134_v9 }
 0x541   : > { %v2163_v14 = vpack.c.bf16 %v2137_v12, %v2135_v11  ;;  %v2077_v18 = vpop.f32.mrb[76].mxu0 }
 0x542   : > { %v2078_v15 = vadd.f32 %v2077_v18, %v6794_v35  ;;  %v2079_v19 = vpop.f32.mrb[77].mxu0 }
 0x543   : > { %v2080_v16 = vadd.f32 %v2079_v19, %v6797_v36  ;;  %v2081_v17 = vpop.f32.mrb[78].mxu0  ;;  %2629 = vmatprep.mubr.bf16.mxu1 %v2163_v14 }
 0x544   : > { %v2082_v20 = vadd.f32 %v2081_v17, %v6794_v35  ;;  %v2083_v21 = vpop.f32.mrb[79].mxu0  ;;  %2630 = vmatmul.mubr.bf16.gmra.mrb[72].mxu1 %v2162_v13  ;;  %v2138_v27 = vmax.f32 %v2078_v15, 0.0 }
 0x545   : > { %v2084_v22 = vadd.f32 %v2083_v21, %v6797_v36  ;;  %v2139_v25 = vmax.f32 %v2080_v16, 0.0 }
 0x546   : > { %v2140_v23 = vmax.f32 %v2082_v20, 0.0 }
 0x547   : > { %v2141_v28 = vmax.f32 %v2084_v22, 0.0 }
 0x548   : > { %v2164_v29 = vpack.c.bf16 %v2140_v23, %v2138_v27 }
 0x549   : > { %v2165_v30 = vpack.c.bf16 %v2141_v28, %v2139_v25  ;;  %v2087_v31 = vpop.f32.mrb[80].mxu0  ;;  %v5885_v25 = vld [vmem:[#allocation8 + $0x5e4] ss:$8 sps:$4 sm:$0xff]   ;;  %v5883_v28 = vld [vmem:[#allocation8 + $0x5e0] ss:$8 sps:$4 sm:$0xff]  }
 0x54a   : > { %v2088_v32 = vadd.f32 %v2087_v31, %v6794_v35  ;;  %v2089_v33 = vpop.f32.mrb[81].mxu0  ;;  %3017 = vmatprep.subr.bf16.mxu0 %v5885_v25  ;;  %v2691_v31 = vld [vmem:[#allocation7 + $0xa] sm:$0x3]  ;;  %v5906_v25 = vld [vmem:[#allocation8 + $0x654] ss:$8 sps:$4 sm:$0xff]  }
 0x54b   : > { %v2090_v34 = vadd.f32 %v2089_v33, %v6797_v36  ;;  %v2091_v37 = vpop.f32.mrb[82].mxu0  ;;  %2639 = vmatprep.mubr.bf16.mxu1 %v2165_v30  ;;  %3018 = vmatpush1.bf16.msra.mxu0 %v5883_v28  ;;  %v5886_v30 = vld [vmem:[#allocation8 + $0x5f0] ss:$8 sps:$4 sm:$0xff]  }
 0x54c   : > { %v2092_v38 = vadd.f32 %v2091_v37, %v6794_v35  ;;  %v2093_v39 = vpop.f32.mrb[83].mxu0  ;;  %2640 = vmatmul.mubr.bf16.gmra.mrb[76].mxu1 %v2164_v29  ;;  %v2142_v41 = vmax.f32 %v2088_v32, 0.0  ;;  %v5888_v29 = vld [vmem:[#allocation8 + $0x5f4] ss:$8 sps:$4 sm:$0xff]   ;;  %v6835_v32 = vrot.slane %v2691_v31, %v6623_v26 }
 0x54d   : > { %v2094_v40 = vadd.f32 %v2093_v39, %v6797_v36  ;;  %v2143_v43 = vmax.f32 %v2090_v34, 0.0  ;;  %3019 = vmatprep.subr.bf16.mxu0 %v5888_v29 }
 0x54e   : > { %v2144_v42 = vmax.f32 %v2092_v38, 0.0 }
 0x54f   : > { %v2145_v44 = vmax.f32 %v2094_v40, 0.0  ;;  %3020 = vmatpush1.bf16.msra.mxu0 %v5886_v30 }
 0x550   : > { %v2166_v45 = vpack.c.bf16 %v2144_v42, %v2142_v41 }
 0x551   : > { %v2167_v46 = vpack.c.bf16 %v2145_v44, %v2143_v43  ;;  %v2097_v47 = vpop.f32.mrb[84].mxu0 }
 0x552   : > { %v2098_v48 = vadd.f32 %v2097_v47, %v6794_v35  ;;  %v2099_v49 = vpop.f32.mrb[85].mxu0 }
 0x553   : > { %v2100_v50 = vadd.f32 %v2099_v49, %v6797_v36  ;;  %v2101_v51 = vpop.f32.mrb[86].mxu0  ;;  %2649 = vmatprep.mubr.bf16.mxu1 %v2167_v46 }
 0x554   : > { %v2102_v54 = vadd.f32 %v2101_v51, %v6794_v35  ;;  %v2103_v53 = vpop.f32.mrb[87].mxu0  ;;  %2650 = vmatmul.mubr.bf16.gmra.mrb[80].mxu1 %v2166_v45  ;;  %v2146_v57 = vmax.f32 %v2098_v48, 0.0 }
 0x555   : > { %v2104_v56 = vadd.f32 %v2103_v53, %v6797_v36  ;;  %v2147_v59 = vmax.f32 %v2100_v50, 0.0  ;;  %v5889_v50 = vld [vmem:[#allocation8 + $0x600] ss:$8 sps:$4 sm:$0xff]   ;;  %v5894_v53 = vld [vmem:[#allocation8 + $0x614] ss:$8 sps:$4 sm:$0xff]  }
 0x556   : > { %v2148_v58 = vmax.f32 %v2102_v54, 0.0 }
 0x557   : > { %v2149_v60 = vmax.f32 %v2104_v56, 0.0 }
 0x558   : > { %v2168_v61 = vpack.c.bf16 %v2148_v58, %v2146_v57 }
 0x559   : > { %v2169_v62 = vpack.c.bf16 %v2149_v60, %v2147_v59  ;;  %v2107_v0 = vpop.f32.mrb[88].mxu0 }
 0x55a   : > { %v2108_v63 = vadd.f32 %v2107_v0, %v6794_v35  ;;  %v2109_v1 = vpop.f32.mrb[89].mxu0 }
 0x55b   : > { %v2110_v2 = vadd.f32 %v2109_v1, %v6797_v36  ;;  %v2111_v3 = vpop.f32.mrb[90].mxu0  ;;  %2659 = vmatprep.mubr.bf16.mxu1 %v2169_v62 }
 0x55c   : > { %v2112_v4 = vadd.f32 %v2111_v3, %v6794_v35  ;;  %v2113_v5 = vpop.f32.mrb[91].mxu0  ;;  %2660 = vmatmul.mubr.bf16.gmra.mrb[84].mxu1 %v2168_v61  ;;  %v2150_v6 = vmax.f32 %v2108_v63, 0.0  ;;  %v5892_v61 = vld [vmem:[#allocation8 + $0x610] ss:$8 sps:$4 sm:$0xff]   ;;  %v5897_v63 = vld [vmem:[#allocation8 + $0x624] ss:$8 sps:$4 sm:$0xff]  }
 0x55d   : > { %v2114_v52 = vadd.f32 %v2113_v5, %v6797_v36  ;;  %v2151_v55 = vmax.f32 %v2110_v2, 0.0 }
 0x55e   : > { %v2152_v7 = vmax.f32 %v2112_v4, 0.0 }
 0x55f   : > { %v2153_v8 = vmax.f32 %v2114_v52, 0.0  ;;  %v5895_v52 = vld [vmem:[#allocation8 + $0x620] ss:$8 sps:$4 sm:$0xff]  }
 0x560   : > { %v2170_v9 = vpack.c.bf16 %v2152_v7, %v2150_v6 }
 0x561   : > { %v2171_v10 = vpack.c.bf16 %v2153_v8, %v2151_v55  ;;  %v2117_v11 = vpop.f32.mrb[92].mxu0  ;;  %v5900_v55 = vld [vmem:[#allocation8 + $0x634] ss:$8 sps:$4 sm:$0xff]  }
 0x562   : > { %v2118_v12 = vadd.f32 %v2117_v11, %v6794_v35  ;;  %v2119_v13 = vpop.f32.mrb[93].mxu0 }
 0x563   : > { %v2120_v14 = vadd.f32 %v2119_v13, %v6797_v36  ;;  %v2121_v18 = vpop.f32.mrb[94].mxu0  ;;  %2669 = vmatprep.mubr.bf16.mxu1 %v2171_v10  ;;  %v5898_v13 = vld [vmem:[#allocation8 + $0x630] ss:$8 sps:$4 sm:$0xff]  }
 0x564   : > { %v2122_v15 = vadd.f32 %v2121_v18, %v6794_v35  ;;  %v2123_v19 = vpop.f32.mrb[95].mxu0  ;;  %2670 = vmatmul.mubr.bf16.gmra.mrb[88].mxu1 %v2170_v9  ;;  %v2154_v17 = vmax.f32 %v2118_v12, 0.0  ;;  %v5891_v35 = vld [vmem:[#allocation8 + $0x604] ss:$8 sps:$4 sm:$0xff]  }
 0x565   : > { %v2124_v16 = vadd.f32 %v2123_v19, %v6797_v36  ;;  %v2155_v21 = vmax.f32 %v2120_v14, 0.0  ;;  %3356 = vmatprep.subr.bf16.mxu0 %v5891_v35  ;;  %v6832_v36 = vrot.slane %v2691_v31, %v6621_v24 }
 0x566   : > { %v2156_v20 = vmax.f32 %v2122_v15, 0.0  ;;  %v5903_v15 = vld [vmem:[#allocation8 + $0x644] ss:$8 sps:$4 sm:$0xff]  }
 0x567   : > { %v2157_v22 = vmax.f32 %v2124_v16, 0.0 }
 0x568   : > { %v2172_v27 = vpack.c.bf16 %v2156_v20, %v2154_v17 }
 0x569   : > { %v2173_v23 = vpack.c.bf16 %v2157_v22, %v2155_v21  ;;  %v5901_v22 = vld [vmem:[#allocation8 + $0x640] ss:$8 sps:$4 sm:$0xff]  }
 0x56b   : > { %2679 = vmatprep.mubr.bf16.mxu1 %v2173_v23 }
 0x56c   : > { %2680 = vmatmul.mubr.bf16.gmra.mrb[92].mxu1 %v2172_v27 }
 0x607   : > { %v2611_v33 = vpop.f32.mrb[64].mxu1 }
 0x608   : > { %v2703_v34 = vadd.f32 %v6832_v36, %v2611_v33  ;;  %v2613_v37 = vpop.f32.mrb[65].mxu1  ;;  %v5904_v33 = vld [vmem:[#allocation8 + $0x650] ss:$8 sps:$4 sm:$0xff]  }
 0x609   : > { %v2704_v38 = vadd.f32 %v6835_v32, %v2613_v37  ;;  %v2615_v39 = vpop.f32.mrb[66].mxu1 }
 0x60a   : > { %v2705_v40 = vadd.f32 %v6832_v36, %v2615_v39  ;;  %v2617_v41 = vpop.f32.mrb[67].mxu1  ;;  %v2735_v43 = vmax.f32 %v2703_v34, 0.0 }
 0x60b   : > { %v2706_v42 = vadd.f32 %v6835_v32, %v2617_v41  ;;  %v2736_v45 = vmax.f32 %v2704_v38, 0.0  ;;  %v5909_v38 = vld [vmem:[#allocation8 + $0x664] ss:$8 sps:$4 sm:$0xff]  }
 0x60c   : > { %v2737_v44 = vmax.f32 %v2705_v40, 0.0 }
 0x60d   : > { %v2738_v46 = vmax.f32 %v2706_v42, 0.0 }
 0x60e   : > { %v2767_v47 = vpack.c.bf16 %v2737_v44, %v2735_v43  ;;  %v5907_v44 = vld [vmem:[#allocation8 + $0x660] ss:$8 sps:$4 sm:$0xff]  }
 0x60f   : > { %v2768_v48 = vpack.c.bf16 %v2738_v46, %v2736_v45  ;;  %v2621_v49 = vpop.f32.mrb[68].mxu1 }
 0x610   : > { %v2707_v51 = vadd.f32 %v6832_v36, %v2621_v49  ;;  %v2623_v54 = vpop.f32.mrb[69].mxu1 }
 0x611   : > { %v2708_v56 = vadd.f32 %v6835_v32, %v2623_v54  ;;  %v2625_v57 = vpop.f32.mrb[70].mxu1  ;;  %3021 = vmatprep.mubr.bf16.mxu0 %v2768_v48 }
 0x612   : > { %v2709_v58 = vadd.f32 %v6832_v36, %v2625_v57  ;;  %v2627_v59 = vpop.f32.mrb[71].mxu1  ;;  %3022 = vmatmul.mubr.bf16.vlgmr.msra.gmra.mrb[96].mxu0 %v2767_v47  ;;  %v2739_v62 = vmax.f32 %v2707_v51, 0.0  ;;  %v5912_v47 = vld [vmem:[#allocation8 + $0x674] ss:$8 sps:$4 sm:$0xff]  }
 0x613   : > { %v2710_v60 = vadd.f32 %v6835_v32, %v2627_v59  ;;  %3357 = vmatpush1.bf16.msra.mxu0 %v5889_v50  ;;  %v2740_v1 = vmax.f32 %v2708_v56, 0.0 }
 0x614   : > { %v2741_v0 = vmax.f32 %v2709_v58, 0.0  ;;  %3358 = vmatprep.subr.bf16.mxu0 %v5894_v53  ;;  %v5910_v53 = vld [vmem:[#allocation8 + $0x670] ss:$8 sps:$4 sm:$0xff]   ;;  %v5915_v58 = vld [vmem:[#allocation8 + $0x684] ss:$8 sps:$4 sm:$0xff]  }
 0x615   : > { %v2742_v2 = vmax.f32 %v2710_v60, 0.0 }
 0x616   : > { %v2769_v3 = vpack.c.bf16 %v2741_v0, %v2739_v62 }
 0x617   : > { %v2770_v4 = vpack.c.bf16 %v2742_v2, %v2740_v1  ;;  %v2631_v5 = vpop.f32.mrb[72].mxu1  ;;  %3359 = vmatpush1.bf16.msra.mxu0 %v5892_v61 }
 0x618   : > { %v2711_v6 = vadd.f32 %v6832_v36, %v2631_v5  ;;  %v2633_v7 = vpop.f32.mrb[73].mxu1  ;;  %3360 = vmatprep.subr.bf16.mxu0 %v5897_v63  ;;  %v5913_v63 = vld [vmem:[#allocation8 + $0x680] ss:$8 sps:$4 sm:$0xff]  }
 0x619   : > { %v2712_v8 = vadd.f32 %v6835_v32, %v2633_v7  ;;  %v2635_v9 = vpop.f32.mrb[74].mxu1  ;;  %3031 = vmatprep.mubr.bf16.mxu0 %v2770_v4 }
 0x61a   : > { %v2713_v10 = vadd.f32 %v6832_v36, %v2635_v9  ;;  %v2637_v11 = vpop.f32.mrb[75].mxu1  ;;  %3032 = vmatmul.mubr.bf16.gmra.mrb[100].mxu0 %v2769_v3  ;;  %v2743_v14 = vmax.f32 %v2711_v6, 0.0  ;;  %v5918_v3 = vld [vmem:[#allocation8 + $0x694] ss:$8 sps:$4 sm:$0xff]  }
 0x61b   : > { %v2714_v12 = vadd.f32 %v6835_v32, %v2637_v11  ;;  %3361 = vmatpush1.bf16.msra.mxu0 %v5895_v52  ;;  %v2744_v19 = vmax.f32 %v2712_v8, 0.0 }
 0x61c   : > { %v2745_v18 = vmax.f32 %v2713_v10, 0.0  ;;  %3362 = vmatprep.subr.bf16.mxu0 %v5900_v55  ;;  %v5916_v55 = vld [vmem:[#allocation8 + $0x690] ss:$8 sps:$4 sm:$0xff]   ;;  %v5921_v10 = vld [vmem:[#allocation8 + $0x6a4] ss:$8 sps:$4 sm:$0xff]  }
 0x61d   : > { %v2746_v16 = vmax.f32 %v2714_v12, 0.0 }
 0x61e   : > { %v2771_v17 = vpack.c.bf16 %v2745_v18, %v2743_v14 }
 0x61f   : > { %v2772_v20 = vpack.c.bf16 %v2746_v16, %v2744_v19  ;;  %v2641_v21 = vpop.f32.mrb[76].mxu1  ;;  %3363 = vmatpush1.bf16.msra.mxu0 %v5898_v13 }
 0x620   : > { %v2715_v27 = vadd.f32 %v6832_v36, %v2641_v21  ;;  %v2643_v23 = vpop.f32.mrb[77].mxu1  ;;  %3364 = vmatprep.subr.bf16.mxu0 %v5903_v15  ;;  %v5919_v15 = vld [vmem:[#allocation8 + $0x6a0] ss:$8 sps:$4 sm:$0xff]  }
 0x621   : > { %v2716_v28 = vadd.f32 %v6835_v32, %v2643_v23  ;;  %v2645_v29 = vpop.f32.mrb[78].mxu1  ;;  %3041 = vmatprep.mubr.bf16.mxu0 %v2772_v20 }
 0x622   : > { %v2717_v30 = vadd.f32 %v6832_v36, %v2645_v29  ;;  %v2647_v35 = vpop.f32.mrb[79].mxu1  ;;  %3042 = vmatmul.mubr.bf16.gmra.mrb[104].mxu0 %v2771_v17  ;;  %v2747_v34 = vmax.f32 %v2715_v27, 0.0  ;;  %v5924_v17 = vld [vmem:[#allocation8 + $0x6b4] ss:$8 sps:$4 sm:$0xff]  }
 0x623   : > { %v2718_v31 = vadd.f32 %v6835_v32, %v2647_v35  ;;  %3365 = vmatpush1.bf16.msra.mxu0 %v5901_v22  ;;  %v2748_v39 = vmax.f32 %v2716_v28, 0.0 }
 0x624   : > { %v2749_v37 = vmax.f32 %v2717_v30, 0.0  ;;  %3366 = vmatprep.subr.bf16.mxu0 %v5906_v25  ;;  %v5922_v25 = vld [vmem:[#allocation8 + $0x6b0] ss:$8 sps:$4 sm:$0xff]   ;;  %v5927_v30 = vld [vmem:[#allocation8 + $0x6c4] ss:$8 sps:$4 sm:$0xff]  }
 0x625   : > { %v2750_v40 = vmax.f32 %v2718_v31, 0.0 }
 0x626   : > { %v2773_v41 = vpack.c.bf16 %v2749_v37, %v2747_v34 }
 0x627   : > { %v2774_v42 = vpack.c.bf16 %v2750_v40, %v2748_v39  ;;  %v2651_v43 = vpop.f32.mrb[80].mxu1  ;;  %3367 = vmatpush1.bf16.msra.mxu0 %v5904_v33 }
 0x628   : > { %v2719_v45 = vadd.f32 %v6832_v36, %v2651_v43  ;;  %v2653_v46 = vpop.f32.mrb[81].mxu1  ;;  %3368 = vmatprep.subr.bf16.mxu0 %v5909_v38  ;;  %v5925_v38 = vld [vmem:[#allocation8 + $0x6c0] ss:$8 sps:$4 sm:$0xff]  }
 0x629   : > { %v2720_v48 = vadd.f32 %v6835_v32, %v2653_v46  ;;  %v2655_v49 = vpop.f32.mrb[82].mxu1  ;;  %3051 = vmatprep.mubr.bf16.mxu0 %v2774_v42 }
 0x62a   : > { %v2721_v50 = vadd.f32 %v6832_v36, %v2655_v49  ;;  %v2657_v51 = vpop.f32.mrb[83].mxu1  ;;  %3052 = vmatmul.mubr.bf16.gmra.mrb[108].mxu0 %v2773_v41  ;;  %v2751_v56 = vmax.f32 %v2719_v45, 0.0  ;;  %v5930_v41 = vld [vmem:[#allocation8 + $0x6d4] ss:$8 sps:$4 sm:$0xff]  }
 0x62b   : > { %v2722_v54 = vadd.f32 %v6835_v32, %v2657_v51  ;;  %3369 = vmatpush1.bf16.msra.mxu0 %v5907_v44  ;;  %v2752_v59 = vmax.f32 %v2720_v48, 0.0 }
 0x62c   : > { %v2753_v57 = vmax.f32 %v2721_v50, 0.0  ;;  %3370 = vmatprep.subr.bf16.mxu0 %v5912_v47  ;;  %v5928_v47 = vld [vmem:[#allocation8 + $0x6d0] ss:$8 sps:$4 sm:$0xff]  }
 0x62d   : > { %v2754_v60 = vmax.f32 %v2722_v54, 0.0 }
 0x62e   : > { %v2775_v61 = vpack.c.bf16 %v2753_v57, %v2751_v56  ;;  %v5933_v56 = vld [vmem:[#allocation8 + $0x6e4] ss:$8 sps:$4 sm:$0xff]   ;;  %v5931_v57 = vld [vmem:[#allocation8 + $0x6e0] ss:$8 sps:$4 sm:$0xff]  }
 0x62f   : > { %v2776_v62 = vpack.c.bf16 %v2754_v60, %v2752_v59  ;;  %v2661_v0 = vpop.f32.mrb[84].mxu1  ;;  %3371 = vmatpush1.bf16.msra.mxu0 %v5910_v53  ;;  %v5939_v59 = vld [vmem:[#allocation10 + $0x4] ss:$8 sps:$4 sm:$0xff]   ;;  %v5942_v60 = vld [vmem:[#allocation10 + $0x14] ss:$8 sps:$4 sm:$0xff]  }
 0x630   : > { %v2723_v1 = vadd.f32 %v6832_v36, %v2661_v0  ;;  %v2663_v2 = vpop.f32.mrb[85].mxu1  ;;  %3372 = vmatprep.subr.bf16.mxu0 %v5915_v58  ;;  %v5934_v58 = vld [vmem:[#allocation8 + $0x6f0] ss:$8 sps:$4 sm:$0xff]   ;;  %3709 = vmatprep.subr.bf16.mxu1 %v5939_v59  ;;  %v6869_v0 = vld [vmem:[#allocation11] sm:$0xff]  }
 0x631   : > { %v2724_v4 = vadd.f32 %v6835_v32, %v2663_v2  ;;  %v2665_v5 = vpop.f32.mrb[86].mxu1  ;;  %3061 = vmatprep.mubr.bf16.mxu0 %v2776_v62  ;;  %v5945_v62 = vld [vmem:[#allocation10 + $0x24] ss:$8 sps:$4 sm:$0xff]   ;;  %v5946_v2 = vld [vmem:[#allocation10 + $0x30] ss:$8 sps:$4 sm:$0xff]  }
 0x632   : > { %v2725_v52 = vadd.f32 %v6832_v36, %v2665_v5  ;;  %v2667_v6 = vpop.f32.mrb[87].mxu1  ;;  %3062 = vmatmul.mubr.bf16.gmra.mrb[112].mxu0 %v2775_v61  ;;  %v2755_v8 = vmax.f32 %v2723_v1, 0.0  ;;  %v5940_v61 = vld [vmem:[#allocation10 + $0x10] ss:$8 sps:$4 sm:$0xff]   ;;  %v5948_v1 = vld [vmem:[#allocation10 + $0x34] ss:$8 sps:$4 sm:$0xff]  }
 0x633   : > { %v2726_v7 = vadd.f32 %v6835_v32, %v2667_v6  ;;  %3373 = vmatpush1.bf16.msra.mxu0 %v5913_v63  ;;  %v2756_v11 = vmax.f32 %v2724_v4, 0.0  ;;  %v5943_v63 = vld [vmem:[#allocation10 + $0x20] ss:$8 sps:$4 sm:$0xff]   ;;  %v5954_v5 = vld [vmem:[#allocation10 + $0x54] ss:$8 sps:$4 sm:$0xff]  }
 0x634   : > { %v2757_v9 = vmax.f32 %v2725_v52, 0.0  ;;  %3374 = vmatprep.subr.bf16.mxu0 %v5918_v3  ;;  %v5951_v3 = vld [vmem:[#allocation10 + $0x44] ss:$8 sps:$4 sm:$0xff]   ;;  %v5949_v4 = vld [vmem:[#allocation10 + $0x40] ss:$8 sps:$4 sm:$0xff]  }
 0x635   : > { %v2758_v12 = vmax.f32 %v2726_v7, 0.0  ;;  %v5952_v52 = vld [vmem:[#allocation10 + $0x50] ss:$8 sps:$4 sm:$0xff]   ;;  %v5957_v6 = vld [vmem:[#allocation10 + $0x64] ss:$8 sps:$4 sm:$0xff]  }
 0x636   : > { %v2777_v13 = vpack.c.bf16 %v2757_v9, %v2755_v8  ;;  %v5955_v7 = vld [vmem:[#allocation10 + $0x60] ss:$8 sps:$4 sm:$0xff]   ;;  %v5958_v8 = vld [vmem:[#allocation10 + $0x70] ss:$8 sps:$4 sm:$0xff]   ;;  %v5964_v9 = vld [vmem:[#allocation10 + $0x84] ss:$8 sps:$4 sm:$0xff]  }
 0x637   : > { %v2778_v14 = vpack.c.bf16 %v2758_v12, %v2756_v11  ;;  %v2671_v18 = vpop.f32.mrb[88].mxu1  ;;  %3375 = vmatpush1.bf16.msra.mxu0 %v5916_v55  ;;  %v5960_v55 = vld [vmem:[#allocation10 + $0x74] ss:$8 sps:$4 sm:$0xff]   ;;  %v5965_v12 = vld [vmem:[#allocation10 + $0x90] ss:$8 sps:$4 sm:$0xff]  }
 0x638   : > { %v2727_v19 = vadd.f32 %v6832_v36, %v2671_v18  ;;  %v2673_v16 = vpop.f32.mrb[89].mxu1  ;;  %3376 = vmatprep.subr.bf16.mxu0 %v5921_v10  ;;  %v5962_v10 = vld [vmem:[#allocation10 + $0x80] ss:$8 sps:$4 sm:$0xff]   ;;  %v5967_v11 = vld [vmem:[#allocation10 + $0x94] ss:$8 sps:$4 sm:$0xff]  }
 0x639   : > { %v2728_v20 = vadd.f32 %v6835_v32, %v2673_v16  ;;  %v2675_v21 = vpop.f32.mrb[90].mxu1  ;;  %3071 = vmatprep.mubr.bf16.mxu0 %v2778_v14  ;;  %v5969_v14 = vld [vmem:[#allocation10 + $0xa0] ss:$8 sps:$4 sm:$0xff]   ;;  %v5975_v18 = vld [vmem:[#allocation10 + $0xb4] ss:$8 sps:$4 sm:$0xff]  }
 0x63a   : > { %v2729_v22 = vadd.f32 %v6832_v36, %v2675_v21  ;;  %v2677_v27 = vpop.f32.mrb[91].mxu1  ;;  %3072 = vmatmul.mubr.bf16.gmra.mrb[116].mxu0 %v2777_v13  ;;  %v2759_v28 = vmax.f32 %v2727_v19, 0.0  ;;  %v5971_v13 = vld [vmem:[#allocation10 + $0xa4] ss:$8 sps:$4 sm:$0xff]   ;;  %v5977_v16 = vld [vmem:[#allocation10 + $0xc0] ss:$8 sps:$4 sm:$0xff]  }
 0x63b   : > { %v2730_v23 = vadd.f32 %v6835_v32, %v2677_v27  ;;  %3377 = vmatpush1.bf16.msra.mxu0 %v5919_v15  ;;  %v2760_v35 = vmax.f32 %v2728_v20, 0.0  ;;  %v5973_v15 = vld [vmem:[#allocation10 + $0xb0] ss:$8 sps:$4 sm:$0xff]   ;;  %v5979_v19 = vld [vmem:[#allocation10 + $0xc4] ss:$8 sps:$4 sm:$0xff]  }
 0x63c   : > { %v2761_v29 = vmax.f32 %v2729_v22, 0.0  ;;  %3378 = vmatprep.subr.bf16.mxu0 %v5924_v17  ;;  %v5983_v17 = vld [vmem:[#allocation10 + $0xd4] ss:$8 sps:$4 sm:$0xff]   ;;  %v5981_v20 = vld [vmem:[#allocation10 + $0xd0] ss:$8 sps:$4 sm:$0xff]  }
 0x63d   : > { %v2762_v31 = vmax.f32 %v2730_v23, 0.0  ;;  %v2817_v21 = vld [vmem:[#allocation7 + $0xc] sm:$0x3] }
 0x63e   : > { %v2779_v33 = vpack.c.bf16 %v2761_v29, %v2759_v28  ;;  %v6873_v22 = vrot.slane %v2817_v21, %v6621_v24  ;;  %v6876_v27 = vrot.slane %v2817_v21, %v6623_v26 }
 0x63f   : > { %v2780_v34 = vpack.c.bf16 %v2762_v31, %v2760_v35  ;;  %v2681_v37 = vpop.f32.mrb[92].mxu1  ;;  %3379 = vmatpush1.bf16.msra.mxu0 %v5922_v25 }
 0x640   : > { %v2731_v39 = vadd.f32 %v6832_v36, %v2681_v37  ;;  %v2683_v40 = vpop.f32.mrb[93].mxu1  ;;  %3380 = vmatprep.subr.bf16.mxu0 %v5927_v30 }
 0x641   : > { %v2732_v42 = vadd.f32 %v6835_v32, %v2683_v40  ;;  %v2685_v43 = vpop.f32.mrb[94].mxu1  ;;  %3081 = vmatprep.mubr.bf16.mxu0 %v2780_v34 }
 0x642   : > { %v2733_v44 = vadd.f32 %v6832_v36, %v2685_v43  ;;  %v2687_v45 = vpop.f32.mrb[95].mxu1  ;;  %3082 = vmatmul.mubr.bf16.gmra.mrb[120].mxu0 %v2779_v33  ;;  %v2763_v48 = vmax.f32 %v2731_v39, 0.0  ;;  %v5936_v36 = vld [vmem:[#allocation8 + $0x6f4] ss:$8 sps:$4 sm:$0xff]  }
 0x643   : > { %v2734_v46 = vadd.f32 %v6835_v32, %v2687_v45  ;;  %3381 = vmatpush1.bf16.msra.mxu0 %v5925_v38  ;;  %v2764_v50 = vmax.f32 %v2732_v42, 0.0  ;;  %v5937_v32 = vld [vmem:[#allocation10] ss:$8 sps:$4 sm:$0xff]  }
 0x644   : > { %v2765_v49 = vmax.f32 %v2733_v44, 0.0  ;;  %3382 = vmatprep.subr.bf16.mxu0 %v5930_v41  ;;  %3710 = vmatpush1.bf16.msra.mxu1 %v5937_v32  ;;  %v5968_v45 = vld [vmem:[#allocation11 + $0x8] sm:$0xff]  }
 0x645   : > { %v2766_v51 = vmax.f32 %v2734_v46, 0.0  ;;  %3711 = vmatprep.subr.bf16.mxu1 %v5942_v60 }
 0x646   : > { %v2781_v54 = vpack.c.bf16 %v2765_v49, %v2763_v48 }
 0x647   : > { %v2782_v53 = vpack.c.bf16 %v2766_v51, %v2764_v50  ;;  %3383 = vmatpush1.bf16.msra.mxu0 %v5928_v47 }
 0x648   : > { %3384 = vmatprep.subr.bf16.mxu0 %v5933_v56  ;;  %3712 = vmatpush1.bf16.msra.mxu1 %v5940_v61  ;;  %v5976_v61 = vld [vmem:[#allocation11 + $0x18] sm:$0xff]  }
 0x649   : > { %3091 = vmatprep.mubr.bf16.mxu0 %v2782_v53  ;;  %3713 = vmatprep.subr.bf16.mxu1 %v5945_v62  ;;  %v5972_v53 = vld [vmem:[#allocation11 + $0x10] sm:$0xff]  }
 0x64a   : > { %3092 = vmatmul.mubr.bf16.gmra.mrb[124].mxu0 %v2781_v54 }
 0x64b   : > { %3385 = vmatpush1.bf16.msra.mxu0 %v5931_v57 }
 0x64c   : > { %3386 = vmatprep.subr.bf16.mxu0 %v5936_v36  ;;  %3714 = vmatpush1.bf16.msra.mxu1 %v5943_v63 }
 0x64d   : > { %3715 = vmatprep.subr.bf16.mxu1 %v5948_v1 }
 0x64f   : > { %3387 = vmatpush1.bf16.msra.mxu0 %v5934_v58 }
 0x650   : > { %5254 = vmatprep.subr.bf16.mxu0 %v6869_v0  ;;  %3716 = vmatpush1.bf16.msra.mxu1 %v5946_v2 }
 0x651   : > { %3717 = vmatprep.subr.bf16.mxu1 %v5951_v3 }
 0x654   : > { %3718 = vmatpush1.bf16.msra.mxu1 %v5949_v4 }
 0x655   : > { %3719 = vmatprep.subr.bf16.mxu1 %v5954_v5  ;;  %v5980_v5 = vld [vmem:[#allocation11 + $0x20] sm:$0xff]  }
 0x658   : > { %3720 = vmatpush1.bf16.msra.mxu1 %v5952_v52 }
 0x659   : > { %3721 = vmatprep.subr.bf16.mxu1 %v5957_v6 }
 0x65c   : > { %3722 = vmatpush1.bf16.msra.mxu1 %v5955_v7 }
 0x65d   : > { %3723 = vmatprep.subr.bf16.mxu1 %v5960_v55 }
 0x660   : > { %3724 = vmatpush1.bf16.msra.mxu1 %v5958_v8 }
 0x661   : > { %3725 = vmatprep.subr.bf16.mxu1 %v5964_v9 }
 0x664   : > { %3726 = vmatpush1.bf16.msra.mxu1 %v5962_v10 }
 0x665   : > { %3727 = vmatprep.subr.bf16.mxu1 %v5967_v11  ;;  %v5984_v11 = vld [vmem:[#allocation11 + $0x28] sm:$0xff]  }
 0x668   : > { %3728 = vmatpush1.bf16.msra.mxu1 %v5965_v12 }
 0x669   : > { %3729 = vmatprep.subr.bf16.mxu1 %v5971_v13 }
 0x66c   : > { %3730 = vmatpush1.bf16.msra.mxu1 %v5969_v14 }
 0x66d   : > { %3731 = vmatprep.subr.bf16.mxu1 %v5975_v18 }
 0x670   : > { %3732 = vmatpush1.bf16.msra.mxu1 %v5973_v15 }
 0x671   : > { %3733 = vmatprep.subr.bf16.mxu1 %v5979_v19 }
 0x674   : > { %3734 = vmatpush1.bf16.msra.mxu1 %v5977_v16 }
 0x675   : > { %3735 = vmatprep.subr.bf16.mxu1 %v5983_v17 }
 0x678   : > { %3736 = vmatpush1.bf16.msra.mxu1 %v5981_v20 }
 0x6e5   : > { %v3023_v23 = vpop.f32.mrb[96].mxu0 }
 0x6e6   : > { %v3024_v25 = vadd.f32 %v3023_v23, %v6873_v22  ;;  %v3025_v28 = vpop.f32.mrb[97].mxu0 }
 0x6e7   : > { %v3026_v29 = vadd.f32 %v3025_v28, %v6876_v27  ;;  %v3027_v30 = vpop.f32.mrb[98].mxu0 }
 0x6e8   : > { %v3028_v35 = vadd.f32 %v3027_v30, %v6873_v22  ;;  %v3029_v31 = vpop.f32.mrb[99].mxu0  ;;  %v3102_v34 = vmax.f32 %v3024_v25, 0.0 }
 0x6e9   : > { %v3030_v33 = vadd.f32 %v3029_v31, %v6876_v27  ;;  %v3103_v38 = vmax.f32 %v3026_v29, 0.0 }
 0x6ea   : > { %v3104_v37 = vmax.f32 %v3028_v35, 0.0 }
 0x6eb   : > { %v3105_v39 = vmax.f32 %v3030_v33, 0.0 }
 0x6ec   : > { %v3134_v40 = vpack.c.bf16 %v3104_v37, %v3102_v34 }
 0x6ed   : > { %v3135_v41 = vpack.c.bf16 %v3105_v39, %v3103_v38  ;;  %v3033_v42 = vpop.f32.mrb[100].mxu0 }
 0x6ee   : > { %v3034_v43 = vadd.f32 %v3033_v42, %v6873_v22  ;;  %v3035_v44 = vpop.f32.mrb[101].mxu0 }
 0x6ef   : > { %v3036_v46 = vadd.f32 %v3035_v44, %v6876_v27  ;;  %v3037_v47 = vpop.f32.mrb[102].mxu0  ;;  %3388 = vmatprep.mubr.bf16.mxu0 %v3135_v41 }
 0x6f0   : > { %v3038_v48 = vadd.f32 %v3037_v47, %v6873_v22  ;;  %v3039_v49 = vpop.f32.mrb[103].mxu0  ;;  %3389 = vmatmul.mubr.bf16.vlgmr.msra.gmra.mrb[128].mxu0 %v3134_v40  ;;  %v3106_v51 = vmax.f32 %v3034_v43, 0.0 }
 0x6f1   : > { %v3040_v50 = vadd.f32 %v3039_v49, %v6876_v27  ;;  %5255 = vmatpush3.bf16.msra.mxu0 %v6869_v0  ;;  %v3107_v56 = vmax.f32 %v3036_v46, 0.0 }
 0x6f2   : > { %v3108_v54 = vmax.f32 %v3038_v48, 0.0  ;;  %5256 = vmatprep.subr.bf16.mxu0 %v5968_v45 }
 0x6f3   : > { %v3109_v57 = vmax.f32 %v3040_v50, 0.0 }
 0x6f4   : > { %v3136_v36 = vpack.c.bf16 %v3108_v54, %v3106_v51 }
 0x6f5   : > { %v3137_v58 = vpack.c.bf16 %v3109_v57, %v3107_v56  ;;  %v3043_v32 = vpop.f32.mrb[104].mxu0  ;;  %5257 = vmatpush3.bf16.msra.mxu0 %v5968_v45 }
 0x6f6   : > { %v3044_v59 = vadd.f32 %v3043_v32, %v6873_v22  ;;  %v3045_v60 = vpop.f32.mrb[105].mxu0  ;;  %5258 = vmatprep.subr.bf16.mxu0 %v5972_v53 }
 0x6f7   : > { %v3046_v62 = vadd.f32 %v3045_v60, %v6876_v27  ;;  %v3047_v63 = vpop.f32.mrb[106].mxu0  ;;  %3398 = vmatprep.mubr.bf16.mxu0 %v3137_v58 }
 0x6f8   : > { %v3048_v0 = vadd.f32 %v3047_v63, %v6873_v22  ;;  %v3049_v1 = vpop.f32.mrb[107].mxu0  ;;  %3399 = vmatmul.mubr.bf16.gmra.mrb[132].mxu0 %v3136_v36  ;;  %v3110_v3 = vmax.f32 %v3044_v59, 0.0 }
 0x6f9   : > { %v3050_v2 = vadd.f32 %v3049_v1, %v6876_v27  ;;  %5259 = vmatpush3.bf16.msra.mxu0 %v5972_v53  ;;  %v3111_v52 = vmax.f32 %v3046_v62, 0.0 }
 0x6fa   : > { %v3112_v4 = vmax.f32 %v3048_v0, 0.0  ;;  %5260 = vmatprep.subr.bf16.mxu0 %v5976_v61 }
 0x6fb   : > { %v3113_v6 = vmax.f32 %v3050_v2, 0.0 }
 0x6fc   : > { %v3138_v7 = vpack.c.bf16 %v3112_v4, %v3110_v3 }
 0x6fd   : > { %v3139_v55 = vpack.c.bf16 %v3113_v6, %v3111_v52  ;;  %v3053_v8 = vpop.f32.mrb[108].mxu0  ;;  %5261 = vmatpush3.bf16.msra.mxu0 %v5976_v61 }
 0x6fe   : > { %v3054_v9 = vadd.f32 %v3053_v8, %v6873_v22  ;;  %v3055_v10 = vpop.f32.mrb[109].mxu0  ;;  %5262 = vmatprep.subr.bf16.mxu0 %v5980_v5 }
 0x6ff   : > { %v3056_v12 = vadd.f32 %v3055_v10, %v6876_v27  ;;  %v3057_v13 = vpop.f32.mrb[110].mxu0  ;;  %3408 = vmatprep.mubr.bf16.mxu0 %v3139_v55 }
 0x700   : > { %v3058_v14 = vadd.f32 %v3057_v13, %v6873_v22  ;;  %v3059_v18 = vpop.f32.mrb[111].mxu0  ;;  %3409 = vmatmul.mubr.bf16.gmra.mrb[136].mxu0 %v3138_v7  ;;  %v3114_v19 = vmax.f32 %v3054_v9, 0.0 }
 0x701   : > { %v3060_v15 = vadd.f32 %v3059_v18, %v6876_v27  ;;  %5263 = vmatpush3.bf16.msra.mxu0 %v5980_v5  ;;  %v3115_v17 = vmax.f32 %v3056_v12, 0.0 }
 0x702   : > { %v3116_v16 = vmax.f32 %v3058_v14, 0.0  ;;  %5264 = vmatprep.subr.bf16.mxu0 %v5984_v11 }
 0x703   : > { %v3117_v20 = vmax.f32 %v3060_v15, 0.0 }
 0x704   : > { %v3140_v21 = vpack.c.bf16 %v3116_v16, %v3114_v19 }
 0x705   : > { %v3141_v23 = vpack.c.bf16 %v3117_v20, %v3115_v17  ;;  %v3063_v25 = vpop.f32.mrb[112].mxu0  ;;  %5265 = vmatpush3.bf16.msra.mxu0 %v5984_v11  ;;  %v5988_v17 = vld [vmem:[#allocation11 + $0x30] sm:$0xff]   ;;  %v5987_v20 = vld [vmem:[#allocation10 + $0xe4] ss:$8 sps:$4 sm:$0xff]  }
 0x706   : > { %v3064_v28 = vadd.f32 %v3063_v25, %v6873_v22  ;;  %v3065_v29 = vpop.f32.mrb[113].mxu0  ;;  %5266 = vmatprep.subr.bf16.mxu0 %v5988_v17  ;;  %3737 = vmatprep.subr.bf16.mxu1 %v5987_v20  ;;  %v5989_v25 = vld [vmem:[#allocation10 + $0xf0] ss:$8 sps:$4 sm:$0xff]  }
 0x707   : > { %v3066_v30 = vadd.f32 %v3065_v29, %v6876_v27  ;;  %v3067_v35 = vpop.f32.mrb[114].mxu0  ;;  %3418 = vmatprep.mubr.bf16.mxu0 %v3141_v23  ;;  %v5564_v23 = vld [vmem:[%s6587_s1 + $0x14] ss:$8 sps:$4 sm:$0xff]   ;;  %v5994_v29 = vld [vmem:[%s6587_s1 + $0x24] ss:$8 sps:$4 sm:$0xff]  }
 0x708   : > { %v3068_v31 = vadd.f32 %v3067_v35, %v6873_v22  ;;  %v3069_v33 = vpop.f32.mrb[115].mxu0  ;;  %3419 = vmatmul.mubr.bf16.gmra.mrb[140].mxu0 %v3140_v21  ;;  %v3118_v37 = vmax.f32 %v3064_v28, 0.0  ;;  %v5985_v21 = vld [vmem:[#allocation10 + $0xe0] ss:$8 sps:$4 sm:$0xff]   ;;  %v5993_v28 = vld [vmem:[%s6587_s1 + $0x4] ss:$8 sps:$4 sm:$0xff]  }
 0x709   : > { %v3070_v34 = vadd.f32 %v3069_v33, %v6876_v27  ;;  %v3119_v39 = vmax.f32 %v3066_v30, 0.0  ;;  %5267 = vmatpush3.bf16.msra.mxu0 %v5988_v17  ;;  %3738 = vmatpush1.bf16.msra.mxu1 %v5985_v21  ;;  %v5995_v30 = vld [vmem:[%s6587_s1 + $0x34] ss:$8 sps:$4 sm:$0xff]   ;;  %v5996_v35 = vld [vmem:[%s6587_s1 + $0x44] ss:$8 sps:$4 sm:$0xff]  }
 0x70a   : > { %v3120_v38 = vmax.f32 %v3068_v31, 0.0  ;;  %v5997_v31 = vld [vmem:[%s6587_s1 + $0x54] ss:$8 sps:$4 sm:$0xff]   ;;  %v5998_v33 = vld [vmem:[%s6587_s1 + $0x64] ss:$8 sps:$4 sm:$0xff]  }
 0x70b   : > { %v3121_v40 = vmax.f32 %v3070_v34, 0.0  ;;  %v5999_v34 = vld [vmem:[%s6587_s1 + $0x74] ss:$8 sps:$4 sm:$0xff]   ;;  %s7122_s1 = scalar_lea.hbm %s7179_s7, %s5189_s18 }
 0x70c   : > { %v3142_v41 = vpack.c.bf16 %v3120_v38, %v3118_v37  ;;  %v6000_v37 = vld [vmem:[#allocation11 + $0x40] sm:$0xff]   ;;  %v6001_v38 = vld [vmem:[#allocation11 + $0x48] sm:$0xff]  }
 0x70d   : > { %v3143_v42 = vpack.c.bf16 %v3121_v40, %v3119_v39  ;;  %v3073_v43 = vpop.f32.mrb[116].mxu0  ;;  %v6002_v39 = vld [vmem:[#allocation11 + $0x50] sm:$0xff]   ;;  %v6003_v40 = vld [vmem:[#allocation11 + $0x58] sm:$0xff]  }
 0x70e   : > { %v3074_v44 = vadd.f32 %v3073_v43, %v6873_v22  ;;  %v3075_v45 = vpop.f32.mrb[117].mxu0 }
 0x70f   : > { %v3076_v46 = vadd.f32 %v3075_v45, %v6876_v27  ;;  %v3077_v47 = vpop.f32.mrb[118].mxu0  ;;  %3428 = vmatprep.mubr.bf16.mxu0 %v3143_v42 }
 0x710   : > { %v3078_v48 = vadd.f32 %v3077_v47, %v6873_v22  ;;  %v3079_v49 = vpop.f32.mrb[119].mxu0  ;;  %3429 = vmatmul.mubr.bf16.gmra.mrb[144].mxu0 %v3142_v41  ;;  %v3122_v51 = vmax.f32 %v3074_v44, 0.0  ;;  %v3184_v41 = vld [vmem:[#allocation7 + $0xe] sm:$0x3] }
 0x711   : > { %v3080_v50 = vadd.f32 %v3079_v49, %v6876_v27  ;;  %v3123_v53 = vmax.f32 %v3076_v46, 0.0  ;;  %v6920_v42 = vrot.slane %v3184_v41, %v6621_v24  ;;  %v6923_v43 = vrot.slane %v3184_v41, %v6623_v26 }
 0x712   : > { %v3124_v54 = vmax.f32 %v3078_v48, 0.0 }
 0x713   : > { %v3125_v56 = vmax.f32 %v3080_v50, 0.0 }
 0x714   : > { %v3144_v57 = vpack.c.bf16 %v3124_v54, %v3122_v51 }
 0x715   : > { %v3145_v36 = vpack.c.bf16 %v3125_v56, %v3123_v53  ;;  %v3083_v58 = vpop.f32.mrb[120].mxu0 }
 0x716   : > { %v3084_v32 = vadd.f32 %v3083_v58, %v6873_v22  ;;  %v3085_v59 = vpop.f32.mrb[121].mxu0 }
 0x717   : > { %v3086_v60 = vadd.f32 %v3085_v59, %v6876_v27  ;;  %v3087_v61 = vpop.f32.mrb[122].mxu0  ;;  %3438 = vmatprep.mubr.bf16.mxu0 %v3145_v36 }
 0x718   : > { %v3088_v62 = vadd.f32 %v3087_v61, %v6873_v22  ;;  %v3089_v63 = vpop.f32.mrb[123].mxu0  ;;  %3439 = vmatmul.mubr.bf16.gmra.mrb[148].mxu0 %v3144_v57  ;;  %v3126_v1 = vmax.f32 %v3084_v32, 0.0 }
 0x719   : > { %v3090_v0 = vadd.f32 %v3089_v63, %v6876_v27  ;;  %v3127_v3 = vmax.f32 %v3086_v60, 0.0 }
 0x71a   : > { %v3128_v2 = vmax.f32 %v3088_v62, 0.0 }
 0x71b   : > { %v3129_v4 = vmax.f32 %v3090_v0, 0.0 }
 0x71c   : > { %v3146_v5 = vpack.c.bf16 %v3128_v2, %v3126_v1 }
 0x71d   : > { %v3147_v52 = vpack.c.bf16 %v3129_v4, %v3127_v3  ;;  %v3093_v6 = vpop.f32.mrb[124].mxu0 }
 0x71e   : > { %v3094_v7 = vadd.f32 %v3093_v6, %v6873_v22  ;;  %v3095_v55 = vpop.f32.mrb[125].mxu0 }
 0x71f   : > { %v3096_v8 = vadd.f32 %v3095_v55, %v6876_v27  ;;  %v3097_v9 = vpop.f32.mrb[126].mxu0  ;;  %3448 = vmatprep.mubr.bf16.mxu0 %v3147_v52 }
 0x720   : > { %v3098_v10 = vadd.f32 %v3097_v9, %v6873_v22  ;;  %v3099_v11 = vpop.f32.mrb[127].mxu0  ;;  %3449 = vmatmul.mubr.bf16.gmra.mrb[152].mxu0 %v3146_v5  ;;  %v3130_v13 = vmax.f32 %v3094_v7, 0.0  ;;  %v5992_v22 = vld [vmem:[#allocation11 + $0x38] sm:$0xff]  }
 0x721   : > { %v3100_v12 = vadd.f32 %v3099_v11, %v6876_v27  ;;  %v3131_v18 = vmax.f32 %v3096_v8, 0.0  ;;  %v5991_v27 = vld [vmem:[#allocation10 + $0xf4] ss:$8 sps:$4 sm:$0xff]   ;;  %5268 = vmatprep.subr.bf16.mxu0 %v5992_v22 }
 0x722   : > { %v3132_v14 = vmax.f32 %v3098_v10, 0.0  ;;  %3739 = vmatprep.subr.bf16.mxu1 %v5991_v27  ;;  %5269 = vmatpush3.bf16.msra.mxu0 %v5992_v22 }
 0x723   : > { %v3133_v15 = vmax.f32 %v3100_v12, 0.0  ;;  %3740 = vmatpush1.bf16.msra.mxu1 %v5989_v25  ;;  %5286 = vmatprep.subr.bf16.mxu0 %v6000_v37 }
 0x724   : > { %v3148_v19 = vpack.c.bf16 %v3132_v14, %v3130_v13 }
 0x725   : > { %v3149_v16 = vpack.c.bf16 %v3133_v15, %v3131_v18 }
 0x727   : > { %3458 = vmatprep.mubr.bf16.mxu0 %v3149_v16 }
 0x728   : > { %3459 = vmatmul.mubr.bf16.gmra.mrb[156].mxu0 %v3148_v19 }
 0x729   : > { %5270 = vmatprep.mubr.bf16.mxu0 %v5993_v28 }
 0x730   : > { %5271 = vmatmul.mubr.bf16.vlgmr.msra.gmra.mrb[160].mxu0 %v5564_v23 }
 0x731   : > { %5274 = vmatprep.mubr.bf16.mxu0 %v5994_v29  ;;  %5287 = vmatpush3.bf16.msra.mxu0 %v6000_v37 }
 0x732   : > { %5288 = vmatprep.subr.bf16.mxu0 %v6001_v38 }
 0x735   : > { %5289 = vmatpush3.bf16.msra.mxu0 %v6001_v38 }
 0x736   : > { %5290 = vmatprep.subr.bf16.mxu0 %v6002_v39 }
 0x738   : > { %5275 = vmatmul.mubr.bf16.gmra.mrb[164].mxu0 %v5995_v30 }
 0x739   : > { %5278 = vmatprep.mubr.bf16.mxu0 %v5996_v35  ;;  %5291 = vmatpush3.bf16.msra.mxu0 %v6002_v39 }
 0x73a   : > { %5292 = vmatprep.subr.bf16.mxu0 %v6003_v40 }
 0x73d   : > { %5293 = vmatpush3.bf16.msra.mxu0 %v6003_v40 }
 0x740   : > { %5279 = vmatmul.mubr.bf16.gmra.mrb[168].mxu0 %v5997_v31 }
 0x741   : > { %5282 = vmatprep.mubr.bf16.mxu0 %v5998_v33 }
 0x748   : > { %5283 = vmatmul.mubr.bf16.gmra.mrb[172].mxu0 %v5999_v34 }
 0x7c3   : > { %v3390_v44 = vpop.f32.mrb[128].mxu0 }
 0x7c4   : > { %v3391_v45 = vadd.f32 %v3390_v44, %v6920_v42  ;;  %v3392_v46 = vpop.f32.mrb[129].mxu0 }
 0x7c5   : > { %v3393_v47 = vadd.f32 %v3392_v46, %v6923_v43  ;;  %v3394_v48 = vpop.f32.mrb[130].mxu0 }
 0x7c6   : > { %v3395_v49 = vadd.f32 %v3394_v48, %v6920_v42  ;;  %v3396_v50 = vpop.f32.mrb[131].mxu0  ;;  %v3469_v54 = vmax.f32 %v3391_v45, 0.0 }
 0x7c7   : > { %v3397_v51 = vadd.f32 %v3396_v50, %v6923_v43  ;;  %v3470_v56 = vmax.f32 %v3393_v47, 0.0 }
 0x7c8   : > { %v3471_v53 = vmax.f32 %v3395_v49, 0.0 }
 0x7c9   : > { %v3472_v24 = vmax.f32 %v3397_v51, 0.0 }
 0x7ca   : > { %v3501_v57 = vpack.c.bf16 %v3471_v53, %v3469_v54 }
 0x7cb   : > { %v3502_v36 = vpack.c.bf16 %v3472_v24, %v3470_v56  ;;  %v3400_v26 = vpop.f32.mrb[132].mxu0 }
 0x7cc   : > { %v3401_v58 = vadd.f32 %v3400_v26, %v6920_v42  ;;  %v3402_v32 = vpop.f32.mrb[133].mxu0 }
 0x7cd   : > { %v3403_v59 = vadd.f32 %v3402_v32, %v6923_v43  ;;  %v3404_v60 = vpop.f32.mrb[134].mxu0  ;;  %3741 = vmatprep.mubr.bf16.mxu1 %v3502_v36 }
 0x7ce   : > { %v3405_v61 = vadd.f32 %v3404_v60, %v6920_v42  ;;  %v3406_v62 = vpop.f32.mrb[135].mxu0  ;;  %3742 = vmatmul.mubr.bf16.vlgmr.msra.gmra.mrb[96].mxu1 %v3501_v57  ;;  %v3473_v0 = vmax.f32 %v3401_v58, 0.0 }
 0x7cf   : > { %v3407_v63 = vadd.f32 %v3406_v62, %v6923_v43  ;;  %v3474_v2 = vmax.f32 %v3403_v59, 0.0 }
 0x7d0   : > { %v3475_v1 = vmax.f32 %v3405_v61, 0.0 }
 0x7d1   : > { %v3476_v3 = vmax.f32 %v3407_v63, 0.0 }
 0x7d2   : > { %v3503_v4 = vpack.c.bf16 %v3475_v1, %v3473_v0 }
 0x7d3   : > { %v3504_v5 = vpack.c.bf16 %v3476_v3, %v3474_v2  ;;  %v3410_v52 = vpop.f32.mrb[136].mxu0 }
 0x7d4   : > { %v3411_v6 = vadd.f32 %v3410_v52, %v6920_v42  ;;  %v3412_v7 = vpop.f32.mrb[137].mxu0 }
 0x7d5   : > { %v3413_v55 = vadd.f32 %v3412_v7, %v6923_v43  ;;  %v3414_v8 = vpop.f32.mrb[138].mxu0  ;;  %3751 = vmatprep.mubr.bf16.mxu1 %v3504_v5 }
 0x7d6   : > { %v3415_v9 = vadd.f32 %v3414_v8, %v6920_v42  ;;  %v3416_v10 = vpop.f32.mrb[139].mxu0  ;;  %3752 = vmatmul.mubr.bf16.gmra.mrb[100].mxu1 %v3503_v4  ;;  %v3477_v12 = vmax.f32 %v3411_v6, 0.0 }
 0x7d7   : > { %v3417_v11 = vadd.f32 %v3416_v10, %v6923_v43  ;;  %v3478_v14 = vmax.f32 %v3413_v55, 0.0 }
 0x7d8   : > { %v3479_v13 = vmax.f32 %v3415_v9, 0.0 }
 0x7d9   : > { %v3480_v18 = vmax.f32 %v3417_v11, 0.0 }
 0x7da   : > { %v3505_v15 = vpack.c.bf16 %v3479_v13, %v3477_v12 }
 0x7db   : > { %v3506_v19 = vpack.c.bf16 %v3480_v18, %v3478_v14  ;;  %v3420_v16 = vpop.f32.mrb[140].mxu0 }
 0x7dc   : > { %v3421_v17 = vadd.f32 %v3420_v16, %v6920_v42  ;;  %v3422_v20 = vpop.f32.mrb[141].mxu0 }
 0x7dd   : > { %v3423_v21 = vadd.f32 %v3422_v20, %v6923_v43  ;;  %v3424_v22 = vpop.f32.mrb[142].mxu0  ;;  %3761 = vmatprep.mubr.bf16.mxu1 %v3506_v19 }
 0x7de   : > { %v3425_v27 = vadd.f32 %v3424_v22, %v6920_v42  ;;  %v3426_v23 = vpop.f32.mrb[143].mxu0  ;;  %3762 = vmatmul.mubr.bf16.gmra.mrb[104].mxu1 %v3505_v15  ;;  %v3481_v28 = vmax.f32 %v3421_v17, 0.0 }
 0x7df   : > { %v3427_v25 = vadd.f32 %v3426_v23, %v6923_v43  ;;  %v3482_v30 = vmax.f32 %v3423_v21, 0.0 }
 0x7e0   : > { %v3483_v29 = vmax.f32 %v3425_v27, 0.0 }
 0x7e1   : > { %v3484_v35 = vmax.f32 %v3427_v25, 0.0 }
 0x7e2   : > { %v3507_v31 = vpack.c.bf16 %v3483_v29, %v3481_v28 }
 0x7e3   : > { %v3508_v33 = vpack.c.bf16 %v3484_v35, %v3482_v30  ;;  %v3430_v34 = vpop.f32.mrb[144].mxu0  ;;  %v6004_v35 = vld [vmem:[#allocation11 + $0x60] sm:$0xff]  }
 0x7e4   : > { %v3431_v37 = vadd.f32 %v3430_v34, %v6920_v42  ;;  %v3432_v38 = vpop.f32.mrb[145].mxu0  ;;  %5294 = vmatprep.subr.bf16.mxu0 %v6004_v35 }
 0x7e5   : > { %v3433_v39 = vadd.f32 %v3432_v38, %v6923_v43  ;;  %v3434_v40 = vpop.f32.mrb[146].mxu0  ;;  %3771 = vmatprep.mubr.bf16.mxu1 %v3508_v33  ;;  %5295 = vmatpush3.bf16.msra.mxu0 %v6004_v35  ;;  %v6006_v33 = vld [vmem:[#allocation11 + $0x70] sm:$0xff]  }
 0x7e6   : > { %v3435_v41 = vadd.f32 %v3434_v40, %v6920_v42  ;;  %v3436_v44 = vpop.f32.mrb[147].mxu0  ;;  %3772 = vmatmul.mubr.bf16.gmra.mrb[108].mxu1 %v3507_v31  ;;  %v3485_v46 = vmax.f32 %v3431_v37, 0.0 }
 0x7e7   : > { %v3437_v45 = vadd.f32 %v3436_v44, %v6923_v43  ;;  %v3486_v48 = vmax.f32 %v3433_v39, 0.0 }
 0x7e8   : > { %v3487_v47 = vmax.f32 %v3435_v41, 0.0 }
 0x7e9   : > { %v3488_v49 = vmax.f32 %v3437_v45, 0.0 }
 0x7ea   : > { %v3509_v50 = vpack.c.bf16 %v3487_v47, %v3485_v46 }
 0x7eb   : > { %v3510_v51 = vpack.c.bf16 %v3488_v49, %v3486_v48  ;;  %v3440_v54 = vpop.f32.mrb[148].mxu0 }
 0x7ec   : > { %v3441_v53 = vadd.f32 %v3440_v54, %v6920_v42  ;;  %v3442_v56 = vpop.f32.mrb[149].mxu0  ;;  %v6010_v54 = vld [vmem:[#allocation11 + $0x90] sm:$0xff]  }
 0x7ed   : > { %v3443_v24 = vadd.f32 %v3442_v56, %v6923_v43  ;;  %v3444_v57 = vpop.f32.mrb[150].mxu0  ;;  %3781 = vmatprep.mubr.bf16.mxu1 %v3510_v51  ;;  %v6009_v51 = vld [vmem:[#allocation11 + $0x88] sm:$0xff]   ;;  %v6012_v56 = vld [vmem:[#allocation11 + $0xa0] sm:$0xff]  }
 0x7ee   : > { %v3445_v36 = vadd.f32 %v3444_v57, %v6920_v42  ;;  %v3446_v26 = vpop.f32.mrb[151].mxu0  ;;  %3782 = vmatmul.mubr.bf16.gmra.mrb[112].mxu1 %v3509_v50  ;;  %v3489_v32 = vmax.f32 %v3441_v53, 0.0  ;;  %v6008_v50 = vld [vmem:[#allocation11 + $0x80] sm:$0xff]   ;;  %v6011_v53 = vld [vmem:[#allocation11 + $0x98] sm:$0xff]  }
 0x7ef   : > { %v3447_v58 = vadd.f32 %v3446_v26, %v6923_v43  ;;  %v3490_v60 = vmax.f32 %v3443_v24, 0.0  ;;  %5318 = vmatprep.subr.bf16.mxu1 %v6008_v50  ;;  %v6013_v24 = vld [vmem:[#allocation11 + $0xa8] sm:$0xff]  }
 0x7f0   : > { %v3491_v59 = vmax.f32 %v3445_v36, 0.0  ;;  %5319 = vmatpush3.bf16.msra.mxu1 %v6008_v50  ;;  %v6980_v36 = vld [vmem:[%s7178_s6] ss:$0 sm:$0xff] }
 0x7f1   : > { %v3492_v61 = vmax.f32 %v3447_v58, 0.0  ;;  %5320 = vmatprep.subr.bf16.mxu1 %v6009_v51 }
 0x7f2   : > { %v3511_v62 = vpack.c.bf16 %v3491_v59, %v3489_v32 }
 0x7f3   : > { %v3512_v63 = vpack.c.bf16 %v3492_v61, %v3490_v60  ;;  %v3450_v0 = vpop.f32.mrb[152].mxu0 }
 0x7f4   : > { %v3451_v1 = vadd.f32 %v3450_v0, %v6920_v42  ;;  %v3452_v2 = vpop.f32.mrb[153].mxu0  ;;  %5321 = vmatpush3.bf16.msra.mxu1 %v6009_v51 }
 0x7f5   : > { %v3453_v3 = vadd.f32 %v3452_v2, %v6923_v43  ;;  %v3454_v4 = vpop.f32.mrb[154].mxu0  ;;  %3791 = vmatprep.mubr.bf16.mxu1 %v3512_v63  ;;  %5322 = vmatprep.subr.bf16.mxu1 %v6010_v54 }
 0x7f6   : > { %v3455_v5 = vadd.f32 %v3454_v4, %v6920_v42  ;;  %v3456_v52 = vpop.f32.mrb[155].mxu0  ;;  %3792 = vmatmul.mubr.bf16.gmra.mrb[116].mxu1 %v3511_v62  ;;  %v3493_v7 = vmax.f32 %v3451_v1, 0.0 }
 0x7f7   : > { %v3457_v6 = vadd.f32 %v3456_v52, %v6923_v43  ;;  %v3494_v8 = vmax.f32 %v3453_v3, 0.0 }
 0x7f8   : > { %v3495_v55 = vmax.f32 %v3455_v5, 0.0  ;;  %5323 = vmatpush3.bf16.msra.mxu1 %v6010_v54 }
 0x7f9   : > { %v3496_v9 = vmax.f32 %v3457_v6, 0.0  ;;  %5324 = vmatprep.subr.bf16.mxu1 %v6011_v53 }
 0x7fa   : > { %v3513_v10 = vpack.c.bf16 %v3495_v55, %v3493_v7 }
 0x7fb   : > { %v3514_v11 = vpack.c.bf16 %v3496_v9, %v3494_v8  ;;  %v3460_v12 = vpop.f32.mrb[156].mxu0 }
 0x7fc   : > { %v3461_v13 = vadd.f32 %v3460_v12, %v6920_v42  ;;  %v3462_v14 = vpop.f32.mrb[157].mxu0  ;;  %5325 = vmatpush3.bf16.msra.mxu1 %v6011_v53 }
 0x7fd   : > { %v3463_v18 = vadd.f32 %v3462_v14, %v6923_v43  ;;  %v3464_v15 = vpop.f32.mrb[158].mxu0  ;;  %3801 = vmatprep.mubr.bf16.mxu1 %v3514_v11  ;;  %5326 = vmatprep.subr.bf16.mxu1 %v6012_v56 }
 0x7fe   : > { %v3465_v19 = vadd.f32 %v3464_v15, %v6920_v42  ;;  %v3466_v16 = vpop.f32.mrb[159].mxu0  ;;  %3802 = vmatmul.mubr.bf16.gmra.mrb[120].mxu1 %v3513_v10  ;;  %v3497_v20 = vmax.f32 %v3461_v13, 0.0  ;;  %v6005_v42 = vld [vmem:[#allocation11 + $0x68] sm:$0xff]  }
 0x7ff   : > { %v3467_v17 = vadd.f32 %v3466_v16, %v6923_v43  ;;  %v3498_v22 = vmax.f32 %v3463_v18, 0.0  ;;  %5296 = vmatprep.subr.bf16.mxu0 %v6005_v42  ;;  %v6007_v43 = vld [vmem:[#allocation11 + $0x78] sm:$0xff]  }
 0x800   : > { %v3499_v21 = vmax.f32 %v3465_v19, 0.0  ;;  %5297 = vmatpush3.bf16.msra.mxu0 %v6005_v42  ;;  %5327 = vmatpush3.bf16.msra.mxu1 %v6012_v56 }
 0x801   : > { %v3500_v27 = vmax.f32 %v3467_v17, 0.0  ;;  %5298 = vmatprep.subr.bf16.mxu0 %v6006_v33  ;;  %5328 = vmatprep.subr.bf16.mxu1 %v6013_v24 }
 0x802   : > { %v3515_v23 = vpack.c.bf16 %v3499_v21, %v3497_v20 }
 0x803   : > { %v3516_v25 = vpack.c.bf16 %v3500_v27, %v3498_v22  ;;  %v5272_v28 = vpop.f32.mrb[160].mxu0 }
 0x804   : > { %v3952_v29 = vpop.f32.mrb[161].mxu0  ;;  %5299 = vmatpush3.bf16.msra.mxu0 %v6006_v33  ;;  %5329 = vmatpush3.bf16.msra.mxu1 %v6013_v24 }
 0x805   : > { %3811 = vmatprep.mubr.bf16.mxu1 %v3516_v25  ;;  %v5273_v30 = vpop.f32.mrb[162].mxu0  ;;  %5300 = vmatprep.subr.bf16.mxu0 %v6007_v43 }
 0x806   : > { %3812 = vmatmul.mubr.bf16.gmra.mrb[124].mxu1 %v3515_v23  ;;  %v3955_v31 = vpop.f32.mrb[163].mxu0 }
 0x808   : > { %5301 = vmatpush3.bf16.msra.mxu0 %v6007_v43 }
 0x80b   : > { %v6957_v34 = vpop.f32.mrb[164].mxu0 }
 0x80c   : > { %v3968_v37 = vpop.f32.mrb[165].mxu0 }
 0x80d   : > { %v6959_v38 = vpop.f32.mrb[166].mxu0 }
 0x80e   : > { %v3971_v39 = vpop.f32.mrb[167].mxu0 }
 0x813   : > { %v6961_v40 = vpop.f32.mrb[168].mxu0 }
 0x814   : > { %v6963_v41 = vpop.f32.mrb[169].mxu0 }
 0x815   : > { %v6965_v44 = vpop.f32.mrb[170].mxu0 }
 0x816   : > { %v6967_v45 = vpop.f32.mrb[171].mxu0 }
 0x81b   : > { %v6969_v46 = vpop.f32.mrb[172].mxu0 }
 0x81c   : > { %v6971_v47 = vpop.f32.mrb[173].mxu0 }
 0x81d   : > { %v6973_v48 = vpop.f32.mrb[174].mxu0 }
 0x81e   : > { %v6975_v49 = vpop.f32.mrb[175].mxu0 }
 0x8a1   : > { %v3743_v57 = vpop.f32.mrb[96].mxu1 }
 0x8a2   : > { %v4015_v26 = vadd.f32 %v3952_v29, %v3743_v57  ;;  %v6982_v58 = vpop.f32.mrb[97].mxu1 }
 0x8a3   : > { %v3747_v32 = vpop.f32.mrb[98].mxu1 }
 0x8a4   : > { %v4038_v59 = vadd.f32 %v6980_v36, %v4015_v26  ;;  %v4016_v60 = vadd.f32 %v3955_v31, %v3747_v32  ;;  %v6985_v61 = vpop.f32.mrb[99].mxu1 }
 0x8a6   : > { %v4039_v62 = vadd.f32 %v6980_v36, %v4016_v60  ;;  %v4054_v63 = vmax.f32 %v4038_v59, 0.0 }
 0x8a8   : > { %v4055_v0 = vmax.f32 %v4039_v62, 0.0 }
 0x8a9   : > { %v3753_v1 = vpop.f32.mrb[100].mxu1 }
 0x8aa   : > { %v4017_v2 = vadd.f32 %v5272_v28, %v3753_v1  ;;  %v6988_v3 = vpop.f32.mrb[101].mxu1  ;;  %v4070_v4 = vpack.c.bf16 %v4055_v0, %v4054_v63 }
 0x8ab   : > { %v3757_v5 = vpop.f32.mrb[102].mxu1 }
 0x8ac   : > { %v4040_v52 = vadd.f32 %v6980_v36, %v4017_v2  ;;  %v4018_v6 = vadd.f32 %v5273_v30, %v3757_v5  ;;  %v6991_v7 = vpop.f32.mrb[103].mxu1  ;;  %5302 = vmatprep.mubr.bf16.mxu0 %v4070_v4 }
 0x8ae   : > { %v4041_v55 = vadd.f32 %v6980_v36, %v4018_v6  ;;  %v4056_v8 = vmax.f32 %v4040_v52, 0.0 }
 0x8b0   : > { %v4057_v9 = vmax.f32 %v4041_v55, 0.0 }
 0x8b1   : > { %v3763_v10 = vpop.f32.mrb[104].mxu1 }
 0x8b2   : > { %v4071_v11 = vpack.c.bf16 %v4057_v9, %v4056_v8  ;;  %v4019_v12 = vadd.f32 %v3968_v37, %v3763_v10  ;;  %v6994_v13 = vpop.f32.mrb[105].mxu1 }
 0x8b3   : > { %v3767_v14 = vpop.f32.mrb[106].mxu1 }
 0x8b4   : > { %v4042_v18 = vadd.f32 %v6980_v36, %v4019_v12  ;;  %v4020_v15 = vadd.f32 %v3971_v39, %v3767_v14  ;;  %v6997_v19 = vpop.f32.mrb[107].mxu1  ;;  %5303 = vmatmul.mubr.bf16.vlgmr.msra.gmra.mrb[176].mxu0 %v4071_v11 }
 0x8b6   : > { %v4043_v16 = vadd.f32 %v6980_v36, %v4020_v15  ;;  %v4058_v17 = vmax.f32 %v4042_v18, 0.0 }
 0x8b8   : > { %v4059_v20 = vmax.f32 %v4043_v16, 0.0 }
 0x8b9   : > { %v3773_v21 = vpop.f32.mrb[108].mxu1 }
 0x8ba   : > { %v4021_v22 = vadd.f32 %v6957_v34, %v3773_v21  ;;  %v7001_v27 = vpop.f32.mrb[109].mxu1  ;;  %v4072_v23 = vpack.c.bf16 %v4059_v20, %v4058_v17 }
 0x8bb   : > { %v3777_v25 = vpop.f32.mrb[110].mxu1 }
 0x8bc   : > { %v4044_v28 = vadd.f32 %v6980_v36, %v4021_v22  ;;  %v4022_v29 = vadd.f32 %v6959_v38, %v3777_v25  ;;  %v7005_v30 = vpop.f32.mrb[111].mxu1  ;;  %5306 = vmatprep.mubr.bf16.mxu0 %v4072_v23  ;;  %v6014_v22 = vld [vmem:[#allocation11 + $0xb0] sm:$0xff]   ;;  %v6016_v23 = vld [vmem:[#allocation11 + $0xc0] sm:$0xff]   ;;  %v6017_v25 = vld [vmem:[#allocation11 + $0xc8] sm:$0xff]  }
 0x8bd   : > { %5330 = vmatprep.subr.bf16.mxu1 %v6014_v22  ;;  %5350 = vmatprep.subr.bf16.mxu0 %v6016_v23 }
 0x8be   : > { %v4045_v35 = vadd.f32 %v6980_v36, %v4022_v29  ;;  %v4060_v31 = vmax.f32 %v4044_v28, 0.0  ;;  %5331 = vmatpush3.bf16.msra.mxu1 %v6014_v22  ;;  %5351 = vmatpush3.bf16.msra.mxu0 %v6016_v23  ;;  %v6020_v28 = vld [vmem:[#allocation11 + $0xe0] sm:$0xff]   ;;  %v6021_v29 = vld [vmem:[#allocation11 + $0xe8] sm:$0xff]  }
 0x8bf   : > { %5352 = vmatprep.subr.bf16.mxu0 %v6017_v25 }
 0x8c0   : > { %v4061_v42 = vmax.f32 %v4045_v35, 0.0  ;;  %v7043_v35 = vld [vmem:[%s7178_s6 + $0x1] ss:$0 sm:$0xff] }
 0x8c1   : > { %v3783_v33 = vpop.f32.mrb[112].mxu1 }
 0x8c2   : > { %v4023_v43 = vadd.f32 %v6963_v41, %v3783_v33  ;;  %v7009_v37 = vpop.f32.mrb[113].mxu1  ;;  %v4073_v34 = vpack.c.bf16 %v4061_v42, %v4060_v31  ;;  %5353 = vmatpush3.bf16.msra.mxu0 %v6017_v25 }
 0x8c3   : > { %v3787_v39 = vpop.f32.mrb[114].mxu1 }
 0x8c4   : > { %v4046_v50 = vadd.f32 %v6980_v36, %v4023_v43  ;;  %v4024_v51 = vadd.f32 %v6967_v45, %v3787_v39  ;;  %v7013_v54 = vpop.f32.mrb[115].mxu1  ;;  %5307 = vmatmul.mubr.bf16.gmra.mrb[180].mxu0 %v4073_v34 }
 0x8c6   : > { %v4047_v38 = vadd.f32 %v6980_v36, %v4024_v51  ;;  %v4062_v53 = vmax.f32 %v4046_v50, 0.0 }
 0x8c8   : > { %v4063_v56 = vmax.f32 %v4047_v38, 0.0 }
 0x8c9   : > { %v3793_v24 = vpop.f32.mrb[116].mxu1 }
 0x8ca   : > { %v4025_v57 = vadd.f32 %v6961_v40, %v3793_v24  ;;  %v7017_v26 = vpop.f32.mrb[117].mxu1  ;;  %v4074_v41 = vpack.c.bf16 %v4063_v56, %v4062_v53 }
 0x8cb   : > { %v3797_v32 = vpop.f32.mrb[118].mxu1 }
 0x8cc   : > { %v4048_v59 = vadd.f32 %v6980_v36, %v4025_v57  ;;  %v4026_v60 = vadd.f32 %v6965_v44, %v3797_v32  ;;  %v7021_v62 = vpop.f32.mrb[119].mxu1  ;;  %5310 = vmatprep.mubr.bf16.mxu0 %v4074_v41 }
 0x8ce   : > { %v4049_v45 = vadd.f32 %v6980_v36, %v4026_v60  ;;  %v4064_v63 = vmax.f32 %v4048_v59, 0.0 }
 0x8d0   : > { %v4065_v0 = vmax.f32 %v4049_v45, 0.0 }
 0x8d1   : > { %v3803_v1 = vpop.f32.mrb[120].mxu1 }
 0x8d2   : > { %v4027_v2 = vadd.f32 %v6971_v47, %v3803_v1  ;;  %v7025_v4 = vpop.f32.mrb[121].mxu1  ;;  %v4075_v40 = vpack.c.bf16 %v4065_v0, %v4064_v63 }
 0x8d3   : > { %v3807_v5 = vpop.f32.mrb[122].mxu1 }
 0x8d4   : > { %v4050_v52 = vadd.f32 %v6980_v36, %v4027_v2  ;;  %v4028_v6 = vadd.f32 %v6975_v49, %v3807_v5  ;;  %v7029_v55 = vpop.f32.mrb[123].mxu1  ;;  %5311 = vmatmul.mubr.bf16.gmra.mrb[184].mxu0 %v4075_v40 }
 0x8d6   : > { %v4051_v44 = vadd.f32 %v6980_v36, %v4028_v6  ;;  %v4066_v8 = vmax.f32 %v4050_v52, 0.0 }
 0x8d8   : > { %v4067_v9 = vmax.f32 %v4051_v44, 0.0 }
 0x8d9   : > { %v3813_v10 = vpop.f32.mrb[124].mxu1 }
 0x8da   : > { %v4029_v11 = vadd.f32 %v6969_v46, %v3813_v10  ;;  %v7033_v12 = vpop.f32.mrb[125].mxu1  ;;  %v4076_v47 = vpack.c.bf16 %v4067_v9, %v4066_v8  ;;  %v6015_v46 = vld [vmem:[#allocation11 + $0xb8] sm:$0xff]  }
 0x8db   : > { %v3817_v14 = vpop.f32.mrb[126].mxu1  ;;  %5332 = vmatprep.subr.bf16.mxu1 %v6015_v46 }
 0x8dc   : > { %v4052_v18 = vadd.f32 %v6980_v36, %v4029_v11  ;;  %v4030_v15 = vadd.f32 %v6973_v48, %v3817_v14  ;;  %v7037_v16 = vpop.f32.mrb[127].mxu1  ;;  %5314 = vmatprep.mubr.bf16.mxu0 %v4076_v47  ;;  %5333 = vmatpush3.bf16.msra.mxu1 %v6015_v46  ;;  %v6018_v48 = vld [vmem:[#allocation11 + $0xd0] sm:$0xff]  }
 0x8dd   : > { %5382 = vmatprep.subr.bf16.mxu1 %v6016_v23  ;;  %5354 = vmatprep.subr.bf16.mxu0 %v6018_v48 }
 0x8de   : > { %v4053_v49 = vadd.f32 %v6980_v36, %v4030_v15  ;;  %v4068_v17 = vmax.f32 %v4052_v18, 0.0  ;;  %v6019_v36 = vld [vmem:[#allocation11 + $0xd8] sm:$0xff]   ;;  %5355 = vmatpush3.bf16.msra.mxu0 %v6018_v48 }
 0x8df   : > { %5356 = vmatprep.subr.bf16.mxu0 %v6019_v36 }
 0x8e0   : > { %v4069_v20 = vmax.f32 %v4053_v49, 0.0 }
 0x8e2   : > { %v4077_v21 = vpack.c.bf16 %v4069_v20, %v4068_v17  ;;  %5357 = vmatpush3.bf16.msra.mxu0 %v6019_v36 }
 0x8e3   : > { %5358 = vmatprep.subr.bf16.mxu0 %v6020_v28 }
 0x8e4   : > { %5315 = vmatmul.mubr.bf16.gmra.mrb[188].mxu0 %v4077_v21 }
 0x8e6   : > { %5359 = vmatpush3.bf16.msra.mxu0 %v6020_v28 }
 0x8e7   : > { %5360 = vmatprep.subr.bf16.mxu0 %v6021_v29 }
 0x8ea   : > { %5361 = vmatpush3.bf16.msra.mxu0 %v6021_v29 }
 0x987   : > { %v5304_v31 = vpop.f32.mrb[176].mxu0 }
 0x988   : > { %v4194_v42 = vadd.f32 %v5304_v31, %v7043_v35  ;;  %v4185_v33 = vpop.f32.mrb[177].mxu0 }
 0x989   : > { %v4186_v43 = vadd.f32 %v7043_v35, %v4185_v33  ;;  %v5305_v34 = vpop.f32.mrb[178].mxu0 }
 0x98a   : > { %v4197_v39 = vadd.f32 %v5305_v34, %v7043_v35  ;;  %v4188_v50 = vpop.f32.mrb[179].mxu0  ;;  %v4250_v38 = vmax.f32 %v4194_v42, 0.0 }
 0x98b   : > { %v4189_v51 = vadd.f32 %v7043_v35, %v4188_v50  ;;  %v4248_v56 = vmax.f32 %v4186_v43, 0.0 }
 0x98c   : > { %v4251_v53 = vmax.f32 %v4197_v39, 0.0 }
 0x98d   : > { %v4249_v24 = vmax.f32 %v4189_v51, 0.0 }
 0x98e   : > { %v4265_v57 = vpack.c.bf16 %v4251_v53, %v4250_v38  ;;  %v6022_v53 = vld [vmem:[#allocation11 + $0xf0] sm:$0xff]  }
 0x98f   : > { %v4264_v41 = vpack.c.bf16 %v4249_v24, %v4248_v56  ;;  %5362 = vmatprep.subr.bf16.mxu0 %v6022_v53  ;;  %v6023_v56 = vld [vmem:[#allocation11 + $0xf8] sm:$0xff]  }
 0x990   : > { %5363 = vmatpush3.bf16.msra.mxu0 %v6022_v53 }
 0x991   : > { %5334 = vmatprep.mubr.bf16.mxu1 %v4264_v41  ;;  %5364 = vmatprep.subr.bf16.mxu0 %v6023_v56 }
 0x992   : > { %5335 = vmatmul.mubr.bf16.vlgmr.msra.gmra.mrb[128].mxu1 %v4265_v57 }
 0x993   : > { %5390 = vmatpush3.bf16.msra.mxu1 %v6016_v23 }
 0x994   : > { %5383 = vmatprep.subr.bf16.mxu1 %v6017_v25  ;;  %5365 = vmatpush3.bf16.msra.mxu0 %v6023_v56 }
 0x997   : > { %v5308_v32 = vpop.f32.mrb[180].mxu0  ;;  %5391 = vmatpush3.bf16.msra.mxu1 %v6017_v25 }
 0x998   : > { %v4210_v59 = vadd.f32 %v5308_v32, %v7043_v35  ;;  %v4201_v60 = vpop.f32.mrb[181].mxu0  ;;  %5384 = vmatprep.subr.bf16.mxu1 %v6018_v48 }
 0x999   : > { %v4202_v45 = vadd.f32 %v7043_v35, %v4201_v60  ;;  %v5309_v63 = vpop.f32.mrb[182].mxu0 }
 0x99a   : > { %v4213_v0 = vadd.f32 %v5309_v63, %v7043_v35  ;;  %v4204_v1 = vpop.f32.mrb[183].mxu0  ;;  %v4254_v40 = vmax.f32 %v4210_v59, 0.0 }
 0x99b   : > { %v4205_v2 = vadd.f32 %v7043_v35, %v4204_v1  ;;  %5392 = vmatpush3.bf16.msra.mxu1 %v6018_v48  ;;  %v4252_v52 = vmax.f32 %v4202_v45, 0.0 }
 0x99c   : > { %v4255_v5 = vmax.f32 %v4213_v0, 0.0  ;;  %5385 = vmatprep.subr.bf16.mxu1 %v6019_v36 }
 0x99d   : > { %v4253_v6 = vmax.f32 %v4205_v2, 0.0 }
 0x99e   : > { %v4267_v44 = vpack.c.bf16 %v4255_v5, %v4254_v40 }
 0x99f   : > { %v4266_v8 = vpack.c.bf16 %v4253_v6, %v4252_v52  ;;  %5393 = vmatpush3.bf16.msra.mxu1 %v6019_v36 }
 0x9a0   : > { %5386 = vmatprep.subr.bf16.mxu1 %v6020_v28 }
 0x9a1   : > { %5338 = vmatprep.mubr.bf16.mxu1 %v4266_v8 }
 0x9a2   : > { %5339 = vmatmul.mubr.bf16.gmra.mrb[132].mxu1 %v4267_v44 }
 0x9a3   : > { %5394 = vmatpush3.bf16.msra.mxu1 %v6020_v28 }
 0x9a4   : > { %5387 = vmatprep.subr.bf16.mxu1 %v6021_v29 }
 0x9a7   : > { %v5312_v9 = vpop.f32.mrb[184].mxu0  ;;  %5395 = vmatpush3.bf16.msra.mxu1 %v6021_v29 }
 0x9a8   : > { %v4226_v10 = vadd.f32 %v5312_v9, %v7043_v35  ;;  %v4217_v11 = vpop.f32.mrb[185].mxu0  ;;  %5388 = vmatprep.subr.bf16.mxu1 %v6022_v53 }
 0x9a9   : > { %v4218_v47 = vadd.f32 %v7043_v35, %v4217_v11  ;;  %v5313_v14 = vpop.f32.mrb[186].mxu0 }
 0x9aa   : > { %v4229_v18 = vadd.f32 %v5313_v14, %v7043_v35  ;;  %v4220_v15 = vpop.f32.mrb[187].mxu0  ;;  %v4258_v17 = vmax.f32 %v4226_v10, 0.0 }
 0x9ab   : > { %v4221_v49 = vadd.f32 %v7043_v35, %v4220_v15  ;;  %v4256_v21 = vmax.f32 %v4218_v47, 0.0  ;;  %5396 = vmatpush3.bf16.msra.mxu1 %v6022_v53 }
 0x9ac   : > { %v4259_v20 = vmax.f32 %v4229_v18, 0.0  ;;  %5389 = vmatprep.subr.bf16.mxu1 %v6023_v56 }
 0x9ad   : > { %v4257_v22 = vmax.f32 %v4221_v49, 0.0 }
 0x9ae   : > { %v4269_v46 = vpack.c.bf16 %v4259_v20, %v4258_v17 }
 0x9af   : > { %v4268_v23 = vpack.c.bf16 %v4257_v22, %v4256_v21  ;;  %5397 = vmatpush3.bf16.msra.mxu1 %v6023_v56 }
 0x9b1   : > { %5342 = vmatprep.mubr.bf16.mxu1 %v4268_v23 }
 0x9b2   : > { %5343 = vmatmul.mubr.bf16.gmra.mrb[136].mxu1 %v4269_v46 }
 0x9b7   : > { %v5316_v25 = vpop.f32.mrb[188].mxu0 }
 0x9b8   : > { %v4242_v48 = vadd.f32 %v5316_v25, %v7043_v35  ;;  %v4233_v36 = vpop.f32.mrb[189].mxu0 }
 0x9b9   : > { %v4234_v28 = vadd.f32 %v7043_v35, %v4233_v36  ;;  %v5317_v29 = vpop.f32.mrb[190].mxu0 }
 0x9ba   : > { %v4245_v31 = vadd.f32 %v5317_v29, %v7043_v35  ;;  %v4236_v42 = vpop.f32.mrb[191].mxu0  ;;  %v4262_v43 = vmax.f32 %v4242_v48, 0.0 }
 0x9bb   : > { %v4237_v33 = vadd.f32 %v7043_v35, %v4236_v42  ;;  %v4260_v39 = vmax.f32 %v4234_v28, 0.0  ;;  %v5163_v35 = vld [vmem:[%s7178_s6 + $0x2] ss:$0 sm:$0xff] }
 0x9bc   : > { %v4263_v34 = vmax.f32 %v4245_v31, 0.0 }
 0x9bd   : > { %v4261_v50 = vmax.f32 %v4237_v33, 0.0 }
 0x9be   : > { %v4271_v51 = vpack.c.bf16 %v4263_v34, %v4262_v43 }
 0x9bf   : > { %v4270_v38 = vpack.c.bf16 %v4261_v50, %v4260_v39 }
 0x9c1   : > { %5346 = vmatprep.mubr.bf16.mxu1 %v4270_v38 }
 0x9c2   : > { %5347 = vmatmul.mubr.bf16.gmra.mrb[140].mxu1 %v4271_v51 }
 0xa65   : > { %v5336_v24 = vpop.f32.mrb[128].mxu1 }
 0xa66   : > { %v4388_v57 = vadd.f32 %v5336_v24, %v5163_v35  ;;  %v4379_v41 = vpop.f32.mrb[129].mxu1 }
 0xa67   : > { %v4380_v32 = vadd.f32 %v5163_v35, %v4379_v41  ;;  %v5337_v59 = vpop.f32.mrb[130].mxu1 }
 0xa68   : > { %v4391_v60 = vadd.f32 %v5337_v59, %v5163_v35  ;;  %v4382_v45 = vpop.f32.mrb[131].mxu1  ;;  %v4444_v0 = vmax.f32 %v4388_v57, 0.0 }
 0xa69   : > { %v4383_v63 = vadd.f32 %v5163_v35, %v4382_v45  ;;  %v4442_v2 = vmax.f32 %v4380_v32, 0.0 }
 0xa6a   : > { %v4445_v1 = vmax.f32 %v4391_v60, 0.0 }
 0xa6b   : > { %v4443_v40 = vmax.f32 %v4383_v63, 0.0 }
 0xa6c   : > { %v4459_v5 = vpack.c.bf16 %v4445_v1, %v4444_v0 }
 0xa6d   : > { %v4458_v52 = vpack.c.bf16 %v4443_v40, %v4442_v2  ;;  %v7067_v2 = vld [vmem:[%s7178_s6 + $0x3] ss:$0 sm:$0xff] }
 0xa6f   : > { %5366 = vmatprep.mubr.bf16.mxu0 %v4458_v52 }
 0xa70   : > { %5367 = vmatmul.mubr.bf16.vlgmr.msra.gmra.mrb[192].mxu0 %v4459_v5 }
 0xa75   : > { %v5340_v6 = vpop.f32.mrb[132].mxu1 }
 0xa76   : > { %v4404_v44 = vadd.f32 %v5340_v6, %v5163_v35  ;;  %v4395_v8 = vpop.f32.mrb[133].mxu1 }
 0xa77   : > { %v4396_v9 = vadd.f32 %v5163_v35, %v4395_v8  ;;  %v5341_v10 = vpop.f32.mrb[134].mxu1 }
 0xa78   : > { %v4407_v11 = vadd.f32 %v5341_v10, %v5163_v35  ;;  %v4398_v47 = vpop.f32.mrb[135].mxu1  ;;  %v4448_v18 = vmax.f32 %v4404_v44, 0.0 }
 0xa79   : > { %v4399_v14 = vadd.f32 %v5163_v35, %v4398_v47  ;;  %v4446_v49 = vmax.f32 %v4396_v9, 0.0 }
 0xa7a   : > { %v4449_v15 = vmax.f32 %v4407_v11, 0.0 }
 0xa7b   : > { %v4447_v17 = vmax.f32 %v4399_v14, 0.0 }
 0xa7c   : > { %v4461_v20 = vpack.c.bf16 %v4449_v15, %v4448_v18 }
 0xa7d   : > { %v4460_v21 = vpack.c.bf16 %v4447_v17, %v4446_v49 }
 0xa7f   : > { %5370 = vmatprep.mubr.bf16.mxu0 %v4460_v21 }
 0xa80   : > { %5371 = vmatmul.mubr.bf16.gmra.mrb[196].mxu0 %v4461_v20 }
 0xa85   : > { %v5344_v22 = vpop.f32.mrb[136].mxu1 }
 0xa86   : > { %v4420_v46 = vadd.f32 %v5344_v22, %v5163_v35  ;;  %v4411_v23 = vpop.f32.mrb[137].mxu1 }
 0xa87   : > { %v4412_v25 = vadd.f32 %v5163_v35, %v4411_v23  ;;  %v5345_v48 = vpop.f32.mrb[138].mxu1 }
 0xa88   : > { %v4423_v36 = vadd.f32 %v5345_v48, %v5163_v35  ;;  %v4414_v28 = vpop.f32.mrb[139].mxu1  ;;  %v4452_v31 = vmax.f32 %v4420_v46, 0.0 }
 0xa89   : > { %v4415_v29 = vadd.f32 %v5163_v35, %v4414_v28  ;;  %v4450_v33 = vmax.f32 %v4412_v25, 0.0 }
 0xa8a   : > { %v4453_v42 = vmax.f32 %v4423_v36, 0.0 }
 0xa8b   : > { %v4451_v43 = vmax.f32 %v4415_v29, 0.0 }
 0xa8c   : > { %v4463_v34 = vpack.c.bf16 %v4453_v42, %v4452_v31 }
 0xa8d   : > { %v4462_v39 = vpack.c.bf16 %v4451_v43, %v4450_v33 }
 0xa8f   : > { %5374 = vmatprep.mubr.bf16.mxu1 %v4462_v39 }
 0xa90   : > { %5375 = vmatmul.mubr.bf16.vlgmr.msra.gmra.mrb[144].mxu1 %v4463_v34 }
 0xa95   : > { %v5348_v50 = vpop.f32.mrb[140].mxu1 }
 0xa96   : > { %v4436_v51 = vadd.f32 %v5348_v50, %v5163_v35  ;;  %v4427_v38 = vpop.f32.mrb[141].mxu1 }
 0xa97   : > { %v4428_v53 = vadd.f32 %v5163_v35, %v4427_v38  ;;  %v5349_v56 = vpop.f32.mrb[142].mxu1 }
 0xa98   : > { %v4439_v24 = vadd.f32 %v5349_v56, %v5163_v35  ;;  %v4430_v57 = vpop.f32.mrb[143].mxu1  ;;  %v4456_v32 = vmax.f32 %v4436_v51, 0.0 }
 0xa99   : > { %v4431_v41 = vadd.f32 %v5163_v35, %v4430_v57  ;;  %v4454_v60 = vmax.f32 %v4428_v53, 0.0 }
 0xa9a   : > { %v4457_v59 = vmax.f32 %v4439_v24, 0.0 }
 0xa9b   : > { %v4455_v45 = vmax.f32 %v4431_v41, 0.0 }
 0xa9c   : > { %v4465_v63 = vpack.c.bf16 %v4457_v59, %v4456_v32 }
 0xa9d   : > { %v4464_v0 = vpack.c.bf16 %v4455_v45, %v4454_v60 }
 0xa9f   : > { %5378 = vmatprep.mubr.bf16.mxu1 %v4464_v0 }
 0xaa0   : > { %5379 = vmatmul.mubr.bf16.gmra.mrb[148].mxu1 %v4465_v63 }
 0xb43   : > { %v5368_v1 = vpop.f32.mrb[192].mxu0 }
 0xb44   : > { %v4630_v40 = vadd.f32 %v5368_v1, %v6988_v3  ;;  %v4565_v5 = vpop.f32.mrb[193].mxu0 }
 0xb45   : > { %v4628_v35 = vadd.f32 %v4565_v5, %v6982_v58  ;;  %v5369_v52 = vpop.f32.mrb[194].mxu0 }
 0xb46   : > { %v4654_v6 = vadd.f32 %v7067_v2, %v4630_v40  ;;  %v4631_v44 = vadd.f32 %v5369_v52, %v6991_v7  ;;  %v4568_v8 = vpop.f32.mrb[195].mxu0 }
 0xb47   : > { %v4652_v9 = vadd.f32 %v7067_v2, %v4628_v35  ;;  %v4629_v10 = vadd.f32 %v4568_v8, %v6985_v61 }
 0xb48   : > { %4670 = vst [vmem:[%s7077_s17 + $0x10] sm:$0xff] %v4654_v6  ;;  %v4655_v58 = vadd.f32 %v7067_v2, %v4631_v44 }
 0xb49   : > { %4668 = vst [vmem:[%s7077_s17] sm:$0xff] %v4652_v9  ;;  %v4653_v3 = vadd.f32 %v7067_v2, %v4629_v10 }
 0xb4a   : > { %4671 = vst [vmem:[%s7077_s17 + $0x18] sm:$0xff] %v4655_v58 }
 0xb4b   : > { %4669 = vst [vmem:[%s7077_s17 + $0x8] sm:$0xff] %v4653_v3 }
 0xb53   : > { %v5372_v61 = vpop.f32.mrb[196].mxu0 }
 0xb54   : > { %v4634_v7 = vadd.f32 %v5372_v61, %v7001_v27  ;;  %v4581_v11 = vpop.f32.mrb[197].mxu0 }
 0xb55   : > { %v4632_v47 = vadd.f32 %v4581_v11, %v6994_v13  ;;  %v5373_v14 = vpop.f32.mrb[198].mxu0 }
 0xb56   : > { %v4658_v18 = vadd.f32 %v7067_v2, %v4634_v7  ;;  %v4635_v15 = vadd.f32 %v5373_v14, %v7005_v30  ;;  %v4584_v49 = vpop.f32.mrb[199].mxu0 }
 0xb57   : > { %v4656_v17 = vadd.f32 %v7067_v2, %v4632_v47  ;;  %v4633_v20 = vadd.f32 %v4584_v49, %v6997_v19 }
 0xb58   : > { %4674 = vst [vmem:[%s7077_s17 + $0x30] sm:$0xff] %v4658_v18  ;;  %v4659_v21 = vadd.f32 %v7067_v2, %v4635_v15 }
 0xb59   : > { %4672 = vst [vmem:[%s7077_s17 + $0x20] sm:$0xff] %v4656_v17  ;;  %v4657_v27 = vadd.f32 %v7067_v2, %v4633_v20 }
 0xb5a   : > { %4675 = vst [vmem:[%s7077_s17 + $0x38] sm:$0xff] %v4659_v21 }
 0xb5b   : > { %4673 = vst [vmem:[%s7077_s17 + $0x28] sm:$0xff] %v4657_v27 }
 0xb63   : > { %v5376_v13 = vpop.f32.mrb[144].mxu1 }
 0xb64   : > { %v4638_v30 = vadd.f32 %v5376_v13, %v7017_v26  ;;  %v4597_v22 = vpop.f32.mrb[145].mxu1 }
 0xb65   : > { %v4636_v46 = vadd.f32 %v4597_v22, %v7009_v37  ;;  %v5377_v23 = vpop.f32.mrb[146].mxu1 }
 0xb66   : > { %v4662_v19 = vadd.f32 %v7067_v2, %v4638_v30  ;;  %v4639_v25 = vadd.f32 %v5377_v23, %v7021_v62  ;;  %v4600_v48 = vpop.f32.mrb[147].mxu1 }
 0xb67   : > { %v4660_v36 = vadd.f32 %v7067_v2, %v4636_v46  ;;  %v4637_v28 = vadd.f32 %v4600_v48, %v7013_v54 }
 0xb68   : > { %4678 = vst [vmem:[%s7077_s17 + $0x50] sm:$0xff] %v4662_v19  ;;  %v4663_v29 = vadd.f32 %v7067_v2, %v4639_v25 }
 0xb69   : > { %4676 = vst [vmem:[%s7077_s17 + $0x40] sm:$0xff] %v4660_v36  ;;  %v4661_v26 = vadd.f32 %v7067_v2, %v4637_v28 }
 0xb6a   : > { %4679 = vst [vmem:[%s7077_s17 + $0x58] sm:$0xff] %v4663_v29 }
 0xb6b   : > { %4677 = vst [vmem:[%s7077_s17 + $0x48] sm:$0xff] %v4661_v26 }
 0xb73   : > { %v5380_v37 = vpop.f32.mrb[148].mxu1 }
 0xb74   : > { %v4642_v31 = vadd.f32 %v5380_v37, %v7033_v12  ;;  %v4613_v62 = vpop.f32.mrb[149].mxu1 }
 0xb75   : > { %v4640_v42 = vadd.f32 %v4613_v62, %v7025_v4  ;;  %v5381_v33 = vpop.f32.mrb[150].mxu1 }
 0xb76   : > { %v4666_v54 = vadd.f32 %v7067_v2, %v4642_v31  ;;  %v4643_v43 = vadd.f32 %v5381_v33, %v7037_v16  ;;  %v4616_v34 = vpop.f32.mrb[151].mxu1 }
 0xb77   : > { %v4664_v39 = vadd.f32 %v7067_v2, %v4640_v42  ;;  %v4641_v50 = vadd.f32 %v4616_v34, %v7029_v55 }
 0xb78   : > { %4682 = vst [vmem:[%s7077_s17 + $0x70] sm:$0xff] %v4666_v54  ;;  %v4667_v12 = vadd.f32 %v7067_v2, %v4643_v43 }
 0xb79   : > { %4680 = vst [vmem:[%s7077_s17 + $0x60] sm:$0xff] %v4664_v39  ;;  %v4665_v4 = vadd.f32 %v7067_v2, %v4641_v50 }
 0xb7a   : > { %4683 = vst [vmem:[%s7077_s17 + $0x78] sm:$0xff] %v4667_v12 }
 0xb7b   : > { %4681 = vst [vmem:[%s7077_s17 + $0x68] sm:$0xff] %v4665_v4 }
 0xb7c   : > { %6215 = shalt.err (!%p6212_p8)
}
 0xb7d   : > { %s6216_s19 = scalar_lea.hbm %s7122_s1, 2048  ;;  %s6220_s12 = scalar_lea.hbm %s7179_s7, 4096 }
 0xb7e   : > { %p6217_p6 = scmp.ne.s32.totalorder %s7122_s1, %s6216_s19  ;;  %p6221_p3 = scmp.lt.u32.totalorder %s7122_s1, %s7179_s7 }
 0xb7f   : > { %p6222_p5 = scmp.lt.u32.totalorder %s6220_s12, %s6216_s19  ;;  %p6224_p7 = scmp.lt.u32.totalorder %s6216_s19, %s7122_s1 }
 0xb80   : > { %p6218_p10 = pnand %p6217_p6, %p7206_p4 }
 0xb81   : > { %p6223_p9 = por %p6222_p5, %p6221_p3 }
 0xb82   : > { %p6219_p11 = pneg %p6218_p10 }
 0xb83   : > { %p6225_p12 = por %p6224_p7, %p6223_p9 }
 0xb85   : > { %p6226_p1 = pnand %p6225_p12, %p6219_p11 }
 0xb87   : > { %6229 = shalt.err (!%p6226_p1)
}
 0xb88   : > { %s6296_s20 = smov 128   ;;  %s6297_s10 = smov 8  }
 0xb89   : > { %5452 = dma.vmem_to_hbm [thread:$0]  (%p7206_p4), %s7124_s14, 2048, %s7122_s1, %s4685_s30, %s6296_s20, %s6296_s20, %s6297_s10  }
 0xb8a PF: > { %s4713_s8 = sand.u32 1, %s6268_s24   ;;  %p7207_p13 = scmp.ne.s32.totalorder %s7197_s15, 0 }
 0xb8b   : > { %p7208_p0 = scmp.ge.s32.totalorder %s6280_s27, 2  ;;  %s4714_s23 = scalar_lea.sflag [#allocation4], %s4713_s8 }
 0xb8d   : > { %p5475_p2 = pnand %p7208_p0, %p7207_p13 }
 0xb8f   : > { %6263 = dma.done.wait (!%p5475_p2), %s4714_s23, 2048  }
 0xb90   : > { %6265 = vsyncadd (!%p5475_p2), %s4714_s23, 4294965248  ;;  %p23_p8 = scmp.ge.s32.totalorder %s6505_s28, 4   ;;  %s7209_s24 = smov %s6272_s25 }
 0xb91   : > { %s7210_s25 = smov %s6276_s26  ;;  %s7211_s26 = smov %s6517_s9 }
 0xb92   : > { %s7212_s27 = smov %s6505_s28  ;;  %25 = sbr.rel (!%p23_p8) target bundleno = 10 (0xa), region = 133 }
 0xb99   :  { %4719 = vsyncpa [#allocation3], 1 }
 0xb9a   :  { %4721 = vsyncpa [#allocation3 + $0x1], 1 }
 0xb9b   :  { %4722 = vsyncpa [#allocation6], 1 }
 0xb9c   :  { %4723 = vsyncpa [#allocation9], 1 }
 0xb9d   :  { %4724 = vsyncpa [#allocation12], 1 }
 0xb9e   :  { %4725 = vsyncpa [#allocation4], 1 }
 0xb9f   :  { %4727 = vsyncpa [#allocation4 + $0x1], 1 }

</bundles_post_ra>
